<compile_context>
chip_gen: v6e
topology: v6e:2x2x1
jax: 0.10.0
libtpu: 0.0.40
codegen_flags: <defaults>
</compile_context>

<pallas_src>
import functools
import math

import jax
import jax.numpy as jnp
from jax import lax
from jax.experimental import pallas as pl
from jax.experimental.pallas import tpu as pltpu


def _sigmoid_f32(x):
    # sigmoid(x) == 0.5 * tanh(0.5 * x) + 0.5 : one EUP transcendental
    # (tanh) instead of exp + reciprocal.
    return 0.5 * jnp.tanh(0.5 * x) + 0.5


def convlstm_cell_kernel(xp_ref, w_ref, b_ref, cprev_ref, h_ref, c_ref, *,
                         KH, KW, hidden_dim, batch_block):
    """One grid step = `batch_block` images.

    xp_ref:    (bb, H+KH-1, W+KW-1, Cin)  zero-padded concat(input, h_prev), NHWC, bf16
    w_ref:     (KH*KW, 4*hidden, Cin)     conv weight as per-tap matmul slabs, bf16
    b_ref:     (4*hidden, 1)              conv bias (lane-broadcast column), f32
    cprev_ref: (bb, hidden, H*W)          previous cell state, channels-major, f32
    h_ref:     (bb, hidden, H*W)          output hidden state, channels-major, f32
    c_ref:     (bb, hidden, H*W)          output cell state, channels-major, f32
    """
    bb, HP, WP, Cin = xp_ref.shape
    H = HP - (KH - 1)
    W = WP - (KW - 1)
    R = H * W
    hd = hidden_dim

    # Bias folded into the matmul accumulator init (hoisted out of all loops).
    bias_cm = jnp.broadcast_to(b_ref[...], (4 * hd, R))             # (4*hd, R) f32

    # "NT" contraction: (4*hd, Cin) x (R, Cin) -> (4*hd, R), channels-major,
    # so no output transpose is needed.
    dn = (((1,), (1,)), ((), ()))

    for b in range(batch_block):
        xp = xp_ref[b]                                              # (HP, WP, Cin) bf16

        # Convolution as KH*KW accumulated MXU matmuls (K = Cin per tap):
        # no lane-misaligned im2col concat, bf16 operands, f32 accumulate.
        acc = bias_cm
        for kh in range(KH):
            for kw in range(KW):
                tap = xp[kh:kh + H, kw:kw + W, :].reshape(R, Cin)   # (R, Cin) bf16
                acc = acc + lax.dot_general(
                    w_ref[kh * KW + kw], tap, dn,
                    preferred_element_type=jnp.float32)             # (4*hd, R) f32

        # Each gate is an aligned sublane-row group of the channels-major acc;
        # all elementwise math stays f32 (v5e has no bf16 VPU/EUP).
        cc_i = acc[0 * hd:1 * hd, :]
        cc_f = acc[1 * hd:2 * hd, :]
        cc_o = acc[2 * hd:3 * hd, :]
        cc_g = acc[3 * hd:4 * hd, :]

        c_prev = cprev_ref[b]                                       # (hd, R) f32

        i_gate = _sigmoid_f32(cc_i)
        f_gate = _sigmoid_f32(cc_f)
        g_gate = jnp.tanh(cc_g)
        c_cur = f_gate * c_prev + i_gate * g_gate
        o_gate = _sigmoid_f32(cc_o)
        h_cur = o_gate * jnp.tanh(c_cur)

        h_ref[b] = h_cur
        c_ref[b] = c_cur


def pack_conv_weight(weight_oihw, kernel_size):
    """OIHW -> (KH*KW, Cout, Cin) bf16 per-tap matmul slabs (tap t = kh*KW+kw),
    matching the in-kernel NT dot_general.  Call once per parameter set,
    outside any timestep loop."""
    KH, KW = kernel_size
    Cout, Cin = weight_oihw.shape[0], weight_oihw.shape[1]
    w = jnp.transpose(weight_oihw.astype(jnp.float32), (2, 3, 0, 1))  # (KH,KW,Cout,Cin)
    return w.reshape(KH * KW, Cout, Cin).astype(jnp.bfloat16)


def _pick_batch_block(n, max_block=4):
    """Largest divisor of n (<= max_block) that keeps the grid length >= 2,
    so v7x's two TensorCores both get work while amortizing per-step overhead."""
    bb = 1
    for cand in range(2, max_block + 1):
        if n % cand == 0 and n // cand >= 2:
            bb = cand
    return bb


def conv_lstm_cell_forward(x_nchw, h_prev_nchw, c_prev_nchw,
                           packed_weight, bias, kernel_size):
    """ConvLSTMCell.forward semantics (NCHW in / NCHW out), Pallas kernel inside."""
    KH, KW = kernel_size
    N, _, H, W = x_nchw.shape
    hd = h_prev_nchw.shape[1]
    Cin = x_nchw.shape[1] + hd
    Cout = 4 * hd
    R = H * W
    ph, pw = KH // 2, KW // 2
    HP, WP = H + KH - 1, W + KW - 1

    bb = _pick_batch_block(N)
    grid = (N // bb,)

    # Channel concat in native NCHW (no transpose), cast to bf16 EARLY (halves
    # the transpose/pad traffic and the per-step input DMA), then one small
    # NCHW->NHWC transpose + zero-pad of the combined tensor feeds the kernel.
    # Outputs come back channels-major, so no output transposes are needed.
    # TODO(synk): for a full ConvLSTM sequence rollout, keep activations in the
    #             kernel-native NHWC / channels-major layouts across timesteps
    #             (and split the weight into its x / h halves) so this per-step
    #             concat/transpose/pad disappears as well.
    combined = jnp.concatenate([x_nchw.astype(jnp.bfloat16),
                                h_prev_nchw.astype(jnp.bfloat16)], axis=1)
    combined_nhwc = jnp.transpose(combined, (0, 2, 3, 1))            # (N,H,W,Cin) bf16
    xp = jnp.pad(combined_nhwc, ((0, 0), (ph, ph), (pw, pw), (0, 0)))

    b_col = bias.astype(jnp.float32).reshape(Cout, 1)
    cprev = c_prev_nchw.astype(jnp.float32).reshape(N, hd, R)        # free reshape

    kern = functools.partial(convlstm_cell_kernel, KH=KH, KW=KW,
                             hidden_dim=hd, batch_block=bb)

    h_cm, c_cm = pl.pallas_call(
        kern,
        out_shape=(jax.ShapeDtypeStruct((N, hd, R), jnp.float32),
                   jax.ShapeDtypeStruct((N, hd, R), jnp.float32)),
        grid=grid,
        in_specs=[
            pl.BlockSpec((bb, HP, WP, Cin), lambda i: (i, 0, 0, 0)),
            pl.BlockSpec((KH * KW, Cout, Cin), lambda i: (0, 0, 0)),
            pl.BlockSpec((Cout, 1), lambda i: (0, 0)),
            pl.BlockSpec((bb, hd, R), lambda i: (i, 0, 0)),
        ],
        out_specs=(
            pl.BlockSpec((bb, hd, R), lambda i: (i, 0, 0)),
            pl.BlockSpec((bb, hd, R), lambda i: (i, 0, 0)),
        ),
        compiler_params=pltpu.CompilerParams(
            dimension_semantics=("parallel",),       # v7x: 2 TCs split the batch
            vmem_limit_bytes=32 * 1024 * 1024,       # explicit; safe on v5e/v6e/v7x
        ),
    )(xp, packed_weight, b_col, cprev)

    # Channels-major (N, hd, H*W) == NCHW up to a free reshape.
    return h_cm.reshape(N, hd, H, W), c_cm.reshape(N, hd, H, W)


def reference_forward(x_nchw, h_prev, c_prev, weight_oihw, bias, kernel_size,
                      hidden_dim):
    """Pure-JAX f32 reference mirroring the PyTorch module."""
    combined = jnp.concatenate([x_nchw, h_prev], axis=1)
    out = jax.lax.conv_general_dilated(
        combined, weight_oihw, window_strides=(1, 1),
        padding=((kernel_size[0] // 2,) * 2, (kernel_size[1] // 2,) * 2),
        dimension_numbers=('NCHW', 'OIHW', 'NCHW'))
    out = out + bias[None, :, None, None]
    cc_i, cc_f, cc_o, cc_g = jnp.split(out, 4, axis=1)
    i = jax.nn.sigmoid(cc_i)
    f = jax.nn.sigmoid(cc_f)
    g = jnp.tanh(cc_g)
    c = f * c_prev + i * g
    o = jax.nn.sigmoid(cc_o)
    h = o * jnp.tanh(c)
    return h, c


if __name__ == "__main__":
    # Module config (small, consistent with ConvLSTMCell defaults)
    batch = 2
    input_dim = 4
    hidden_dim = 32
    height = width = 16
    kernel_size = (3, 3)

    key = jax.random.PRNGKey(0)
    kx, kh, kc, kw = jax.random.split(key, 4)

    x = jax.random.normal(kx, (batch, input_dim, height, width), jnp.float32)
    h_prev = jax.random.normal(kh, (batch, hidden_dim, height, width), jnp.float32)
    c_prev = jax.random.normal(kc, (batch, hidden_dim, height, width), jnp.float32)

    # Deterministic parameter init mirroring reset_parameters():
    # xavier_uniform_ with gain = calculate_gain('tanh') = 5/3, bias zeroed.
    cin = input_dim + hidden_dim
    cout = 4 * hidden_dim
    fan_in = cin * kernel_size[0] * kernel_size[1]
    fan_out = cout * kernel_size[0] * kernel_size[1]
    gain = 5.0 / 3.0
    limit = gain * math.sqrt(6.0 / (fan_in + fan_out))
    conv_weight = jax.random.uniform(
        kw, (cout, cin, kernel_size[0], kernel_size[1]),
        jnp.float32, minval=-limit, maxval=limit)
    conv_bias = jnp.zeros((cout,), jnp.float32)

    # Pack the weight to its per-tap matmul layout ONCE (outside any step loop).
    packed_w = pack_conv_weight(conv_weight, kernel_size)

    h_cur, c_cur = conv_lstm_cell_forward(
        x, h_prev, c_prev, packed_w, conv_bias, kernel_size)
    jax.block_until_ready((h_cur, c_cur))

    h_ref, c_ref = reference_forward(
        x, h_prev, c_prev, conv_weight, conv_bias, kernel_size, hidden_dim)
    jax.block_until_ready((h_ref, c_ref))

    assert h_cur.shape == (batch, hidden_dim, height, width)
    assert c_cur.shape == (batch, hidden_dim, height, width)
    # Tolerance accounts for bf16 MXU operands (f32 accumulate);
    # gate/cell elementwise math is f32.
    assert jnp.allclose(h_cur, h_ref, atol=5e-2, rtol=5e-2)
    assert jnp.allclose(c_cur, c_ref, atol=5e-2, rtol=5e-2)

    print("KERNEL_OK")
</pallas_src>

<mosaic_0001>
module attributes {stable_mosaic.version = 11 : i64} {
  func.func @convlstm_cell_kernel(%arg0: i32, %arg1: memref<1x18x18x36xbf16, #tpu.memory_space<vmem>>, %arg2: memref<9x128x36xbf16, #tpu.memory_space<vmem>>, %arg3: memref<128x1xf32, #tpu.memory_space<vmem>>, %arg4: memref<1x32x256xf32, #tpu.memory_space<vmem>>, %arg5: memref<1x32x256xf32, #tpu.memory_space<vmem>>, %arg6: memref<1x32x256xf32, #tpu.memory_space<vmem>>) attributes {dimension_semantics = [#tpu.dimension_semantics<parallel>], iteration_bounds = array<i64: 2>, scalar_prefetch = 0 : i64, scratch_operands = 0 : i64, tpu.core_type = #tpu.core_type<tc>, window_params = [{transform_indices = @transform_0, window_bounds = array<i64: 1, 18, 18, 36>}, {pipeline_mode = #tpu.pipeline_mode<synchronous>, transform_indices = @transform_1, window_bounds = array<i64: 9, 128, 36>}, {pipeline_mode = #tpu.pipeline_mode<synchronous>, transform_indices = @transform_2, window_bounds = array<i64: 128, 1>}, {transform_indices = @transform_3, window_bounds = array<i64: 1, 32, 256>}, {transform_indices = @transform_4, window_bounds = array<i64: 1, 32, 256>}, {transform_indices = @transform_5, window_bounds = array<i64: 1, 32, 256>}]} {
    %c0 = arith.constant 0 : index
    %c0_0 = arith.constant 0 : index
    %0 = vector.load %arg3[%c0, %c0_0] : memref<128x1xf32, #tpu.memory_space<vmem>>, vector<128x1xf32>
    %1 = vector.shape_cast %0 : vector<128x1xf32> to vector<128x1xf32>
    %2 = vector.broadcast %1 : vector<128x1xf32> to vector<128x256xf32>
    %c0_1 = arith.constant 0 : index
    %c0_2 = arith.constant 0 : index
    %c0_3 = arith.constant 0 : index
    %c0_4 = arith.constant 0 : index
    %3 = vector.load %arg1[%c0_1, %c0_2, %c0_3, %c0_4] : memref<1x18x18x36xbf16, #tpu.memory_space<vmem>>, vector<1x18x18x36xbf16>
    %4 = vector.shape_cast %3 : vector<1x18x18x36xbf16> to vector<18x18x36xbf16>
    %5 = vector.extract_strided_slice %4 {offsets = [0, 0, 0], sizes = [16, 16, 36], strides = [1, 1, 1]} : vector<18x18x36xbf16> to vector<16x16x36xbf16>
    %6 = vector.shape_cast %5 : vector<16x16x36xbf16> to vector<256x36xbf16>
    %c0_5 = arith.constant 0 : index
    %c0_6 = arith.constant 0 : index
    %c0_7 = arith.constant 0 : index
    %7 = vector.load %arg2[%c0_5, %c0_6, %c0_7] : memref<9x128x36xbf16, #tpu.memory_space<vmem>>, vector<1x128x36xbf16>
    %8 = vector.shape_cast %7 : vector<1x128x36xbf16> to vector<128x36xbf16>
    %cst = arith.constant dense<0.000000e+00> : vector<128x256xf32>
    %9 = tpu.matmul %8, %6, %cst {dimension_numbers = #tpu.dot_dimension_numbers<[1], [1], [0], [0], [0, 0, 1, 0], [], []>} : vector<128x36xbf16>, vector<256x36xbf16>, vector<128x256xf32> -> vector<128x256xf32>
    %10 = arith.addf %2, %9 : vector<128x256xf32>
    %11 = vector.extract_strided_slice %4 {offsets = [0, 1, 0], sizes = [16, 16, 36], strides = [1, 1, 1]} : vector<18x18x36xbf16> to vector<16x16x36xbf16>
    %12 = vector.shape_cast %11 : vector<16x16x36xbf16> to vector<256x36xbf16>
    %c1 = arith.constant 1 : index
    %c0_8 = arith.constant 0 : index
    %c0_9 = arith.constant 0 : index
    %13 = vector.load %arg2[%c1, %c0_8, %c0_9] : memref<9x128x36xbf16, #tpu.memory_space<vmem>>, vector<1x128x36xbf16>
    %14 = vector.shape_cast %13 : vector<1x128x36xbf16> to vector<128x36xbf16>
    %cst_10 = arith.constant dense<0.000000e+00> : vector<128x256xf32>
    %15 = tpu.matmul %14, %12, %cst_10 {dimension_numbers = #tpu.dot_dimension_numbers<[1], [1], [0], [0], [0, 0, 1, 0], [], []>} : vector<128x36xbf16>, vector<256x36xbf16>, vector<128x256xf32> -> vector<128x256xf32>
    %16 = arith.addf %10, %15 : vector<128x256xf32>
    %17 = vector.extract_strided_slice %4 {offsets = [0, 2, 0], sizes = [16, 16, 36], strides = [1, 1, 1]} : vector<18x18x36xbf16> to vector<16x16x36xbf16>
    %18 = vector.shape_cast %17 : vector<16x16x36xbf16> to vector<256x36xbf16>
    %c2 = arith.constant 2 : index
    %c0_11 = arith.constant 0 : index
    %c0_12 = arith.constant 0 : index
    %19 = vector.load %arg2[%c2, %c0_11, %c0_12] : memref<9x128x36xbf16, #tpu.memory_space<vmem>>, vector<1x128x36xbf16>
    %20 = vector.shape_cast %19 : vector<1x128x36xbf16> to vector<128x36xbf16>
    %cst_13 = arith.constant dense<0.000000e+00> : vector<128x256xf32>
    %21 = tpu.matmul %20, %18, %cst_13 {dimension_numbers = #tpu.dot_dimension_numbers<[1], [1], [0], [0], [0, 0, 1, 0], [], []>} : vector<128x36xbf16>, vector<256x36xbf16>, vector<128x256xf32> -> vector<128x256xf32>
    %22 = arith.addf %16, %21 : vector<128x256xf32>
    %23 = vector.extract_strided_slice %4 {offsets = [1, 0, 0], sizes = [16, 16, 36], strides = [1, 1, 1]} : vector<18x18x36xbf16> to vector<16x16x36xbf16>
    %24 = vector.shape_cast %23 : vector<16x16x36xbf16> to vector<256x36xbf16>
    %c3 = arith.constant 3 : index
    %c0_14 = arith.constant 0 : index
    %c0_15 = arith.constant 0 : index
    %25 = vector.load %arg2[%c3, %c0_14, %c0_15] : memref<9x128x36xbf16, #tpu.memory_space<vmem>>, vector<1x128x36xbf16>
    %26 = vector.shape_cast %25 : vector<1x128x36xbf16> to vector<128x36xbf16>
    %cst_16 = arith.constant dense<0.000000e+00> : vector<128x256xf32>
    %27 = tpu.matmul %26, %24, %cst_16 {dimension_numbers = #tpu.dot_dimension_numbers<[1], [1], [0], [0], [0, 0, 1, 0], [], []>} : vector<128x36xbf16>, vector<256x36xbf16>, vector<128x256xf32> -> vector<128x256xf32>
    %28 = arith.addf %22, %27 : vector<128x256xf32>
    %29 = vector.extract_strided_slice %4 {offsets = [1, 1, 0], sizes = [16, 16, 36], strides = [1, 1, 1]} : vector<18x18x36xbf16> to vector<16x16x36xbf16>
    %30 = vector.shape_cast %29 : vector<16x16x36xbf16> to vector<256x36xbf16>
    %c4 = arith.constant 4 : index
    %c0_17 = arith.constant 0 : index
    %c0_18 = arith.constant 0 : index
    %31 = vector.load %arg2[%c4, %c0_17, %c0_18] : memref<9x128x36xbf16, #tpu.memory_space<vmem>>, vector<1x128x36xbf16>
    %32 = vector.shape_cast %31 : vector<1x128x36xbf16> to vector<128x36xbf16>
    %cst_19 = arith.constant dense<0.000000e+00> : vector<128x256xf32>
    %33 = tpu.matmul %32, %30, %cst_19 {dimension_numbers = #tpu.dot_dimension_numbers<[1], [1], [0], [0], [0, 0, 1, 0], [], []>} : vector<128x36xbf16>, vector<256x36xbf16>, vector<128x256xf32> -> vector<128x256xf32>
    %34 = arith.addf %28, %33 : vector<128x256xf32>
    %35 = vector.extract_strided_slice %4 {offsets = [1, 2, 0], sizes = [16, 16, 36], strides = [1, 1, 1]} : vector<18x18x36xbf16> to vector<16x16x36xbf16>
    %36 = vector.shape_cast %35 : vector<16x16x36xbf16> to vector<256x36xbf16>
    %c5 = arith.constant 5 : index
    %c0_20 = arith.constant 0 : index
    %c0_21 = arith.constant 0 : index
    %37 = vector.load %arg2[%c5, %c0_20, %c0_21] : memref<9x128x36xbf16, #tpu.memory_space<vmem>>, vector<1x128x36xbf16>
    %38 = vector.shape_cast %37 : vector<1x128x36xbf16> to vector<128x36xbf16>
    %cst_22 = arith.constant dense<0.000000e+00> : vector<128x256xf32>
    %39 = tpu.matmul %38, %36, %cst_22 {dimension_numbers = #tpu.dot_dimension_numbers<[1], [1], [0], [0], [0, 0, 1, 0], [], []>} : vector<128x36xbf16>, vector<256x36xbf16>, vector<128x256xf32> -> vector<128x256xf32>
    %40 = arith.addf %34, %39 : vector<128x256xf32>
    %41 = vector.extract_strided_slice %4 {offsets = [2, 0, 0], sizes = [16, 16, 36], strides = [1, 1, 1]} : vector<18x18x36xbf16> to vector<16x16x36xbf16>
    %42 = vector.shape_cast %41 : vector<16x16x36xbf16> to vector<256x36xbf16>
    %c6 = arith.constant 6 : index
    %c0_23 = arith.constant 0 : index
    %c0_24 = arith.constant 0 : index
    %43 = vector.load %arg2[%c6, %c0_23, %c0_24] : memref<9x128x36xbf16, #tpu.memory_space<vmem>>, vector<1x128x36xbf16>
    %44 = vector.shape_cast %43 : vector<1x128x36xbf16> to vector<128x36xbf16>
    %cst_25 = arith.constant dense<0.000000e+00> : vector<128x256xf32>
    %45 = tpu.matmul %44, %42, %cst_25 {dimension_numbers = #tpu.dot_dimension_numbers<[1], [1], [0], [0], [0, 0, 1, 0], [], []>} : vector<128x36xbf16>, vector<256x36xbf16>, vector<128x256xf32> -> vector<128x256xf32>
    %46 = arith.addf %40, %45 : vector<128x256xf32>
    %47 = vector.extract_strided_slice %4 {offsets = [2, 1, 0], sizes = [16, 16, 36], strides = [1, 1, 1]} : vector<18x18x36xbf16> to vector<16x16x36xbf16>
    %48 = vector.shape_cast %47 : vector<16x16x36xbf16> to vector<256x36xbf16>
    %c7 = arith.constant 7 : index
    %c0_26 = arith.constant 0 : index
    %c0_27 = arith.constant 0 : index
    %49 = vector.load %arg2[%c7, %c0_26, %c0_27] : memref<9x128x36xbf16, #tpu.memory_space<vmem>>, vector<1x128x36xbf16>
    %50 = vector.shape_cast %49 : vector<1x128x36xbf16> to vector<128x36xbf16>
    %cst_28 = arith.constant dense<0.000000e+00> : vector<128x256xf32>
    %51 = tpu.matmul %50, %48, %cst_28 {dimension_numbers = #tpu.dot_dimension_numbers<[1], [1], [0], [0], [0, 0, 1, 0], [], []>} : vector<128x36xbf16>, vector<256x36xbf16>, vector<128x256xf32> -> vector<128x256xf32>
    %52 = arith.addf %46, %51 : vector<128x256xf32>
    %53 = vector.extract_strided_slice %4 {offsets = [2, 2, 0], sizes = [16, 16, 36], strides = [1, 1, 1]} : vector<18x18x36xbf16> to vector<16x16x36xbf16>
    %54 = vector.shape_cast %53 : vector<16x16x36xbf16> to vector<256x36xbf16>
    %c8 = arith.constant 8 : index
    %c0_29 = arith.constant 0 : index
    %c0_30 = arith.constant 0 : index
    %55 = vector.load %arg2[%c8, %c0_29, %c0_30] : memref<9x128x36xbf16, #tpu.memory_space<vmem>>, vector<1x128x36xbf16>
    %56 = vector.shape_cast %55 : vector<1x128x36xbf16> to vector<128x36xbf16>
    %cst_31 = arith.constant dense<0.000000e+00> : vector<128x256xf32>
    %57 = tpu.matmul %56, %54, %cst_31 {dimension_numbers = #tpu.dot_dimension_numbers<[1], [1], [0], [0], [0, 0, 1, 0], [], []>} : vector<128x36xbf16>, vector<256x36xbf16>, vector<128x256xf32> -> vector<128x256xf32>
    %58 = arith.addf %52, %57 : vector<128x256xf32>
    %59 = vector.extract_strided_slice %58 {offsets = [0, 0], sizes = [32, 256], strides = [1, 1]} : vector<128x256xf32> to vector<32x256xf32>
    %60 = vector.extract_strided_slice %58 {offsets = [32, 0], sizes = [32, 256], strides = [1, 1]} : vector<128x256xf32> to vector<32x256xf32>
    %61 = vector.extract_strided_slice %58 {offsets = [64, 0], sizes = [32, 256], strides = [1, 1]} : vector<128x256xf32> to vector<32x256xf32>
    %62 = vector.extract_strided_slice %58 {offsets = [96, 0], sizes = [32, 256], strides = [1, 1]} : vector<128x256xf32> to vector<32x256xf32>
    %c0_32 = arith.constant 0 : index
    %c0_33 = arith.constant 0 : index
    %c0_34 = arith.constant 0 : index
    %63 = vector.load %arg4[%c0_32, %c0_33, %c0_34] : memref<1x32x256xf32, #tpu.memory_space<vmem>>, vector<1x32x256xf32>
    %64 = vector.shape_cast %63 : vector<1x32x256xf32> to vector<32x256xf32>
    %cst_35 = arith.constant 5.000000e-01 : f32
    %65 = vector.broadcast %cst_35 : f32 to vector<32x256xf32>
    %66 = arith.mulf %65, %59 : vector<32x256xf32>
    %67 = math.tanh %66 : vector<32x256xf32>
    %cst_36 = arith.constant 5.000000e-01 : f32
    %68 = vector.broadcast %cst_36 : f32 to vector<32x256xf32>
    %69 = arith.mulf %68, %67 : vector<32x256xf32>
    %cst_37 = arith.constant 5.000000e-01 : f32
    %70 = vector.broadcast %cst_37 : f32 to vector<32x256xf32>
    %71 = arith.addf %69, %70 : vector<32x256xf32>
    %cst_38 = arith.constant 5.000000e-01 : f32
    %72 = vector.broadcast %cst_38 : f32 to vector<32x256xf32>
    %73 = arith.mulf %72, %60 : vector<32x256xf32>
    %74 = math.tanh %73 : vector<32x256xf32>
    %cst_39 = arith.constant 5.000000e-01 : f32
    %75 = vector.broadcast %cst_39 : f32 to vector<32x256xf32>
    %76 = arith.mulf %75, %74 : vector<32x256xf32>
    %cst_40 = arith.constant 5.000000e-01 : f32
    %77 = vector.broadcast %cst_40 : f32 to vector<32x256xf32>
    %78 = arith.addf %76, %77 : vector<32x256xf32>
    %79 = math.tanh %62 : vector<32x256xf32>
    %80 = arith.mulf %78, %64 : vector<32x256xf32>
    %81 = arith.mulf %71, %79 : vector<32x256xf32>
    %82 = arith.addf %80, %81 : vector<32x256xf32>
    %cst_41 = arith.constant 5.000000e-01 : f32
    %83 = vector.broadcast %cst_41 : f32 to vector<32x256xf32>
    %84 = arith.mulf %83, %61 : vector<32x256xf32>
    %85 = math.tanh %84 : vector<32x256xf32>
    %cst_42 = arith.constant 5.000000e-01 : f32
    %86 = vector.broadcast %cst_42 : f32 to vector<32x256xf32>
    %87 = arith.mulf %86, %85 : vector<32x256xf32>
    %cst_43 = arith.constant 5.000000e-01 : f32
    %88 = vector.broadcast %cst_43 : f32 to vector<32x256xf32>
    %89 = arith.addf %87, %88 : vector<32x256xf32>
    %90 = math.tanh %82 : vector<32x256xf32>
    %91 = arith.mulf %89, %90 : vector<32x256xf32>
    %c0_44 = arith.constant 0 : index
    %c0_45 = arith.constant 0 : index
    %c0_46 = arith.constant 0 : index
    %92 = vector.load %arg5[%c0_44, %c0_45, %c0_46] : memref<1x32x256xf32, #tpu.memory_space<vmem>>, vector<1x32x256xf32>
    %93 = vector.shape_cast %92 : vector<1x32x256xf32> to vector<32x256xf32>
    %94 = vector.shape_cast %91 : vector<32x256xf32> to vector<1x32x256xf32>
    tpu.vector_store %arg5[%c0_44, %c0_45, %c0_46], %94 {strides = array<i32>} : memref<1x32x256xf32, #tpu.memory_space<vmem>>, vector<1x32x256xf32>,
    %c0_47 = arith.constant 0 : index
    %c0_48 = arith.constant 0 : index
    %c0_49 = arith.constant 0 : index
    %95 = vector.load %arg6[%c0_47, %c0_48, %c0_49] : memref<1x32x256xf32, #tpu.memory_space<vmem>>, vector<1x32x256xf32>
    %96 = vector.shape_cast %95 : vector<1x32x256xf32> to vector<32x256xf32>
    %97 = vector.shape_cast %82 : vector<32x256xf32> to vector<1x32x256xf32>
    tpu.vector_store %arg6[%c0_47, %c0_48, %c0_49], %97 {strides = array<i32>} : memref<1x32x256xf32, #tpu.memory_space<vmem>>, vector<1x32x256xf32>,
    return
  }
  func.func @transform_0(%arg0: i32) -> (i32, i32, i32, i32) {
    %c0_i32 = arith.constant 0 : i32
    %c0_i32_0 = arith.constant 0 : i32
    %c0_i32_1 = arith.constant 0 : i32
    %c0_i32_2 = arith.constant 0 : i32
    return %arg0, %c0_i32, %c0_i32_0, %c0_i32_1 : i32, i32, i32, i32
  }
  func.func @transform_1(%arg0: i32) -> (i32, i32, i32) {
    %c0_i32 = arith.constant 0 : i32
    %c0_i32_0 = arith.constant 0 : i32
    %c0_i32_1 = arith.constant 0 : i32
    %c0_i32_2 = arith.constant 0 : i32
    return %c0_i32, %c0_i32_0, %c0_i32_1 : i32, i32, i32
  }
  func.func @transform_2(%arg0: i32) -> (i32, i32) {
    %c0_i32 = arith.constant 0 : i32
    %c0_i32_0 = arith.constant 0 : i32
    %c0_i32_1 = arith.constant 0 : i32
    return %c0_i32, %c0_i32_0 : i32, i32
  }
  func.func @transform_3(%arg0: i32) -> (i32, i32, i32) {
    %c0_i32 = arith.constant 0 : i32
    %c0_i32_0 = arith.constant 0 : i32
    %c0_i32_1 = arith.constant 0 : i32
    return %arg0, %c0_i32, %c0_i32_0 : i32, i32, i32
  }
  func.func @transform_4(%arg0: i32) -> (i32, i32, i32) {
    %c0_i32 = arith.constant 0 : i32
    %c0_i32_0 = arith.constant 0 : i32
    %c0_i32_1 = arith.constant 0 : i32
    return %arg0, %c0_i32, %c0_i32_0 : i32, i32, i32
  }
  func.func @transform_5(%arg0: i32) -> (i32, i32, i32) {
    %c0_i32 = arith.constant 0 : i32
    %c0_i32_0 = arith.constant 0 : i32
    %c0_i32_1 = arith.constant 0 : i32
    return %arg0, %c0_i32, %c0_i32_0 : i32, i32, i32
  }
}

</mosaic_0001>

<bundles_post_ra>
// kernel: tpu_custom_call.1
= control target key start
LH: loop header
LB: loop body
LE: loop exit
PB: predicated region body
PF: predicated region fallthrough
CT: control target
= control target key end

     0   :  { %11 = vsyncpa [#allocation3], 0  ;;  %s6893_s0 = inlined_call_operand.vmem [shape: bf16[2,18,18,36], index: 0, kind: input, shape index: {}]   ;;  %s6894_s1 = inlined_call_operand.vmem [shape: bf16[9,128,36], index: 1, kind: input, shape index: {}]   ;;  %s6895_s2 = inlined_call_operand.vmem [shape: f32[128,1], index: 2, kind: input, shape index: {}]   ;;  %s6896_s3 = inlined_call_operand.vmem [shape: f32[2,32,256], index: 3, kind: input, shape index: {}]   ;;  %s6897_s4 = inlined_call_operand.hbm [shape: f32[2,32,256], index: 4, kind: output, shape index: {0}]   ;;  %s6898_s5 = inlined_call_operand.hbm [shape: f32[2,32,256], index: 5, kind: output, shape index: {1}]  }
   0x1   :  { %13 = vsyncpa [#allocation3 + $0x1], 0 }
   0x2   :  { %14 = vsyncpa [#allocation5], 0 }
   0x3   :  { %16 = vsyncpa [#allocation5 + $0x1], 0  ;;  %s4786_s18 = smov 0   ;;  %s4788_s19 = smov 0  }
   0x4   :  { %s4790_s20 = smov 0   ;;  %s4792_s21 = smov 0  }
   0x5 LB: > { %s4807_s22 = sadd.s32 4294967295, %s4749_s21   ;;  %s3690_s23 = sadd.s32 4294967294, %s4749_s21   ;;  %s4749_s21 = sphi %s4792_s21, %s7142_s21   ;;  %s4745_s20 = sphi %s4790_s20, %s7141_s20   ;;  %s4741_s19 = sphi %s4788_s19, %s7140_s19   ;;  %s4737_s18 = sphi %s4786_s18, %s7139_s18  }
   0x6   : > { %s4811_s24 = sadd.s32 1, %s4749_s21   ;;  %s123_s25 = sadd.s32 1, %s4745_s20 }
   0x7   : > { %s120_s26 = ssub.s32 %s4749_s21, %s4811_s24  ;;  %p133_p0 = scmp.ne.s32.totalorder %s4745_s20, %s4741_s19 }
   0x8   : > { %p121_p1 = scmp.eq.s32.totalorder %s120_s26, 0  ;;  %p134_p2 = scmp.eq.s32.totalorder %s4807_s22, 1 }
   0x9   : > { %p139_p3 = scmp.ne.s32.totalorder %s4741_s19, %s4737_s18  ;;  %p140_p4 = scmp.eq.s32.totalorder %s3690_s23, 1 }
   0xa   : > { %s4822_s27 = scalar_select %p121_p1, %s4745_s20, %s123_s25  }
   0xb   : > { %p4824_p5 = por %p134_p2, %p133_p0  ;;  %p4828_p6 = por %p140_p4, %p139_p3 }
   0xc   : > { %p3693_p7 = scmp.ge.s32.totalorder %s4749_s21, 1  ;;  %p206_p8 = scmp.lt.s32.totalorder %s4749_s21, 3 }
   0xe   : > { %p207_p9 = pnand %p3693_p7, %p206_p8 }
  0x10   : > { %210 = sbr.rel (%p207_p9) target bundleno = 660 (0x294), region = 36 }
  0x15   : > { %p244_p10 = scmp.lt.s32.totalorder %s4807_s22, 1  ;;  %v4841_v0 = vld [vmem:[%s6894_s1] sm:$0xff]   ;;  %vm541_vm0 = vcmask 293888   ;;  %vm759_vm1 = vsmask.f32 3328  ;;  %vm1484_vm2 = vcmask 1042432  }
  0x16   : > { %4070 = vmatprep.mubr.msk.bf16.mxu0 %vm541_vm0, %v4841_v0  ;;  %v4506_v1 = vld [vmem:[%s6894_s1 + $0x40] sm:$0xff]   ;;  %vm1485_vm3 = vcmask 1046532   ;;  %vm760_vm4 = vsmask.f32 7440  ;;  %v4542_v47 = vld [vmem:[%s6894_s1 + $0x148] sm:$0xff]   ;;  %s6757_s17 = sand.u32 1, %s4741_s19  }
  0x17   : > { %s4836_s30 = scalar_select %p244_p10, %s4807_s22, 1  ;;  %4102 = vmatprep.mubr.msk.bf16.mxu1 %vm541_vm0, %v4506_v1  ;;  %vm4869_vm5 = vmor %vm1484_vm2, %vm1485_vm3 }
  0x18   : > { %vm4938_vm6 = vmor %vm759_vm1, %vm760_vm4  ;;  %s3694_s23 = sshll.u32 %s6757_s17, 6  ;;  %s4052_s26 = sshll.u32 %s4807_s22, 10 }
  0x19   : > { %s4438_s8 = smul.u32 216, %s4836_s30  ;;  %s4051_s14 = sshll.u32 %s4836_s30, 6 }
  0x1a   : > { %s6754_s16 = scalar_lea.vmem %s6896_s3, %s4051_s14  ;;  %s6776_s25 = scalar_lea.vmem [#allocation4], %s3694_s23 }
  0x1b   : > { %s4852_s13 = scalar_lea.vmem %s6893_s0, %s4438_s8  ;;  %s3584_s6 = sshll.u32 %s6776_s25, 4  ;;  %s6800_s6 = int_to_ptr.vmem [resolvable:$true] %s3584_s6 }
  0x1c   : > { %v396_v2 = vld [vmem:[%s4852_s13 + $0xb4] sm:$0xf]  ;;  %v4857_v3 = vld [vmem:[%s4852_s13 + $0xb8] sm:$0xf]  ;;  %v4878_v15 = vld [vmem:[%s4852_s13 + $0xa8] sm:$0xf] }
  0x1d   : > { %v4860_v4 = vld [vmem:[%s4852_s13 + $0x54] sm:$0xf]  ;;  %v4863_v5 = vcombine.low %v396_v2, %v4857_v3  ;;  %v1123_v6 = vshrl.u32 %v396_v2, 16  ;;  %v1126_v7 = vshll.u32 %v396_v2, 16  ;;  %v1136_v8 = vshrl.u32 %v4857_v3, 16  ;;  %s3555_s9 = scalar_lea.sflag [#allocation5], %s6757_s17 }
  0x1e   : > { %v4867_v9 = vld [vmem:[%s4852_s13 + $0x58] sm:$0xf]  ;;  %v3794_v11 = vrot.slane %v396_v2, 9  ;;  %v6899_v12 = vrot.slane %v4857_v3, 5  ;;  %v931_v14 = vshrl.u32 %v4860_v4, 16  ;;  %v934_v16 = vshll.u32 %v4860_v4, 16 }
  0x1f   : > { %6970 = vst [vmem:[#allocation8_spill] sm:$0xff] %v4863_v5  ;;  %v3714_v13 = vcombine.low %v4860_v4, %v4867_v9  ;;  %4358 = vmatprep.subr.msk.bf16.mxu0 %vm541_vm0, %v4863_v5  ;;  %v944_v17 = vshrl.u32 %v4867_v9, 16  ;;  %v4885_v18 = vld [vmem:[%s4852_s13 + $0xac] sm:$0xf]  ;;  %v1099_v19 = vshrl.u32 %v4878_v15, 16  ;;  %v1102_v20 = vshll.u32 %v4878_v15, 16 }
  0x20   : > { %v4894_v22 = vcombine.low %v4878_v15, %v4885_v18  ;;  %v1112_v23 = vshrl.u32 %v4885_v18, 16  ;;  %v4898_v24 = vld [vmem:[%s4852_s13 + $0x48] sm:$0xf]  ;;  %v4901_v25 = vld [vmem:[%s4852_s13 + $0x4c] sm:$0xf]  ;;  %v4907_v26 = vsel %vm4869_vm5, %v3794_v11, %v6899_v12  ;;  %v1125_v32 = vrot.slane %v1123_v6, 4 }
  0x21   : > { %v4890_v21 = vsel %vm541_vm0, %v3714_v13, 0  ;;  %v3713_v27 = vcombine.low %v4898_v24, %v4901_v25  ;;  %v907_v28 = vshrl.u32 %v4898_v24, 16  ;;  %v910_v29 = vshll.u32 %v4898_v24, 16  ;;  %v4916_v31 = vld [vmem:[%s4852_s13 + $0xbc] sm:$0x1]  ;;  %s4659_s10 = scalar_lea.vmem %s6800_s6, 1024 }
  0x22   : > { %6973 = vst [vmem:[#allocation9_spill] sm:$0xff] %v4890_v21  ;;  %6974 = vst [vmem:[#allocation10_spill] sm:$0xff] %v4894_v22  ;;  %4055 = vmatpush3.bf16.xpose.msra.mxu0 %v4890_v21  ;;  %v920_v30 = vshrl.u32 %v4901_v25, 16  ;;  %v1128_v33 = vrot.slane %v1126_v7, 5  ;;  %v1132_v34 = vshll.u32 %v4857_v3, 16  ;;  %v1138_v35 = vrot.slane %v1136_v8, 4  ;;  %p4660_p11 = scmp.ne.s32.totalorder %s6800_s6, %s4659_s10 }
  0x23   : > { %4359 = vmatprep.subr.msk.bf16.mxu0 %vm541_vm0, %v4894_v22  ;;  %v4922_v36 = vld [vmem:[%s4852_s13 + $0x5c] sm:$0x1]  ;;  %v4925_v37 = vsel %vm541_vm0, %v3713_v27, 0  ;;  %v1142_v38 = vshll.u32 %v4916_v31, 16  ;;  %v933_v40 = vrot.slane %v931_v14, 4  ;;  %v936_v44 = vrot.slane %v934_v16, 5 }
  0x24   : > { %6975 = vst [vmem:[#allocation11_spill] sm:$0xff] %v4925_v37  ;;  %v4930_v41 = vld [vmem:[%s4852_s13 + $0x9c] sm:$0xf]  ;;  %v1129_v42 = vor.u32 %v1128_v33, %v1125_v32  ;;  %v1134_v43 = vrot.slane %v1132_v34, 5  ;;  %v940_v45 = vshll.u32 %v4867_v9, 16  ;;  %v946_v49 = vrot.slane %v944_v17, 4  ;;  %p4661_p12 = pnand %p4660_p11, %p4824_p5 }
  0x25   : > { %v4934_v46 = vld [vmem:[%s4852_s13 + $0xa0] sm:$0xf]  ;;  %v1144_v48 = vrot.slane %v1142_v38, 5  ;;  %v950_v50 = vshll.u32 %v4922_v36, 16  ;;  %v937_v54 = vor.u32 %v936_v44, %v933_v40  ;;  %v4948_v56 = vld [vmem:[%s4852_s13 + $0x3c] sm:$0xf] }
  0x26   : > { %v4945_v51 = vcombine.low %v4930_v41, %v4934_v46  ;;  %v1130_v52 = vrot.slane %v1129_v42, 4  ;;  %v1139_v53 = vor.u32 %v1138_v35, %v1134_v43  ;;  %v942_v55 = vrot.slane %v940_v45, 5  ;;  %v4951_v57 = vld [vmem:[%s4852_s13 + $0x40] sm:$0xf]  ;;  %v4965_v13 = vld [vmem:[%s4852_s13 + $0xb0] sm:$0x1]  ;;  %p4662_p13 = pneg %p4661_p12 }
  0x27   : > { %v952_v58 = vrot.slane %v950_v50, 5  ;;  %v1075_v59 = vshrl.u32 %v4930_v41, 16  ;;  %v1078_v60 = vshll.u32 %v4930_v41, 16  ;;  %v1088_v61 = vshrl.u32 %v4934_v46, 16  ;;  %v4980_v38 = vld [vmem:[%s4852_s13 + $0x50] sm:$0x1] }
  0x28   : > { %6978 = vst [vmem:[#allocation12_spill] sm:$0xff] %v4945_v51  ;;  %v1135_v62 = vsel %vm4938_vm6, %v1130_v52, %v1134_v43  ;;  %v1140_v63 = vrot.slane %v1139_v53, 4  ;;  %v938_v1 = vrot.slane %v937_v54, 4  ;;  %v947_v2 = vor.u32 %v946_v49, %v942_v55  ;;  %v4990_v49 = vld [vmem:[%s4852_s13 + $0x90] sm:$0xf]  ;;  %s4752_s11 = smov [#allocation4]  }
  0x29   : > { %v3712_v6 = vcombine.low %v4948_v56, %v4951_v57  ;;  %v883_v7 = vshrl.u32 %v4948_v56, 16  ;;  %v886_v8 = vshll.u32 %v4948_v56, 16  ;;  %v896_v11 = vshrl.u32 %v4951_v57, 16  ;;  %v4993_v50 = vld [vmem:[%s4852_s13 + $0x94] sm:$0xf]  ;;  %s4663_s12 = sshll.u32 %s4752_s11, 4  ;;  %s4664_s12 = int_to_ptr.vmem [resolvable:$false] %s4663_s12 }
  0x2a   : > { %4057 = vmatpush3.bf16.xpose.msra.mxu0 %v4925_v37  ;;  %v1145_v14 = vsel %vm4938_vm6, %v1140_v63, %v1144_v48  ;;  %v943_v16 = vsel %vm4938_vm6, %v938_v1, %v942_v55  ;;  %v948_v17 = vrot.slane %v947_v2, 4  ;;  %v1101_v27 = vrot.slane %v1099_v19, 4  ;;  %v5003_v63 = vld [vmem:[%s4852_s13 + $0x30] sm:$0xf]  ;;  %s4665_s14 = scalar_lea.vmem %s4664_s12, 2048  ;;  %p4666_p0 = scmp.lt.s32.totalorder %s6800_s6, %s4664_s12 }
  0x2b   : > { %4360 = vmatprep.subr.msk.bf16.mxu0 %vm541_vm0, %v4945_v51  ;;  %v4973_v32 = vcombine.low %v1135_v62, %v1145_v14  ;;  %v4976_v33 = vsel %vm541_vm0, %v3712_v6, 0  ;;  %v1104_v34 = vrot.slane %v1102_v20, 5  ;;  %v1108_v35 = vshll.u32 %v4885_v18, 16  ;;  %p4667_p1 = scmp.lt.s32.totalorder %s4665_s14, %s4659_s10 }
  0x2c   : > { %6980 = vst [vmem:[#allocation14_spill] sm:$0xff] %v4976_v33  ;;  %v953_v40 = vsel %vm4938_vm6, %v948_v17, %v952_v58  ;;  %v1114_v42 = vrot.slane %v1112_v23, 4  ;;  %v1118_v43 = vshll.u32 %v4965_v13, 16  ;;  %v909_v19 = vrot.slane %v907_v28, 4 }
  0x2d   : > { %6979 = vst [vmem:[#allocation13_spill] sm:$0xff] %v4973_v32  ;;  %4366 = vmatprep.subr.msk.bf16.mxu1 %vm541_vm0, %v4973_v32  ;;  %v3762_v44 = vcombine.low %v943_v16, %v953_v40  ;;  %v1105_v20 = vor.u32 %v1104_v34, %v1101_v27  ;;  %v1110_v45 = vrot.slane %v1108_v35, 5  ;;  %v912_v48 = vrot.slane %v910_v29, 5  ;;  %v5006_v29 = vld [vmem:[%s4852_s13 + $0x34] sm:$0xf]  ;;  %p4668_p2 = por %p4667_p1, %p4666_p0 }
  0x2e   : > { %v1120_v52 = vrot.slane %v1118_v43, 5  ;;  %v916_v53 = vshll.u32 %v4901_v25, 16  ;;  %v922_v23 = vrot.slane %v920_v30, 4  ;;  %v926_v28 = vshll.u32 %v4980_v38, 16  ;;  %v5025_v43 = vld [vmem:[%s4852_s13 + $0xa4] sm:$0x1] }
  0x2f   : > { %v5000_v54 = vsel %vm541_vm0, %v3762_v44, 0  ;;  %v1106_v55 = vrot.slane %v1105_v20, 4  ;;  %v1115_v58 = vor.u32 %v1114_v42, %v1110_v45  ;;  %v913_v62 = vor.u32 %v912_v48, %v909_v19  ;;  %p4669_p3 = pnand %p4668_p2, %p4662_p13 }
  0x30   : > { %6981 = vst [vmem:[#allocation15_spill] sm:$0xff] %v5000_v54  ;;  %4087 = vmatpush3.bf16.xpose.msra.mxu1 %v5000_v54  ;;  %v918_v1 = vrot.slane %v916_v53, 5  ;;  %v928_v2 = vrot.slane %v926_v28, 5  ;;  %v5011_v30 = vcombine.low %v4990_v49, %v4993_v50  ;;  %v1051_v6 = vshrl.u32 %v4990_v49, 16 }
  0x31   : > { %v1111_v14 = vsel %vm4938_vm6, %v1106_v55, %v1110_v45  ;;  %v1116_v16 = vrot.slane %v1115_v58, 4  ;;  %v914_v17 = vrot.slane %v913_v62, 4  ;;  %v1054_v27 = vshll.u32 %v4990_v49, 16  ;;  %v5041_v55 = vld [vmem:[%s4852_s13 + $0x44] sm:$0x1] }
  0x32   : > { %6982 = vst [vmem:[#allocation16_spill] sm:$0xff] %v5011_v30  ;;  %4059 = vmatpush3.bf16.xpose.msra.mxu0 %v4976_v33  ;;  %v923_v34 = vor.u32 %v922_v23, %v918_v1  ;;  %v1064_v35 = vshrl.u32 %v4993_v50, 16  ;;  %v3711_v40 = vcombine.low %v5003_v63, %v5006_v29  ;;  %v859_v42 = vshrl.u32 %v5003_v63, 16 }
  0x33   : > { %4361 = vmatprep.subr.msk.bf16.mxu0 %vm541_vm0, %v5011_v30  ;;  %v1121_v19 = vsel %vm4938_vm6, %v1116_v16, %v1120_v52  ;;  %v919_v44 = vsel %vm4938_vm6, %v914_v17, %v918_v1  ;;  %v1077_v28 = vrot.slane %v1075_v59, 4  ;;  %v1080_v52 = vrot.slane %v1078_v60, 5 }
  0x34   : > { %v5033_v48 = vcombine.low %v1111_v14, %v1121_v19  ;;  %v924_v53 = vrot.slane %v923_v34, 4  ;;  %v5036_v23 = vsel %vm541_vm0, %v3711_v40, 0  ;;  %v1084_v58 = vshll.u32 %v4934_v46, 16  ;;  %v5050_v14 = vld [vmem:[%s4852_s13 + $0x84] sm:$0xf] }
  0x35   : > { %6984 = vst [vmem:[#allocation18_spill] sm:$0xff] %v5036_v23  ;;  %v1090_v62 = vrot.slane %v1088_v61, 4  ;;  %v1094_v1 = vshll.u32 %v5025_v43, 16  ;;  %v885_v16 = vrot.slane %v883_v7, 4  ;;  %v888_v60 = vrot.slane %v886_v8, 5 }
  0x36   : > { %6983 = vst [vmem:[#allocation17_spill] sm:$0xff] %v5033_v48  ;;  %4367 = vmatprep.subr.msk.bf16.mxu1 %vm541_vm0, %v5033_v48  ;;  %v929_v59 = vsel %vm4938_vm6, %v924_v53, %v928_v2  ;;  %v892_v17 = vshll.u32 %v4951_v57, 16  ;;  %v5062_v61 = vld [vmem:[%s4852_s13 + $0x88] sm:$0xf]  ;;  %v1081_v40 = vor.u32 %v1080_v52, %v1077_v28  ;;  %v1086_v19 = vrot.slane %v1084_v58, 5 }
  0x37   : > { %v3761_v34 = vcombine.low %v919_v44, %v929_v59  ;;  %v1096_v39 = vrot.slane %v1094_v1, 5  ;;  %v889_v12 = vor.u32 %v888_v60, %v885_v16  ;;  %v898_v2 = vrot.slane %v896_v11, 4  ;;  %v5076_v28 = vld [vmem:[%s4852_s13 + $0x24] sm:$0xf]  ;;  %v5079_v52 = vld [vmem:[%s4852_s13 + $0x28] sm:$0xf] }
  0x38   : > { %v894_v45 = vrot.slane %v892_v17, 5  ;;  %v902_v7 = vshll.u32 %v5041_v55, 16  ;;  %v1082_v8 = vrot.slane %v1081_v40, 4  ;;  %v1091_v20 = vor.u32 %v1090_v62, %v1086_v19  ;;  %6987 = vst [vmem:[#allocation21_spill] sm:$0xff] %v5079_v52  ;;  %v5136_v59 = vld [vmem:[%s4852_s13 + $0x1c] sm:$0xf] }
  0x39   : > { %v5068_v53 = vsel %vm541_vm0, %v3761_v34, 0  ;;  %v5073_v44 = vcombine.low %v5050_v14, %v5062_v61  ;;  %v890_v11 = vrot.slane %v889_v12, 4  ;;  %v1030_v60 = vshll.u32 %v5050_v14, 16  ;;  %6994 = vst [vmem:[#allocation27_spill] sm:$0xff] %v5136_v59 }
  0x3a   : > { %6985 = vst [vmem:[#allocation19_spill] sm:$0xff] %v5068_v53  ;;  %4061 = vmatpush3.bf16.xpose.msra.mxu0 %v5036_v23  ;;  %4089 = vmatpush3.bf16.xpose.msra.mxu1 %v5068_v53  ;;  %v899_v58 = vor.u32 %v898_v2, %v894_v45  ;;  %v904_v1 = vrot.slane %v902_v7, 5  ;;  %v1087_v16 = vsel %vm4938_vm6, %v1082_v8, %v1086_v19  ;;  %v1092_v62 = vrot.slane %v1091_v20, 4  ;;  %v5095_v20 = vld [vmem:[%s4852_s13 + $0x98] sm:$0x1] }
  0x3b   : > { %6986 = vst [vmem:[#allocation20_spill] sm:$0xff] %v5073_v44  ;;  %4362 = vmatprep.subr.msk.bf16.mxu0 %vm541_vm0, %v5073_v44  ;;  %v895_v12 = vsel %vm4938_vm6, %v890_v11, %v894_v45  ;;  %v3710_v40 = vcombine.low %v5076_v28, %v5079_v52  ;;  %v1053_v17 = vrot.slane %v1051_v6, 4  ;;  %v5116_v7 = vld [vmem:[%s4852_s13 + $0x78] sm:$0xf]  ;;  %v1060_v6 = vshll.u32 %v4993_v50, 16 }
  0x3c   : > { %v900_v34 = vrot.slane %v899_v58, 4  ;;  %v1097_v19 = vsel %vm4938_vm6, %v1092_v62, %v1096_v39  ;;  %v1056_v39 = vrot.slane %v1054_v27, 5  ;;  %v5113_v62 = vld [vmem:[%s4852_s13 + $0x38] sm:$0x1]  ;;  %6990 = vst [vmem:[#allocation24_spill] sm:$0xff] %v5116_v7  ;;  %v861_v27 = vrot.slane %v859_v42, 4 }
  0x3d   : > { %v5103_v45 = vcombine.low %v1087_v16, %v1097_v19  ;;  %v5108_v58 = vsel %vm541_vm0, %v3710_v40, 0  ;;  %v1066_v16 = vrot.slane %v1064_v35, 4  ;;  %v1070_v19 = vshll.u32 %v5095_v20, 16  ;;  %v5178_v44 = vld [vmem:[%s4852_s13 + $0x6c] sm:$0xf] }
  0x3e   : > { %v905_v11 = vsel %vm4938_vm6, %v900_v34, %v904_v1  ;;  %6989 = vst [vmem:[#allocation23_spill] sm:$0xff] %v5108_v58  ;;  %v5123_v1 = vld [vmem:[%s4852_s13 + $0x7c] sm:$0xf]  ;;  %v1057_v34 = vor.u32 %v1056_v39, %v1053_v17  ;;  %v6992_v40 = vshll.u32 %v5003_v63, 16  ;;  %v1062_v53 = vrot.slane %v1060_v6, 5  ;;  %7001 = vst [vmem:[#allocation32_spill] sm:$0xff] %v5178_v44 }
  0x3f   : > { %6988 = vst [vmem:[#allocation22_spill] sm:$0xff] %v5103_v45  ;;  %v3760_v8 = vcombine.low %v895_v12, %v905_v11  ;;  %6991 = vst [vmem:[#allocation25_spill] sm:$0xff] %v5123_v1  ;;  %4368 = vmatprep.subr.msk.bf16.mxu1 %vm541_vm0, %v5103_v45  ;;  %v868_v12 = vshll.u32 %v5006_v29, 16  ;;  %v5133_v11 = vld [vmem:[%s4852_s13 + $0x18] sm:$0xf]  ;;  %v1072_v17 = vrot.slane %v1070_v19, 5 }
  0x40   : > { %v864_v2 = vrot.slane %v6992_v40, 5  ;;  %6993 = vst [vmem:[#allocation26_spill] sm:$0xff] %v5133_v11  ;;  %v6996_v39 = vshrl.u32 %v5006_v29, 16  ;;  %v1058_v40 = vrot.slane %v1057_v34, 4  ;;  %v878_v54 = vshll.u32 %v5113_v62, 16 }
  0x41   : > { %v5139_v35 = vsel %vm541_vm0, %v3760_v8, 0  ;;  %v870_v48 = vrot.slane %v868_v12, 5  ;;  %v1067_v32 = vor.u32 %v1066_v16, %v1062_v53  ;;  %v5148_v8 = vcombine.low %v5116_v7, %v5123_v1 }
  0x42   : > { %6995 = vst [vmem:[#allocation28_spill] sm:$0xff] %v5139_v35  ;;  %4063 = vmatpush3.bf16.xpose.msra.mxu0 %v5108_v58  ;;  %v874_v42 = vrot.slane %v6996_v39, 4  ;;  %4091 = vmatpush3.bf16.xpose.msra.mxu1 %v5139_v35  ;;  %v865_v45 = vor.u32 %v864_v2, %v861_v27  ;;  %v1063_v19 = vsel %vm4938_vm6, %v1058_v40, %v1062_v53  ;;  %v880_v34 = vrot.slane %v878_v54, 5  ;;  %v5155_v2 = vld [vmem:[%s4852_s13 + $0x8c] sm:$0x1] }
  0x43   : > { %6997 = vst [vmem:[#allocation29_spill] sm:$0xff] %v5148_v8  ;;  %v1068_v16 = vrot.slane %v1067_v32, 4  ;;  %4363 = vmatprep.subr.msk.bf16.mxu0 %vm541_vm0, %v5148_v8  ;;  %v3709_v12 = vcombine.low %v5133_v11, %v5136_v59  ;;  %v5168_v40 = vld [vmem:[%s4852_s13 + $0x2c] sm:$0x1]  ;;  %v7000_v58 = vshrl.u32 %v5050_v14, 16  ;;  %v1032_v6 = vrot.slane %v1030_v60, 5 }
  0x44   : > { %v866_v39 = vrot.slane %v865_v45, 4  ;;  %v875_v35 = vor.u32 %v874_v42, %v870_v48  ;;  %6998 = vst [vmem:[#allocation30_spill] sm:$0xff] %v5168_v40  ;;  %v7005_v54 = vshrl.u32 %v5076_v28, 16  ;;  %v1012_v22 = vshll.u32 %v5123_v1, 16 }
  0x45   : > { %v1073_v32 = vsel %vm4938_vm6, %v1068_v16, %v1072_v17  ;;  %v5173_v27 = vsel %vm541_vm0, %v3709_v12, 0  ;;  %v1029_v8 = vrot.slane %v7000_v58, 4  ;;  %v1036_v17 = vshll.u32 %v5062_v61, 16 }
  0x46   : > { %v871_v53 = vsel %vm4938_vm6, %v866_v39, %v870_v48  ;;  %v876_v45 = vrot.slane %v875_v35, 4  ;;  %6999 = vst [vmem:[#allocation31_spill] sm:$0xff] %v5173_v27  ;;  %v5181_v48 = vld [vmem:[%s4852_s13 + $0x70] sm:$0xf]  ;;  %v5183_v35 = vcombine.low %v1063_v19, %v1073_v32  ;;  %v7004_v16 = vshrl.u32 %v5062_v61, 16 }
  0x47   : > { %7002 = vst [vmem:[#allocation33_spill] sm:$0xff] %v5181_v48  ;;  %v1033_v60 = vor.u32 %v1032_v6, %v1029_v8  ;;  %v1046_v58 = vshll.u32 %v5155_v2, 16  ;;  %v837_v23 = vrot.slane %v7005_v54, 4  ;;  %v1038_v19 = vrot.slane %v1036_v17, 5  ;;  %v5205_v8 = vld [vmem:[%s4852_s13 + $0x10] sm:$0xf] }
  0x48   : > { %7003 = vst [vmem:[#allocation34_spill] sm:$0xff] %v5183_v35  ;;  %v881_v39 = vsel %vm4938_vm6, %v876_v45, %v880_v34  ;;  %v1042_v12 = vrot.slane %v7004_v16, 4  ;;  %4369 = vmatprep.subr.msk.bf16.mxu1 %vm541_vm0, %v5183_v35  ;;  %v7006_v34 = vshll.u32 %v5076_v28, 16  ;;  %v844_v32 = vshll.u32 %v5079_v52, 16 }
  0x49   : > { %v3759_v42 = vcombine.low %v871_v53, %v881_v39  ;;  %v7007_v16 = vshrl.u32 %v5079_v52, 16  ;;  %v5202_v39 = vld [vmem:[%s4852_s13 + $0xc] sm:$0xf]  ;;  %v1034_v54 = vrot.slane %v1033_v60, 4  ;;  %v854_v17 = vshll.u32 %v5168_v40, 16 }
  0x4a   : > { %4065 = vmatpush3.bf16.xpose.msra.mxu0 %v5173_v27  ;;  %v840_v45 = vrot.slane %v7006_v34, 5  ;;  %7008 = vst [vmem:[#allocation35_spill] sm:$0xff] %v5202_v39  ;;  %v1048_v27 = vrot.slane %v1046_v58, 5  ;;  %v1043_v34 = vor.u32 %v1042_v12, %v1038_v19  ;;  %v846_v30 = vrot.slane %v844_v32, 5  ;;  %v5221_v58 = vld [vmem:[%s4852_s13 + $0x80] sm:$0x1] }
  0x4b   : > { %v850_v53 = vrot.slane %v7007_v16, 4  ;;  %v5208_v6 = vsel %vm541_vm0, %v3759_v42, 0  ;;  %v5214_v16 = vcombine.low %v5178_v44, %v5181_v48  ;;  %v1039_v33 = vsel %vm4938_vm6, %v1034_v54, %v1038_v19  ;;  %7011 = vst [vmem:[#allocation38_spill] sm:$0xff] %v5221_v58 }
  0x4c   : > { %7009 = vst [vmem:[#allocation36_spill] sm:$0xff] %v5208_v6  ;;  %4093 = vmatpush3.bf16.xpose.msra.mxu1 %v5208_v6  ;;  %v841_v35 = vor.u32 %v840_v45, %v837_v23  ;;  %v856_v51 = vrot.slane %v854_v17, 5  ;;  %v1044_v37 = vrot.slane %v1043_v34, 4  ;;  %v992_v23 = vshrl.u32 %v5181_v48, 16  ;;  %v5232_v17 = vld [vmem:[%s4852_s13 + $0x20] sm:$0x1] }
  0x4d   : > { %7010 = vst [vmem:[#allocation37_spill] sm:$0xff] %v5214_v16  ;;  %v851_v12 = vor.u32 %v850_v53, %v846_v30  ;;  %4364 = vmatprep.subr.msk.bf16.mxu0 %vm541_vm0, %v5214_v16  ;;  %v3708_v19 = vcombine.low %v5202_v39, %v5205_v8  ;;  %7012 = vst [vmem:[#allocation39_spill] sm:$0xff] %v5232_v17  ;;  %v7013_v60 = vshrl.u32 %v5116_v7, 16  ;;  %v7016_v54 = vshll.u32 %v5116_v7, 16 }
  0x4e   : > { %v842_v6 = vrot.slane %v841_v35, 4  ;;  %v1049_v35 = vsel %vm4938_vm6, %v1044_v37, %v1048_v27  ;;  %v5249_v37 = vld [vmem:[%s4852_s13 + $0x60] sm:$0xf]  ;;  %v5252_v27 = vld [vmem:[%s4852_s13 + $0x64] sm:$0xf]  ;;  %v1014_v21 = vrot.slane %v1012_v22, 5 }
  0x4f   : > { %v852_v34 = vrot.slane %v851_v12, 4  ;;  %v1005_v42 = vrot.slane %v7013_v60, 4  ;;  %v5240_v16 = vcombine.low %v1039_v33, %v1049_v35  ;;  %v5243_v45 = vsel %vm541_vm0, %v3708_v19, 0  ;;  %7017 = vst [vmem:[#allocation42_spill] sm:$0xff] %v5249_v37 }
  0x50   : > { %v847_v53 = vsel %vm4938_vm6, %v842_v6, %v846_v30  ;;  %7015 = vst [vmem:[#allocation41_spill] sm:$0xff] %v5243_v45  ;;  %v1008_v32 = vrot.slane %v7016_v54, 5  ;;  %v7018_v33 = vshrl.u32 %v5123_v1, 16  ;;  %v1022_v60 = vshll.u32 %v5221_v58, 16 }
  0x51   : > { %7014 = vst [vmem:[#allocation40_spill] sm:$0xff] %v5240_v16  ;;  %v857_v30 = vsel %vm4938_vm6, %v852_v34, %v856_v51  ;;  %v7019_v12 = vshrl.u32 %v5133_v11, 16  ;;  %4370 = vmatprep.subr.msk.bf16.mxu1 %vm541_vm0, %v5240_v16  ;;  %v7020_v5 = vshll.u32 %v5133_v11, 16  ;;  %v5267_v51 = vld [vmem:[%s4852_s13] sm:$0xf]  ;;  %v7021_v58 = vshrl.u32 %v5136_v59, 16 }
  0x52   : > { %4067 = vmatpush3.bf16.xpose.msra.mxu0 %v5243_v45  ;;  %v1018_v6 = vrot.slane %v7018_v33, 4  ;;  %v3758_v54 = vcombine.low %v847_v53, %v857_v30  ;;  %v1009_v35 = vor.u32 %v1008_v32, %v1005_v42  ;;  %v5270_v34 = vld [vmem:[%s4852_s13 + $0x4] sm:$0xf]  ;;  %v1024_v33 = vrot.slane %v1022_v60, 5 }
  0x53   : > { %v813_v19 = vrot.slane %v7019_v12, 4  ;;  %v816_v7 = vrot.slane %v7020_v5, 5  ;;  %v820_v45 = vshll.u32 %v5136_v59, 16  ;;  %v826_v12 = vrot.slane %v7021_v58, 4  ;;  %v5286_v58 = vld [vmem:[%s4852_s13 + $0x74] sm:$0x1] }
  0x54   : > { %v830_v1 = vshll.u32 %v5232_v17, 16  ;;  %v5277_v53 = vsel %vm541_vm0, %v3758_v54, 0  ;;  %v1010_v22 = vrot.slane %v1009_v35, 4  ;;  %v1019_v42 = vor.u32 %v1018_v6, %v1014_v21  ;;  %7023 = vst [vmem:[#allocation44_spill] sm:$0xff] %v5286_v58 }
  0x55   : > { %7022 = vst [vmem:[#allocation43_spill] sm:$0xff] %v5277_v53  ;;  %v817_v32 = vor.u32 %v816_v7, %v813_v19  ;;  %4095 = vmatpush3.bf16.xpose.msra.mxu1 %v5277_v53  ;;  %v822_v5 = vrot.slane %v820_v45, 5  ;;  %v5282_v60 = vcombine.low %v5249_v37, %v5252_v27  ;;  %v955_v16 = vshrl.u32 %v5249_v37, 16 }
  0x56   : > { %v832_v30 = vrot.slane %v830_v1, 5  ;;  %v1015_v54 = vsel %vm4938_vm6, %v1010_v22, %v1014_v21  ;;  %v1020_v17 = vrot.slane %v1019_v42, 4  ;;  %v958_v7 = vshll.u32 %v5249_v37, 16  ;;  %v5304_v42 = vld [vmem:[%s4852_s13 + $0x14] sm:$0x1] }
  0x57   : > { %v818_v35 = vrot.slane %v817_v32, 4  ;;  %v827_v6 = vor.u32 %v826_v12, %v822_v5  ;;  %4365 = vmatprep.subr.msk.bf16.mxu0 %vm541_vm0, %v5282_v60  ;;  %v968_v1 = vshrl.u32 %v5252_v27, 16  ;;  %v3707_v45 = vcombine.low %v5267_v51, %v5270_v34 }
  0x58   : > { %v1025_v53 = vsel %vm4938_vm6, %v1020_v17, %v1024_v33  ;;  %v7025_v11 = vshrl.u32 %v5178_v44, 16  ;;  %v7026_v17 = vshll.u32 %v5178_v44, 16  ;;  %v998_v12 = vshll.u32 %v5286_v58, 16 }
  0x59   : > { %v823_v21 = vsel %vm4938_vm6, %v818_v35, %v822_v5  ;;  %v5306_v32 = vcombine.low %v1015_v54, %v1025_v53  ;;  %v828_v37 = vrot.slane %v827_v6, 4  ;;  %v567_v59 = vsel %vm541_vm0, %v3707_v45, 0 }
  0x5a   : > { %v981_v19 = vrot.slane %v7025_v11, 4  ;;  %4069 = vmatpush3.bf16.xpose.msra.mxu0 %v567_v59  ;;  %v984_v33 = vrot.slane %v7026_v17, 5  ;;  %v988_v5 = vshll.u32 %v5181_v48, 16  ;;  %v994_v35 = vrot.slane %v992_v23, 4 }
  0x5b   : > { %7024 = vst [vmem:[#allocation45_spill] sm:$0xff] %v5306_v32  ;;  %4371 = vmatprep.subr.msk.bf16.mxu1 %vm541_vm0, %v5306_v32  ;;  %v833_v53 = vsel %vm4938_vm6, %v828_v37, %v832_v30  ;;  %v7027_v54 = vshrl.u32 %v5202_v39, 16  ;;  %v7028_v59 = vshll.u32 %v5202_v39, 16  ;;  %v796_v45 = vshll.u32 %v5205_v8, 16  ;;  %v5328_v37 = vld [vmem:[%s4852_s13 + $0x68] sm:$0x1] }
  0x5c   : > { %v3757_v17 = vcombine.low %v823_v21, %v833_v53  ;;  %v985_v22 = vor.u32 %v984_v33, %v981_v19  ;;  %v990_v48 = vrot.slane %v988_v5, 5  ;;  %v1000_v23 = vrot.slane %v998_v12, 5  ;;  %v4505_v19 = vld [vmem:[%s6894_s1 + $0x8] sm:$0xff]  }
  0x5d   : > { %v789_v6 = vrot.slane %v7027_v54, 4  ;;  %v792_v11 = vrot.slane %v7028_v59, 5  ;;  %v798_v58 = vrot.slane %v796_v45, 5  ;;  %v7029_v40 = vshrl.u32 %v5205_v8, 16  ;;  %v5365_v45 = vld [vmem:[%s4852_s13 + $0x8] sm:$0x1] }
  0x5e   : > { %v806_v52 = vshll.u32 %v5304_v42, 16  ;;  %v5331_v30 = vsel %vm541_vm0, %v3757_v17, 0  ;;  %v986_v54 = vrot.slane %v985_v22, 4  ;;  %v995_v59 = vor.u32 %v994_v35, %v990_v48 }
  0x5f   : > { %v793_v44 = vor.u32 %v792_v11, %v789_v6  ;;  %v802_v32 = vrot.slane %v7029_v40, 4  ;;  %v7030_v39 = vrot.slane %v4857_v3, 5  ;;  %4097 = vmatpush3.bf16.xpose.msra.mxu1 %v5331_v30  ;;  %v957_v5 = vrot.slane %v955_v16, 4 }
  0x60   : > { %v808_v33 = vrot.slane %v806_v52, 5  ;;  %v991_v53 = vsel %vm4938_vm6, %v986_v54, %v990_v48  ;;  %v996_v6 = vrot.slane %v995_v59, 4  ;;  %v7031_v22 = vrot.slane %v4916_v31, 5 }
  0x61   : > { %v1596_v21 = vrot.slane %v7030_v39, 4  ;;  %v794_v12 = vrot.slane %v793_v44, 4  ;;  %v803_v40 = vor.u32 %v802_v32, %v798_v58  ;;  %v960_v39 = vrot.slane %v958_v7, 5  ;;  %4071 = vmatmul.mubr.msk.bf16.vlgmr.msra.gmra.mxu0 %vm541_vm0, %v4841_v0 }
  0x62   : > { %v964_v52 = vshll.u32 %v5252_v27, 16  ;;  %v1001_v31 = vsel %vm4938_vm6, %v996_v6, %v1000_v23  ;;  %v970_v16 = vrot.slane %v968_v1, 4  ;;  %v974_v7 = vshll.u32 %v5328_v37, 16  ;;  %4072 = vmatprep.mubr.msk.bf16.mxu0 %vm541_vm0, %v4505_v19 }
  0x63   : > { %v1598_v3 = vsel %vm4869_vm5, %v1596_v21, %v7031_v22  ;;  %v799_v35 = vsel %vm4938_vm6, %v794_v12, %v798_v58  ;;  %v804_v11 = vrot.slane %v803_v40, 4  ;;  %v961_v48 = vor.u32 %v960_v39, %v957_v5 }
  0x64   : > { %v5350_v44 = vcombine.low %v4907_v26, %v1598_v3  ;;  %v5357_v32 = vcombine.low %v991_v53, %v1001_v31  ;;  %v966_v0 = vrot.slane %v964_v52, 5  ;;  %v3786_v26 = vrot.slane %v4860_v4, 9  ;;  %v4508_v4 = vld [vmem:[%s6894_s1 + $0x10] sm:$0xff]  }
  0x65   : > { %v809_v58 = vsel %vm4938_vm6, %v804_v11, %v808_v33  ;;  %v962_v23 = vrot.slane %v961_v48, 4  ;;  %v976_v1 = vrot.slane %v974_v7, 5  ;;  %v1538_v54 = vrot.slane %v4867_v9, 5 }
  0x66   : > { %4374 = vmatprep.subr.msk.bf16.mxu0 %vm541_vm0, %v5350_v44  ;;  %v3756_v17 = vcombine.low %v799_v35, %v809_v58  ;;  %4372 = vmatprep.subr.msk.bf16.mxu1 %vm541_vm0, %v5357_v32  ;;  %v971_v59 = vor.u32 %v970_v16, %v966_v0  ;;  %v1541_v21 = vrot.slane %v4922_v36, 5  ;;  %v7032_v12 = vshrl.u32 %v5267_v51, 16 }
  0x67   : > { %v7033_v33 = vshll.u32 %v5267_v51, 16  ;;  %v967_v9 = vsel %vm4938_vm6, %v962_v23, %v966_v0  ;;  %v1539_v6 = vsel %vm4869_vm5, %v3786_v26, %v1538_v54  ;;  %v1540_v36 = vrot.slane %v1538_v54, 4 }
  0x68   : > { %v765_v40 = vrot.slane %v7032_v12, 4  ;;  %v5379_v53 = vsel %vm541_vm0, %v3756_v17, 0  ;;  %v972_v22 = vrot.slane %v971_v59, 4  ;;  %v772_v39 = vshll.u32 %v5270_v34, 16  ;;  %v5398_v17 = vld [vmem:[%s4852_s13 + $0xc0] sm:$0xf] }
  0x69   : > { %v768_v5 = vrot.slane %v7033_v33, 5  ;;  %4099 = vmatpush3.bf16.xpose.msra.mxu1 %v5379_v53  ;;  %v7034_v35 = vshrl.u32 %v5270_v34, 16  ;;  %v1542_v52 = vsel %vm4869_vm5, %v1540_v36, %v1541_v21  ;;  %v782_v31 = vshll.u32 %v5365_v45, 16  ;;  %4073 = vmatmul.mubr.msk.bf16.gmra.mxu0 %vm541_vm0, %v4505_v19  ;;  %v5410_v12 = vld [vmem:[%s4852_s13 + $0xc4] sm:$0xf] }
  0x6a   : > { %v3793_v48 = vrot.slane %v4878_v15, 9  ;;  %v1587_v16 = vrot.slane %v4885_v18, 5  ;;  %v977_v7 = vsel %vm4938_vm6, %v972_v22, %v976_v1  ;;  %v3826_v58 = vcombine.low %v1539_v6, %v1542_v52  ;;  %4074 = vmatprep.mubr.msk.bf16.mxu0 %vm541_vm0, %v4508_v4 }
  0x6b   : > { %v769_v3 = vor.u32 %v768_v5, %v765_v40  ;;  %v778_v11 = vrot.slane %v7034_v35, 4  ;;  %v774_v26 = vrot.slane %v772_v39, 5  ;;  %v5400_v23 = vcombine.low %v967_v9, %v977_v7 }
  0x6c   : > { %v784_v54 = vrot.slane %v782_v31, 5  ;;  %v1589_v59 = vrot.slane %v1587_v16, 4  ;;  %v5404_v15 = vsel %vm541_vm0, %v3826_v58, 0  ;;  %v1588_v1 = vsel %vm4869_vm5, %v3793_v48, %v1587_v16 }
  0x6d   : > { %v770_v0 = vrot.slane %v769_v3, 4  ;;  %v779_v18 = vor.u32 %v778_v11, %v774_v26  ;;  %v1590_v21 = vrot.slane %v4965_v13, 5  ;;  %4373 = vmatprep.subr.msk.bf16.mxu1 %vm541_vm0, %v5400_v23  ;;  %4119 = vmatpush3.bf16.xpose.msra.mxu0 %v5404_v15  ;;  %v3785_v19 = vrot.slane %v4898_v24, 9 }
  0x6e   : > { %v1531_v40 = vrot.slane %v4901_v25, 5  ;;  %v1534_v33 = vrot.slane %v4980_v38, 5  ;;  %v5428_v24 = vcombine.low %v5398_v17, %v5410_v12  ;;  %v4510_v25 = vld [vmem:[%s6894_s1 + $0x18] sm:$0xff]   ;;  %v5437_v3 = vsel %vm541_vm0, %v5282_v60, 0 }
  0x6f   : > { %v775_v5 = vsel %vm4938_vm6, %v770_v0, %v774_v26  ;;  %v780_v9 = vrot.slane %v779_v18, 4  ;;  %v1591_v13 = vsel %vm4869_vm5, %v1589_v59, %v1590_v21  ;;  %v3792_v39 = vrot.slane %v4930_v41, 9  ;;  %v5474_v59 = vld [vmem:[%s6894_s1 + $0x48] sm:$0xff]  }
  0x70   : > { %v5422_v6 = vcombine.low %v1588_v1, %v1591_v13  ;;  %v1532_v36 = vsel %vm4869_vm5, %v3785_v19, %v1531_v40  ;;  %v1533_v22 = vrot.slane %v1531_v40, 4  ;;  %v1580_v35 = vrot.slane %v4934_v46, 5  ;;  %v4512_v40 = vld [vmem:[%s6894_s1 + $0x20] sm:$0xff]  }
  0x71   : > { %v785_v38 = vsel %vm4938_vm6, %v780_v9, %v784_v54  ;;  %v1583_v31 = vrot.slane %v5025_v43, 5  ;;  %v3784_v48 = vrot.slane %v4948_v56, 9  ;;  %4075 = vmatmul.mubr.msk.bf16.gmra.mxu0 %vm541_vm0, %v4508_v4  ;;  %v1524_v46 = vrot.slane %v4951_v57, 5 }
  0x72   : > { %v3755_v11 = vcombine.low %v775_v5, %v785_v38  ;;  %4375 = vmatprep.subr.msk.bf16.mxu0 %vm541_vm0, %v5422_v6  ;;  %v1535_v52 = vsel %vm4869_vm5, %v1533_v22, %v1534_v33  ;;  %v1581_v60 = vsel %vm4869_vm5, %v3792_v39, %v1580_v35  ;;  %v1582_v41 = vrot.slane %v1580_v35, 4  ;;  %4076 = vmatprep.mubr.msk.bf16.mxu0 %vm541_vm0, %v4510_v25 }
  0x73   : > { %v3825_v16 = vcombine.low %v1532_v36, %v1535_v52  ;;  %v1527_v58 = vrot.slane %v5041_v55, 5  ;;  %v3791_v0 = vrot.slane %v4990_v49, 9  ;;  %v1573_v43 = vrot.slane %v4993_v50, 5 }
  0x74   : > { %v1276_v7 = vsel %vm541_vm0, %v3755_v11, 0  ;;  %v1584_v4 = vsel %vm4869_vm5, %v1582_v41, %v1583_v31  ;;  %v1525_v57 = vsel %vm4869_vm5, %v3784_v48, %v1524_v46  ;;  %v1526_v26 = vrot.slane %v1524_v46, 4  ;;  %v7036_v11 = vld [vmem:[#allocation30_spill] sm:$0xff]  ;;  %v7037_v31 = vld [vmem:[#allocation24_spill] sm:$0xff] }
  0x75   : > { %4101 = vmatpush3.bf16.xpose.msra.mxu1 %v1276_v7  ;;  %v5457_v56 = vsel %vm541_vm0, %v3825_v16, 0  ;;  %v5466_v55 = vcombine.low %v1581_v60, %v1584_v4  ;;  %v1574_v49 = vsel %vm4869_vm5, %v3791_v0, %v1573_v43  ;;  %v1575_v50 = vrot.slane %v1573_v43, 4  ;;  %v4658_v48 = vld [vmem:[%s6894_s1 + $0x40] sm:$0xff]   ;;  %v7039_v60 = vld [vmem:[#allocation38_spill] sm:$0xff] }
  0x76   : > { %4121 = vmatpush3.bf16.xpose.msra.mxu0 %v5457_v56  ;;  %4382 = vmatprep.subr.msk.bf16.mxu1 %vm541_vm0, %v5428_v24  ;;  %v1576_v54 = vrot.slane %v5095_v20, 5  ;;  %v1528_v18 = vsel %vm4869_vm5, %v1526_v26, %v1527_v58  ;;  %v3783_v1 = vrot.slane %v5003_v63, 9  ;;  %v1517_v21 = vrot.slane %v5006_v29, 5  ;;  %v7041_v0 = vld [vmem:[#allocation26_spill] sm:$0xff]  ;;  %v7042_v4 = vld [vmem:[#allocation8_spill] sm:$0xff] }
  0x77   : > { %v1520_v19 = vrot.slane %v5113_v62, 5  ;;  %4376 = vmatprep.subr.msk.bf16.mxu0 %vm541_vm0, %v5466_v55  ;;  %v3824_v20 = vcombine.low %v1525_v57, %v1528_v18  ;;  %v3790_v5 = vrot.slane %v5050_v14, 9  ;;  %v1566_v9 = vrot.slane %v5062_v61, 5  ;;  %v7035_v61 = vld [vmem:[#allocation21_spill] sm:$0xff]  ;;  %v4511_v18 = vld [vmem:[%s6894_s1 + $0x50] sm:$0xff]  }
  0x78   : > { %v1577_v33 = vsel %vm4869_vm5, %v1575_v50, %v1576_v54  ;;  %v1518_v29 = vsel %vm4869_vm5, %v3783_v1, %v1517_v21  ;;  %v1519_v62 = vrot.slane %v1517_v21, 4  ;;  %v1569_v13 = vrot.slane %v5155_v2, 5  ;;  %v7043_v50 = vld [vmem:[#allocation27_spill] sm:$0xff] }
  0x79   : > { %v5490_v63 = vcombine.low %v1574_v49, %v1577_v33  ;;  %v5496_v36 = vsel %vm541_vm0, %v3824_v20, 0  ;;  %v1567_v22 = vsel %vm4869_vm5, %v3790_v5, %v1566_v9  ;;  %v1568_v38 = vrot.slane %v1566_v9, 4  ;;  %4077 = vmatmul.mubr.msk.bf16.gmra.mxu0 %vm541_vm0, %v4510_v25  ;;  %v7038_v25 = vld [vmem:[#allocation25_spill] sm:$0xff]  ;;  %v7044_v21 = vld [vmem:[#allocation39_spill] sm:$0xff]  ;;  %v7045_v20 = vld [vmem:[#allocation32_spill] sm:$0xff] }
  0x7a   : > { %v3782_v39 = vrot.slane %v5076_v28, 9  ;;  %v1521_v14 = vsel %vm4869_vm5, %v1519_v62, %v1520_v19  ;;  %v1510_v35 = vrot.slane %v7035_v61, 5  ;;  %v1513_v52 = vrot.slane %v7036_v11, 5  ;;  %4078 = vmatprep.mubr.msk.bf16.mxu0 %vm541_vm0, %v4512_v40  ;;  %v7046_v5 = vld [vmem:[#allocation33_spill] sm:$0xff] }
  0x7b   : > { %v3789_v2 = vrot.slane %v7037_v31, 9  ;;  %v1570_v28 = vsel %vm4869_vm5, %v1568_v38, %v1569_v13  ;;  %v1559_v16 = vrot.slane %v7038_v25, 5  ;;  %v1562_v41 = vrot.slane %v7039_v60, 5  ;;  %v4514_v62 = vld [vmem:[%s6894_s1 + $0x28] sm:$0xff]  }
  0x7c   : > { %4103 = vmatmul.mubr.msk.bf16.vlgmr.msra.gmra.mxu1 %vm541_vm0, %v4658_v48  ;;  %v5519_v46 = vcombine.low %v1567_v22, %v1570_v28  ;;  %v5523_v7 = vsel %vm4869_vm5, %v3782_v39, %v1510_v35  ;;  %v1512_v58 = vrot.slane %v1510_v35, 4  ;;  %v3781_v43 = vrot.slane %v7041_v0, 9  ;;  %v7048_v35 = vld [vmem:[#allocation44_spill] sm:$0xff] }
  0x7d   : > { %4151 = vmatpush3.bf16.xpose.msra.mxu1 %v5437_v3  ;;  %4104 = vmatprep.mubr.msk.bf16.mxu1 %vm541_vm0, %v5474_v59  ;;  %v3823_v57 = vcombine.low %v1518_v29, %v1521_v14  ;;  %v1560_v26 = vsel %vm4869_vm5, %v3789_v2, %v1559_v16  ;;  %v1561_v49 = vrot.slane %v1559_v16, 4  ;;  %v1503_v54 = vrot.slane %v7043_v50, 5  ;;  %v7049_v2 = vld [vmem:[#allocation35_spill] sm:$0xff] }
  0x7e   : > { %7040 = vst [vmem:[#allocation21_spill] sm:$0xff] %v5519_v46  ;;  %4123 = vmatpush3.bf16.xpose.msra.mxu0 %v5496_v36  ;;  %4383 = vmatprep.subr.msk.bf16.mxu1 %vm541_vm0, %v7042_v4  ;;  %v1514_v1 = vsel %vm4869_vm5, %v1512_v58, %v1513_v52  ;;  %v1506_v19 = vrot.slane %v7044_v21, 5  ;;  %v3788_v33 = vrot.slane %v7045_v20, 9  ;;  %v1552_v9 = vrot.slane %v7046_v5, 5  ;;  %v4516_v21 = vld [vmem:[%s6894_s1 + $0x30] sm:$0xff]  }
  0x7f   : > { %4377 = vmatprep.subr.msk.bf16.mxu0 %vm541_vm0, %v5490_v63  ;;  %v3822_v29 = vcombine.low %v5523_v7, %v1514_v1  ;;  %v1563_v13 = vsel %vm4869_vm5, %v1561_v49, %v1562_v41  ;;  %v5550_v22 = vsel %vm4869_vm5, %v3781_v43, %v1503_v54  ;;  %v1505_v38 = vrot.slane %v1503_v54, 4  ;;  %v7050_v41 = vld [vmem:[#allocation42_spill] sm:$0xff]  ;;  %v7051_v43 = vld [vmem:[#allocation9_spill] sm:$0xff]  ;;  %v4513_v1 = vld [vmem:[%s6894_s1 + $0x58] sm:$0xff]  }
  0x80   : > { %v5552_v39 = vcombine.low %v1560_v26, %v1563_v13  ;;  %v1553_v14 = vsel %vm4869_vm5, %v3788_v33, %v1552_v9  ;;  %v1554_v61 = vrot.slane %v1552_v9, 4  ;;  %v1555_v11 = vrot.slane %v7048_v35, 5  ;;  %v7052_v26 = vld [vmem:[#allocation10_spill] sm:$0xff]  ;;  %v5635_v35 = vld [vmem:[%s4852_s13 + $0xc8] sm:$0x1] }
  0x81   : > { %v5558_v52 = vsel %vm541_vm0, %v3823_v57, 0  ;;  %v5562_v31 = vsel %vm4869_vm5, %v1505_v38, %v1506_v19  ;;  %v3780_v48 = vrot.slane %v7049_v2, 9  ;;  %v1496_v28 = vrot.slane %v5205_v8, 5  ;;  %4079 = vmatmul.mubr.msk.bf16.gmra.mxu0 %vm541_vm0, %v4512_v40 }
  0x82   : > { %7047 = vst [vmem:[#allocation30_spill] sm:$0xff] %v5552_v39  ;;  %v3821_v25 = vcombine.low %v5550_v22, %v5562_v31  ;;  %v1556_v16 = vsel %vm4869_vm5, %v1554_v61, %v1555_v11  ;;  %v1499_v60 = vrot.slane %v5304_v42, 5  ;;  %v3787_v7 = vrot.slane %v7050_v41, 9  ;;  %4080 = vmatprep.mubr.msk.bf16.mxu0 %vm541_vm0, %v4514_v62  ;;  %v7054_v61 = vld [vmem:[#allocation11_spill] sm:$0xff] }
  0x83   : > { %v5576_v58 = vcombine.low %v1553_v14, %v1556_v16  ;;  %v5580_v8 = vsel %vm4869_vm5, %v3780_v48, %v1496_v28  ;;  %v1498_v40 = vrot.slane %v1496_v28, 4  ;;  %v1545_v0 = vrot.slane %v5252_v27, 5  ;;  %v255_v14 = vld [vmem:[%s6895_s2] sm:$0xff]  ;;  %v4518_v28 = vld [vmem:[%s6894_s1 + $0x38] sm:$0xff]  }
  0x84   : > { %4105 = vmatmul.mubr.msk.bf16.gmra.mxu1 %vm541_vm0, %v5474_v59  ;;  %v1548_v42 = vrot.slane %v5328_v37, 5  ;;  %v3779_v57 = vrot.slane %v5267_v51, 9  ;;  %v1489_v59 = vrot.slane %v5270_v34, 5  ;;  %v1492_v54 = vrot.slane %v5365_v45, 5  ;;  %v4515_v16 = vld [vmem:[%s6894_s1 + $0x60] sm:$0xff]  }
  0x85   : > { %4153 = vmatpush3.bf16.xpose.msra.mxu1 %v7051_v43  ;;  %4106 = vmatprep.mubr.msk.bf16.mxu1 %vm541_vm0, %v4511_v18  ;;  %v1500_v49 = vsel %vm4869_vm5, %v1498_v40, %v1499_v60  ;;  %v1546_v27 = vsel %vm4869_vm5, %v3787_v7, %v1545_v0  ;;  %v1547_v50 = vrot.slane %v1545_v0, 4  ;;  %v2156_v19 = vshrl.u32 %v5398_v17, 16  ;;  %v256_v40 = vld [vmem:[%s6895_s2 + $0x8] sm:$0xff]  ;;  %v258_v0 = vld [vmem:[%s6895_s2 + $0x18] sm:$0xff] }
  0x86   : > { %4125 = vmatpush3.bf16.xpose.msra.mxu0 %v5558_v52  ;;  %4384 = vmatprep.subr.msk.bf16.mxu1 %vm541_vm0, %v7052_v26  ;;  %v3820_v51 = vcombine.low %v5580_v8, %v1500_v49  ;;  %v5601_v34 = vsel %vm4869_vm5, %v3779_v57, %v1489_v59  ;;  %v1491_v37 = vrot.slane %v1489_v59, 4  ;;  %v2159_v20 = vshll.u32 %v5398_v17, 16  ;;  %v7057_v59 = vld [vmem:[#allocation16_spill] sm:$0xff] }
  0x87   : > { %4378 = vmatprep.subr.msk.bf16.mxu0 %vm541_vm0, %v5519_v46  ;;  %v1549_v45 = vsel %vm4869_vm5, %v1547_v50, %v1548_v42  ;;  %v2169_v9 = vshrl.u32 %v5410_v12, 16  ;;  %v2165_v22 = vshll.u32 %v5410_v12, 16  ;;  %v5624_v38 = vsel %vm541_vm0, %v3822_v29, 0  ;;  %v257_v29 = vld [vmem:[%s6895_s2 + $0x10] sm:$0xff]  ;;  %v4520_v49 = vld [vmem:[%s6894_s1 + $0x80] sm:$0xff]  }
  0x88   : > { %v5613_v33 = vcombine.low %v1546_v27, %v1549_v45  ;;  %v5617_v5 = vsel %vm4869_vm5, %v1491_v37, %v1492_v54  ;;  %7053 = vst [vmem:[#allocation24_spill] sm:$0xff] %v5624_v38  ;;  %v2161_v11 = vrot.slane %v2159_v20, 5  ;;  %v4751_v48 = vmov 0   ;;  %v7056_v42 = vld [vmem:[#allocation14_spill] sm:$0xff]  ;;  %v259_v54 = vld [vmem:[%s6895_s2 + $0x20] sm:$0xff]  ;;  %v260_v37 = vld [vmem:[%s6895_s2 + $0x28] sm:$0xff] }
  0x89   : > { %v3819_v13 = vcombine.low %v5601_v34, %v5617_v5  ;;  %4081 = vmatmul.mubr.msk.bf16.gmra.mxu0 %vm541_vm0, %v4514_v62  ;;  %v7055_v62 = vld [vmem:[#allocation12_spill] sm:$0xff]  ;;  %v2167_v31 = vrot.slane %v2165_v22, 5  ;;  %v2171_v2 = vrot.slane %v2169_v9, 4  ;;  %4486 = vset.pattern.permute.xlu0 %v4751_v48  ;;  %v2175_v60 = vshll.u32 %v5635_v35, 16  ;;  %v262_v9 = vld [vmem:[%s6895_s2 + $0x38] sm:$0xff]  ;;  %v4519_v22 = vld [vmem:[%s6894_s1 + $0x70] sm:$0xff]  }
  0x8a   : > { %4082 = vmatprep.mubr.msk.bf16.mxu0 %vm541_vm0, %v4516_v21  ;;  %273 = vperm.xlu0 %4486, %v255_v14   ;;  %v5653_v8 = vsel %vm541_vm0, %v3821_v25, 0  ;;  %v5667_v25 = vsel %vm541_vm0, %v3820_v51, 0  ;;  %v4517_v51 = vld [vmem:[%s6894_s1 + $0x68] sm:$0xff]   ;;  %v7059_v45 = vld [vmem:[#allocation20_spill] sm:$0xff]  ;;  %v269_v34 = vld [vmem:[%s6895_s2 + $0x70] sm:$0xff] }
  0x8b   : > { %4487 = vset.pattern.permute.xlu1 %v4751_v48  ;;  %v2172_v7 = vor.u32 %v2171_v2, %v2167_v31  ;;  %v2177_v57 = vrot.slane %v2175_v60, 5  ;;  %v267_v14 = vld [vmem:[%s6895_s2 + $0x60] sm:$0xff]  ;;  %v7061_v5 = vld [vmem:[#allocation29_spill] sm:$0xff]  ;;  %v270_v2 = vld [vmem:[%s6895_s2 + $0x78] sm:$0xff] }
  0x8c   : > { %4107 = vmatmul.mubr.msk.bf16.gmra.mxu1 %vm541_vm0, %v4511_v18  ;;  %v2158_v18 = vrot.slane %v2156_v19, 4  ;;  %283 = vperm.xlu1 %4487, %v257_v29   ;;  %v1729_v29 = vsel %vm541_vm0, %v3819_v13, 0  ;;  %v2414_v13 = vrot.slane %v5410_v12, 5  ;;  %v4521_v48 = vld [vmem:[%s6894_s1 + $0x78] sm:$0xff]   ;;  %v3909_v12 = vrot.slane %v5398_v17, 9  ;;  %v7063_v17 = vld [vmem:[#allocation37_spill] sm:$0xff] }
  0x8d   : > { %4155 = vmatpush3.bf16.xpose.msra.mxu1 %v7054_v61  ;;  %4108 = vmatprep.mubr.msk.bf16.mxu1 %vm541_vm0, %v4513_v1  ;;  %v2173_v50 = vrot.slane %v2172_v7, 4  ;;  %v5749_v7 = vsel %vm541_vm0, %v5400_v23, 0 }
  0x8e   : > { %4127 = vmatpush3.bf16.xpose.msra.mxu0 %v5624_v38  ;;  %4385 = vmatprep.subr.msk.bf16.mxu1 %vm541_vm0, %v7055_v62  ;;  %v2162_v41 = vor.u32 %v2161_v11, %v2158_v18  ;;  %v268_v11 = vld [vmem:[%s6895_s2 + $0x68] sm:$0xff]  ;;  %v2416_v60 = vrot.slane %v2414_v13, 4  ;;  %v2415_v23 = vsel %vm4869_vm5, %v3909_v12, %v2414_v13  ;;  %v7071_v13 = vld [vmem:[#allocation34_spill] sm:$0xff]  ;;  %v4531_v12 = vld [vmem:[%s6894_s1 + $0xe0] sm:$0xff]  }
  0x8f   : > { %4379 = vmatprep.subr.msk.bf16.mxu0 %vm541_vm0, %v5552_v39  ;;  %278 = vperm.xlu0 %4486, %v256_v40   ;;  %v2178_v20 = vsel %vm4938_vm6, %v2173_v50, %v2177_v57  ;;  %v7062_v40 = vld [vmem:[#allocation31_spill] sm:$0xff] }
  0x90   : > { %v2163_v27 = vrot.slane %v2162_v41, 4  ;;  %288 = vperm.xlu1 %4487, %v258_v0   ;;  %v2417_v41 = vrot.slane %v5635_v35, 5  ;;  %v264_v0 = vld [vmem:[%s6895_s2 + $0x48] sm:$0xff]  ;;  %v265_v35 = vld [vmem:[%s6895_s2 + $0x50] sm:$0xff]  ;;  %v266_v50 = vld [vmem:[%s6895_s2 + $0x58] sm:$0xff] }
  0x91   : > { %4083 = vmatmul.mubr.msk.bf16.gmra.mxu0 %vm541_vm0, %v4516_v21  ;;  %v261_v21 = vld [vmem:[%s6895_s2 + $0x30] sm:$0xff] }
  0x92   : > { %4084 = vmatprep.mubr.msk.bf16.mxu0 %vm541_vm0, %v4518_v28  ;;  %v2168_v19 = vsel %vm4938_vm6, %v2163_v27, %v2167_v31  ;;  %v7060_v31 = vld [vmem:[#allocation23_spill] sm:$0xff]  ;;  %v2418_v57 = vsel %vm4869_vm5, %v2416_v60, %v2417_v41  ;;  %v7064_v27 = vld [vmem:[#allocation13_spill] sm:$0xff]  ;;  %v4532_v60 = vld [vmem:[%s6894_s1 + $0xb0] sm:$0xff]  }
  0x93   : > { %293 = vperm.xlu0 %4486, %v259_v54   ;;  %v5716_v18 = vcombine.low %v2168_v19, %v2178_v20  ;;  %v5776_v54 = vcombine.low %v2415_v23, %v2418_v57  ;;  %v7067_v19 = vld [vmem:[#allocation17_spill] sm:$0xff]  ;;  %v7074_v41 = vld [vmem:[#allocation43_spill] sm:$0xff] }
  0x94   : > { %4109 = vmatmul.mubr.msk.bf16.gmra.mxu1 %vm541_vm0, %v4513_v1  ;;  %v7058_v1 = vld [vmem:[#allocation18_spill] sm:$0xff]  ;;  %298 = vperm.xlu1 %4487, %v260_v37   ;;  %v7065_v37 = vld [vmem:[#allocation41_spill] sm:$0xff]  ;;  %v4534_v23 = vld [vmem:[%s6894_s1 + $0xb8] sm:$0xff]  }
  0x95   : > { %4157 = vmatpush3.bf16.xpose.msra.mxu1 %v7056_v42  ;;  %4110 = vmatprep.mubr.msk.bf16.mxu1 %vm541_vm0, %v4515_v16  ;;  %v4525_v20 = vld [vmem:[%s6894_s1 + $0xc8] sm:$0xff]  }
  0x96   : > { %4129 = vmatpush3.bf16.xpose.msra.mxu0 %v5653_v8  ;;  %4386 = vmatprep.subr.msk.bf16.mxu1 %vm541_vm0, %v7057_v59  ;;  %v5867_v57 = vld [vmem:[%s4852_s13 + $0xcc] sm:$0xf] }
  0x97   : > { %4380 = vmatprep.subr.msk.bf16.mxu0 %vm541_vm0, %v5576_v58  ;;  %303 = vperm.xlu0 %4486, %v261_v21   ;;  %v7066_v21 = vld [vmem:[#allocation15_spill] sm:$0xff] }
  0x98   : > { %308 = vperm.xlu1 %4487, %v262_v9   ;;  %v5796_v9 = vsel %vm541_vm0, %v5613_v33, 0 }
  0x99   : > { %4085 = vmatmul.mubr.msk.bf16.gmra.mxu0 %vm541_vm0, %v4518_v28  ;;  %v263_v28 = vld [vmem:[%s6895_s2 + $0x40] sm:$0xff] }
  0x9a   : > { %4134 = vmatprep.mubr.msk.bf16.mxu0 %vm541_vm0, %v4520_v49 }
  0x9b   : > { %333 = vperm.xlu0 %4486, %v267_v14   ;;  %v7068_v14 = vld [vmem:[#allocation19_spill] sm:$0xff] }
  0x9c   : > { %4111 = vmatmul.mubr.msk.bf16.gmra.mxu1 %vm541_vm0, %v4515_v16  ;;  %338 = vperm.xlu1 %4487, %v268_v11   ;;  %v4522_v16 = vld [vmem:[%s6894_s1 + $0x88] sm:$0xff]   ;;  %v4528_v11 = vld [vmem:[%s6894_s1 + $0xa0] sm:$0xff]  }
  0x9d   : > { %4159 = vmatpush3.bf16.xpose.msra.mxu1 %v7058_v1  ;;  %4112 = vmatprep.mubr.msk.bf16.mxu1 %vm541_vm0, %v4517_v51 }
  0x9e   : > { %4131 = vmatpush3.bf16.xpose.msra.mxu0 %v5667_v25  ;;  %4387 = vmatprep.subr.msk.bf16.mxu1 %vm541_vm0, %v7059_v45 }
  0x9f   : > { %4381 = vmatprep.subr.msk.bf16.mxu0 %vm541_vm0, %v5613_v33  ;;  %343 = vperm.xlu0 %4486, %v269_v34   ;;  %v7069_v33 = vld [vmem:[#allocation22_spill] sm:$0xff]  ;;  %v7070_v34 = vld [vmem:[#allocation28_spill] sm:$0xff] }
  0xa0   : > { %348 = vperm.xlu1 %4487, %v270_v2   ;;  %v4529_v2 = vld [vmem:[%s6894_s1 + $0xd8] sm:$0xff]  }
  0xa3   : > { %313 = vperm.xlu0 %4486, %v263_v28   ;;  %v7072_v28 = vld [vmem:[#allocation36_spill] sm:$0xff] }
  0xa4   : > { %4113 = vmatmul.mubr.msk.bf16.gmra.mxu1 %vm541_vm0, %v4517_v51  ;;  %318 = vperm.xlu1 %4487, %v264_v0   ;;  %v4524_v51 = vld [vmem:[%s6894_s1 + $0x90] sm:$0xff]   ;;  %v7075_v0 = vld [vmem:[#allocation45_spill] sm:$0xff] }
  0xa5   : > { %4161 = vmatpush3.bf16.xpose.msra.mxu1 %v7060_v31  ;;  %4114 = vmatprep.mubr.msk.bf16.mxu1 %vm541_vm0, %v4519_v22 }
  0xa6   : > { %4133 = vmatpush3.bf16.xpose.msra.mxu0 %v1729_v29  ;;  %4388 = vmatprep.subr.msk.bf16.mxu1 %vm541_vm0, %v7061_v5  ;;  %v4527_v29 = vld [vmem:[%s6894_s1 + $0xd0] sm:$0xff]  }
  0xa7   : > { %4390 = vmatprep.subr.msk.bf16.mxu0 %vm541_vm0, %v5716_v18  ;;  %323 = vperm.xlu0 %4486, %v265_v35   ;;  %v4533_v35 = vld [vmem:[%s6894_s1 + $0xe8] sm:$0xff]  }
  0xa8   : > { %328 = vperm.xlu1 %4487, %v266_v50   ;;  %v2886_v50 = vshrl.u32 %v5867_v57, 16 }
  0xac   : > { %4115 = vmatmul.mubr.msk.bf16.gmra.mxu1 %vm541_vm0, %v4519_v22  ;;  %v4526_v22 = vld [vmem:[%s6894_s1 + $0x98] sm:$0xff]  }
  0xad   : > { %4163 = vmatpush3.bf16.xpose.msra.mxu1 %v7062_v40  ;;  %4116 = vmatprep.mubr.msk.bf16.mxu1 %vm541_vm0, %v4521_v48 }
  0xae   : > { %4135 = vmatmul.mubr.msk.bf16.vlgmr.msra.gmra.mxu0 %vm541_vm0, %v4520_v49  ;;  %4389 = vmatprep.subr.msk.bf16.mxu1 %vm541_vm0, %v7063_v17  ;;  %v4523_v49 = vld [vmem:[%s6894_s1 + $0xc0] sm:$0xff]  }
  0xaf   : > { %4183 = vmatpush3.bf16.xpose.msra.mxu0 %v5749_v7  ;;  %4136 = vmatprep.mubr.msk.bf16.mxu0 %vm541_vm0, %v4522_v16 }
  0xb0   : > { %4391 = vmatprep.subr.msk.bf16.mxu0 %vm541_vm0, %v7064_v27 }
  0xb4   : > { %4117 = vmatmul.mubr.msk.bf16.gmra.mxu1 %vm541_vm0, %v4521_v48  ;;  %v4530_v48 = vld [vmem:[%s6894_s1 + $0xa8] sm:$0xff]  }
  0xb5   : > { %4165 = vmatpush3.bf16.xpose.msra.mxu1 %v7065_v37  ;;  %4166 = vmatprep.mubr.msk.bf16.mxu1 %vm541_vm0, %v4523_v49 }
  0xb6   : > { %4137 = vmatmul.mubr.msk.bf16.gmra.mxu0 %vm541_vm0, %v4522_v16  ;;  %4398 = vmatprep.subr.msk.bf16.mxu1 %vm541_vm0, %v5776_v54  ;;  %v7073_v16 = vld [vmem:[#allocation40_spill] sm:$0xff] }
  0xb7   : > { %4185 = vmatpush3.bf16.xpose.msra.mxu0 %v7066_v21  ;;  %4138 = vmatprep.mubr.msk.bf16.mxu0 %vm541_vm0, %v4524_v51 }
  0xb8   : > { %4392 = vmatprep.subr.msk.bf16.mxu0 %vm541_vm0, %v7067_v19 }
  0xbc   : > { %4167 = vmatmul.mubr.msk.bf16.vlgmr.msra.gmra.mxu1 %vm541_vm0, %v4523_v49  ;;  %v5870_v49 = vld [vmem:[%s4852_s13 + $0xd0] sm:$0xf] }
  0xbd   : > { %4215 = vmatpush3.bf16.xpose.msra.mxu1 %v5796_v9  ;;  %4168 = vmatprep.mubr.msk.bf16.mxu1 %vm541_vm0, %v4525_v20  ;;  %v2899_v37 = vshrl.u32 %v5870_v49, 16 }
  0xbe   : > { %4139 = vmatmul.mubr.msk.bf16.gmra.mxu0 %vm541_vm0, %v4524_v51  ;;  %4399 = vmatprep.subr.msk.bf16.mxu1 %vm541_vm0, %v5350_v44  ;;  %v2889_v51 = vshll.u32 %v5867_v57, 16 }
  0xbf   : > { %4187 = vmatpush3.bf16.xpose.msra.mxu0 %v7068_v14  ;;  %4140 = vmatprep.mubr.msk.bf16.mxu0 %vm541_vm0, %v4526_v22 }
  0xc0   : > { %4393 = vmatprep.subr.msk.bf16.mxu0 %vm541_vm0, %v7069_v33 }
  0xc4   : > { %4169 = vmatmul.mubr.msk.bf16.gmra.mxu1 %vm541_vm0, %v4525_v20  ;;  %v2895_v20 = vshll.u32 %v5870_v49, 16 }
  0xc5   : > { %4217 = vmatpush3.bf16.xpose.msra.mxu1 %v5404_v15  ;;  %4170 = vmatprep.mubr.msk.bf16.mxu1 %vm541_vm0, %v4527_v29 }
  0xc6   : > { %4141 = vmatmul.mubr.msk.bf16.gmra.mxu0 %vm541_vm0, %v4526_v22  ;;  %4400 = vmatprep.subr.msk.bf16.mxu1 %vm541_vm0, %v5422_v6  ;;  %v4535_v22 = vld [vmem:[%s6894_s1 + $0xf0] sm:$0xff]  }
  0xc7   : > { %4189 = vmatpush3.bf16.xpose.msra.mxu0 %v7070_v34  ;;  %4142 = vmatprep.mubr.msk.bf16.mxu0 %vm541_vm0, %v4528_v11 }
  0xc8   : > { %4394 = vmatprep.subr.msk.bf16.mxu0 %vm541_vm0, %v7071_v13 }
  0xcc   : > { %4171 = vmatmul.mubr.msk.bf16.gmra.mxu1 %vm541_vm0, %v4527_v29  ;;  %v4536_v29 = vld [vmem:[%s6894_s1 + $0x100] sm:$0xff]  }
  0xcd   : > { %4219 = vmatpush3.bf16.xpose.msra.mxu1 %v5457_v56  ;;  %4172 = vmatprep.mubr.msk.bf16.mxu1 %vm541_vm0, %v4529_v2 }
  0xce   : > { %4143 = vmatmul.mubr.msk.bf16.gmra.mxu0 %vm541_vm0, %v4528_v11  ;;  %4401 = vmatprep.subr.msk.bf16.mxu1 %vm541_vm0, %v5466_v55  ;;  %v2888_v11 = vrot.slane %v2886_v50, 4 }
  0xcf   : > { %4191 = vmatpush3.bf16.xpose.msra.mxu0 %v7072_v28  ;;  %4144 = vmatprep.mubr.msk.bf16.mxu0 %vm541_vm0, %v4530_v48 }
  0xd0   : > { %4395 = vmatprep.subr.msk.bf16.mxu0 %vm541_vm0, %v7073_v16 }
  0xd4   : > { %4173 = vmatmul.mubr.msk.bf16.gmra.mxu1 %vm541_vm0, %v4529_v2  ;;  %v2891_v2 = vrot.slane %v2889_v51, 5 }
  0xd5   : > { %4221 = vmatpush3.bf16.xpose.msra.mxu1 %v5496_v36  ;;  %4174 = vmatprep.mubr.msk.bf16.mxu1 %vm541_vm0, %v4531_v12 }
  0xd6   : > { %4145 = vmatmul.mubr.msk.bf16.gmra.mxu0 %vm541_vm0, %v4530_v48  ;;  %4402 = vmatprep.subr.msk.bf16.mxu1 %vm541_vm0, %v5490_v63  ;;  %v2897_v48 = vrot.slane %v2895_v20, 5  ;;  %v2892_v50 = vor.u32 %v2891_v2, %v2888_v11  ;;  %v4541_v2 = vld [vmem:[%s6894_s1 + $0x110] sm:$0xff]  }
  0xd7   : > { %4193 = vmatpush3.bf16.xpose.msra.mxu0 %v7074_v41  ;;  %4146 = vmatprep.mubr.msk.bf16.mxu0 %vm541_vm0, %v4532_v60 }
  0xd8   : > { %4396 = vmatprep.subr.msk.bf16.mxu0 %vm541_vm0, %v7075_v0  ;;  %v2893_v20 = vrot.slane %v2892_v50, 4  ;;  %v4559_v50 = vld [vmem:[%s6894_s1 + $0x198] sm:$0xff]  }
  0xda   : > { %v2898_v11 = vsel %vm4938_vm6, %v2893_v20, %v2897_v48 }
  0xdc   : > { %4175 = vmatmul.mubr.msk.bf16.gmra.mxu1 %vm541_vm0, %v4531_v12  ;;  %v2901_v12 = vrot.slane %v2899_v37, 4  ;;  %v4537_v37 = vld [vmem:[%s6894_s1 + $0xf8] sm:$0xff]  }
  0xdd   : > { %4223 = vmatpush3.bf16.xpose.msra.mxu1 %v5558_v52  ;;  %4176 = vmatprep.mubr.msk.bf16.mxu1 %vm541_vm0, %v4533_v35 }
  0xde   : > { %4147 = vmatmul.mubr.msk.bf16.gmra.mxu0 %vm541_vm0, %v4532_v60  ;;  %4403 = vmatprep.subr.msk.bf16.mxu1 %vm541_vm0, %v5519_v46  ;;  %v3967_v60 = vcombine.low %v5867_v57, %v5870_v49  ;;  %v5895_v46 = vld [vmem:[%s4852_s13 + $0xd4] sm:$0x1]  ;;  %s6798_s13 = scalar_lea.hbm %s6898_s5, %s4052_s26 }
  0xdf   : > { %4195 = vmatpush3.bf16.xpose.msra.mxu0 %v5331_v30  ;;  %4148 = vmatprep.mubr.msk.bf16.mxu0 %vm541_vm0, %v4534_v23  ;;  %v2905_v51 = vshll.u32 %v5895_v46, 16 }
  0xe0   : > { %4397 = vmatprep.subr.msk.bf16.mxu0 %vm541_vm0, %v5357_v32 }
  0xe4   : > { %4177 = vmatmul.mubr.msk.bf16.gmra.mxu1 %vm541_vm0, %v4533_v35  ;;  %v2902_v35 = vor.u32 %v2901_v12, %v2897_v48 }
  0xe5   : > { %4225 = vmatpush3.bf16.xpose.msra.mxu1 %v5624_v38  ;;  %4178 = vmatprep.mubr.msk.bf16.mxu1 %vm541_vm0, %v4535_v22  ;;  %v2907_v38 = vrot.slane %v2905_v51, 5 }
  0xe6   : > { %4149 = vmatmul.mubr.msk.bf16.gmra.mxu0 %vm541_vm0, %v4534_v23  ;;  %4404 = vmatprep.subr.msk.bf16.mxu1 %vm541_vm0, %v5552_v39  ;;  %v4539_v23 = vld [vmem:[%s6894_s1 + $0x108] sm:$0xff]   ;;  %v2903_v39 = vrot.slane %v2902_v35, 4 }
  0xe7   : > { %4197 = vmatpush3.bf16.xpose.msra.mxu0 %v5379_v53  ;;  %4198 = vmatprep.mubr.msk.bf16.mxu0 %vm541_vm0, %v4536_v29  ;;  %v594_v53 = vsel %vm541_vm0, %v7063_v17, 0  ;;  %v4540_v17 = vld [vmem:[%s6894_s1 + $0x140] sm:$0xff]  }
  0xe8   : > { %4406 = vmatprep.subr.msk.bf16.mxu0 %vm541_vm0, %v3967_v60 }
  0xec   : > { %4179 = vmatmul.mubr.msk.bf16.gmra.mxu1 %vm541_vm0, %v4535_v22  ;;  %v2908_v22 = vsel %vm4938_vm6, %v2903_v39, %v2907_v38  ;;  %v4543_v39 = vld [vmem:[%s6894_s1 + $0x118] sm:$0xff]   ;;  %v4549_v38 = vld [vmem:[%s6894_s1 + $0x130] sm:$0xff]  }
  0xed   : > { %4227 = vmatpush3.bf16.xpose.msra.mxu1 %v5653_v8  ;;  %4180 = vmatprep.mubr.msk.bf16.mxu1 %vm541_vm0, %v4537_v37 }
  0xee   : > { %4199 = vmatmul.mubr.msk.bf16.vlgmr.msra.gmra.mxu0 %vm541_vm0, %v4536_v29  ;;  %4405 = vmatprep.subr.msk.bf16.mxu1 %vm541_vm0, %v5576_v58  ;;  %v4000_v29 = vcombine.low %v2898_v11, %v2908_v22 }
  0xef   : > { %4247 = vmatpush3.bf16.xpose.msra.mxu0 %v594_v53  ;;  %4200 = vmatprep.mubr.msk.bf16.mxu0 %vm541_vm0, %v4539_v23 }
  0xf0   : > { %4407 = vmatprep.subr.msk.bf16.mxu0 %vm541_vm0, %v5428_v24  ;;  %v1303_v24 = vsel %vm541_vm0, %v5357_v32, 0  ;;  %v4544_v32 = vld [vmem:[%s6894_s1 + $0x150] sm:$0xff]  }
  0xf4   : > { %4181 = vmatmul.mubr.msk.bf16.gmra.mxu1 %vm541_vm0, %v4537_v37 }
  0xf5   : > { %4229 = vmatpush3.bf16.xpose.msra.mxu1 %v5667_v25  ;;  %4230 = vmatprep.mubr.msk.bf16.mxu1 %vm541_vm0, %v4540_v17  ;;  %v4009_v25 = vrot.slane %v5867_v57, 9 }
  0xf6   : > { %4201 = vmatmul.mubr.msk.bf16.gmra.mxu0 %vm541_vm0, %v4539_v23  ;;  %4414 = vmatprep.subr.msk.bf16.mxu1 %vm541_vm0, %v4000_v29 }
  0xf7   : > { %4249 = vmatpush3.bf16.xpose.msra.mxu0 %v5437_v3  ;;  %4202 = vmatprep.mubr.msk.bf16.mxu0 %vm541_vm0, %v4541_v2  ;;  %v4545_v3 = vld [vmem:[%s6894_s1 + $0x120] sm:$0xff]  }
  0xf8   : > { %4408 = vmatprep.subr.msk.bf16.mxu0 %vm541_vm0, %v7042_v4  ;;  %v4546_v4 = vld [vmem:[%s6894_s1 + $0x158] sm:$0xff]  }
  0xfc   : > { %4231 = vmatmul.mubr.msk.bf16.vlgmr.msra.gmra.mxu1 %vm541_vm0, %v4540_v17 }
  0xfd   : > { %4279 = vmatpush3.bf16.xpose.msra.mxu1 %v1303_v24  ;;  %4232 = vmatprep.mubr.msk.bf16.mxu1 %vm541_vm0, %v4542_v47 }
  0xfe   : > { %4203 = vmatmul.mubr.msk.bf16.gmra.mxu0 %vm541_vm0, %v4541_v2  ;;  %4415 = vmatprep.subr.msk.bf16.mxu1 %vm541_vm0, %v5716_v18 }
  0xff   : > { %4251 = vmatpush3.bf16.xpose.msra.mxu0 %v7051_v43  ;;  %4204 = vmatprep.mubr.msk.bf16.mxu0 %vm541_vm0, %v4543_v39  ;;  %v4547_v43 = vld [vmem:[%s6894_s1 + $0x128] sm:$0xff]  }
 0x100   : > { %4409 = vmatprep.subr.msk.bf16.mxu0 %vm541_vm0, %v7052_v26  ;;  %v4548_v26 = vld [vmem:[%s6894_s1 + $0x160] sm:$0xff]  }
 0x104   : > { %4233 = vmatmul.mubr.msk.bf16.gmra.mxu1 %vm541_vm0, %v4542_v47 }
 0x105   : > { %4281 = vmatpush3.bf16.xpose.msra.mxu1 %v5749_v7  ;;  %4234 = vmatprep.mubr.msk.bf16.mxu1 %vm541_vm0, %v4544_v32  ;;  %v4553_v7 = vld [vmem:[%s6894_s1 + $0x180] sm:$0xff]   ;;  %v274_v57 = vpop.permute.xlu0 %273 }
 0x106   : > { %4205 = vmatmul.mubr.msk.bf16.gmra.mxu0 %vm541_vm0, %v4543_v39  ;;  %4416 = vmatprep.subr.msk.bf16.mxu1 %vm541_vm0, %v7064_v27 }
 0x107   : > { %4253 = vmatpush3.bf16.xpose.msra.mxu0 %v7054_v61  ;;  %4206 = vmatprep.mubr.msk.bf16.mxu0 %vm541_vm0, %v4545_v3  ;;  %v4550_v61 = vld [vmem:[%s6894_s1 + $0x168] sm:$0xff]   ;;  %v284_v48 = vpop.permute.xlu1 %283 }
 0x108   : > { %4410 = vmatprep.subr.msk.bf16.mxu0 %vm541_vm0, %v7055_v62  ;;  %v3144_v62 = vrot.slane %v5870_v49, 5 }
 0x10a   : > { %v3145_v18 = vsel %vm4869_vm5, %v4009_v25, %v3144_v62  ;;  %v279_v51 = vpop.permute.xlu0 %278 }
 0x10b   : > { %v289_v29 = vpop.permute.xlu1 %288 }
 0x10c   : > { %4235 = vmatmul.mubr.msk.bf16.gmra.mxu1 %vm541_vm0, %v4544_v32 }
 0x10d   : > { %4283 = vmatpush3.bf16.xpose.msra.mxu1 %v7066_v21  ;;  %4236 = vmatprep.mubr.msk.bf16.mxu1 %vm541_vm0, %v4546_v4  ;;  %v4554_v21 = vld [vmem:[%s6894_s1 + $0x178] sm:$0xff]  }
 0x10e   : > { %4207 = vmatmul.mubr.msk.bf16.gmra.mxu0 %vm541_vm0, %v4545_v3  ;;  %4417 = vmatprep.subr.msk.bf16.mxu1 %vm541_vm0, %v7067_v19  ;;  %v294_v24 = vpop.permute.xlu0 %293 }
 0x10f   : > { %4255 = vmatpush3.bf16.xpose.msra.mxu0 %v7056_v42  ;;  %4208 = vmatprep.mubr.msk.bf16.mxu0 %vm541_vm0, %v4547_v43  ;;  %v4551_v42 = vld [vmem:[%s6894_s1 + $0x138] sm:$0xff]  }
 0x110   : > { %4411 = vmatprep.subr.msk.bf16.mxu0 %vm541_vm0, %v7057_v59  ;;  %v3146_v59 = vrot.slane %v3144_v62, 4 }
 0x114   : > { %4237 = vmatmul.mubr.msk.bf16.gmra.mxu1 %vm541_vm0, %v4546_v4 }
 0x115   : > { %4285 = vmatpush3.bf16.xpose.msra.mxu1 %v7068_v14  ;;  %4238 = vmatprep.mubr.msk.bf16.mxu1 %vm541_vm0, %v4548_v26  ;;  %v4555_v14 = vld [vmem:[%s6894_s1 + $0x188] sm:$0xff]  }
 0x116   : > { %4209 = vmatmul.mubr.msk.bf16.gmra.mxu0 %vm541_vm0, %v4547_v43  ;;  %4418 = vmatprep.subr.msk.bf16.mxu1 %vm541_vm0, %v7069_v33 }
 0x117   : > { %4257 = vmatpush3.bf16.xpose.msra.mxu0 %v7058_v1  ;;  %4210 = vmatprep.mubr.msk.bf16.mxu0 %vm541_vm0, %v4549_v38  ;;  %v3147_v1 = vrot.slane %v5895_v46, 5 }
 0x118   : > { %4412 = vmatprep.subr.msk.bf16.mxu0 %vm541_vm0, %v7059_v45  ;;  %v4552_v45 = vld [vmem:[%s6894_s1 + $0x170] sm:$0xff]  }
 0x119   : > { %v3148_v46 = vsel %vm4869_vm5, %v3146_v59, %v3147_v1 }
 0x11a   : > { %v4034_v27 = vcombine.low %v3145_v18, %v3148_v46  ;;  %v304_v18 = vpop.permute.xlu0 %303 }
 0x11c   : > { %4239 = vmatmul.mubr.msk.bf16.gmra.mxu1 %vm541_vm0, %v4548_v26 }
 0x11d   : > { %4287 = vmatpush3.bf16.xpose.msra.mxu1 %v7070_v34  ;;  %4240 = vmatprep.mubr.msk.bf16.mxu1 %vm541_vm0, %v4550_v61 }
 0x11e   : > { %4211 = vmatmul.mubr.msk.bf16.gmra.mxu0 %vm541_vm0, %v4549_v38  ;;  %4419 = vmatprep.subr.msk.bf16.mxu1 %vm541_vm0, %v7071_v13  ;;  %v4561_v38 = vld [vmem:[%s6894_s1 + $0x1a0] sm:$0xff]  }
 0x11f   : > { %4259 = vmatpush3.bf16.xpose.msra.mxu0 %v7060_v31  ;;  %4212 = vmatprep.mubr.msk.bf16.mxu0 %vm541_vm0, %v4551_v42 }
 0x120   : > { %4413 = vmatprep.subr.msk.bf16.mxu0 %vm541_vm0, %v7061_v5 }
 0x121   : > { %v648_v31 = vpop.f32.mrf.mxu0 }
 0x122   : > { %v727_v60 = vadd.f32 %v648_v31, %v274_v57 }
 0x123   : > { %v650_v5 = vpop.f32.mrf.mxu0 }
 0x124   : > { %4241 = vmatmul.mubr.msk.bf16.gmra.mxu1 %vm541_vm0, %v4550_v61  ;;  %v728_v23 = vadd.f32 %v650_v5, %v274_v57 }
 0x125   : > { %4289 = vmatpush3.bf16.xpose.msra.mxu1 %v7072_v28  ;;  %4242 = vmatprep.mubr.msk.bf16.mxu1 %vm541_vm0, %v4552_v45  ;;  %v652_v10 = vpop.f32.mrf.mxu0 }
 0x126   : > { %4213 = vmatmul.mubr.msk.bf16.gmra.mxu0 %vm541_vm0, %v4551_v42  ;;  %4420 = vmatprep.subr.msk.bf16.mxu1 %vm541_vm0, %v7073_v16  ;;  %v4557_v16 = vld [vmem:[%s6894_s1 + $0x190] sm:$0xff]   ;;  %v729_v22 = vadd.f32 %v652_v10, %v279_v51  ;;  %v299_v42 = vpop.permute.xlu1 %298 }
 0x127   : > { %4261 = vmatpush3.bf16.xpose.msra.mxu0 %v7062_v40  ;;  %4262 = vmatprep.mubr.msk.bf16.mxu0 %vm541_vm0, %v4553_v7  ;;  %v654_v19 = vpop.f32.mrf.mxu0  ;;  %v1756_v40 = vsel %vm541_vm0, %v5576_v58, 0  ;;  %v4556_v58 = vld [vmem:[%s6894_s1 + $0x1c0] sm:$0xff]  }
 0x128   : > { %4422 = vmatprep.subr.msk.bf16.mxu0 %vm541_vm0, %v4034_v27  ;;  %v730_v39 = vadd.f32 %v654_v19, %v279_v51 }
 0x129   : > { %v658_v33 = vpop.f32.mrf.mxu0 }
 0x12a   : > { %v731_v43 = vadd.f32 %v658_v33, %v284_v48  ;;  %v309_v19 = vpop.permute.xlu1 %308 }
 0x12b   : > { %v660_v34 = vpop.f32.mrf.mxu0 }
 0x12c   : > { %4243 = vmatmul.mubr.msk.bf16.gmra.mxu1 %vm541_vm0, %v4552_v45  ;;  %v732_v25 = vadd.f32 %v660_v34, %v284_v48 }
 0x12d   : > { %4291 = vmatpush3.bf16.xpose.msra.mxu1 %v7074_v41  ;;  %4244 = vmatprep.mubr.msk.bf16.mxu1 %vm541_vm0, %v4554_v21  ;;  %v6060_v13 = vpop.f32.mrf.mxu0 }
 0x12e   : > { %4263 = vmatmul.mubr.msk.bf16.vlgmr.msra.gmra.mxu0 %vm541_vm0, %v4553_v7  ;;  %4421 = vmatprep.subr.msk.bf16.mxu1 %vm541_vm0, %v7075_v0  ;;  %v733_v46 = vadd.f32 %v6060_v13, %v289_v29 }
 0x12f   : > { %4311 = vmatpush3.bf16.xpose.msra.mxu0 %v1756_v40  ;;  %4264 = vmatprep.mubr.msk.bf16.mxu0 %vm541_vm0, %v4555_v14  ;;  %v6067_v28 = vpop.f32.mrf.mxu0 }
 0x130   : > { %4424 = vmatprep.subr.msk.bf16.mxu0 %vm541_vm0, %v5776_v54 }
 0x131   : > { %v6072_v41 = vpop.f32.mrf.mxu0 }
 0x133   : > { %v6077_v0 = vpop.f32.mrf.mxu0 }
 0x134   : > { %4245 = vmatmul.mubr.msk.bf16.gmra.mxu1 %vm541_vm0, %v4554_v21 }
 0x135   : > { %4293 = vmatpush3.bf16.xpose.msra.mxu1 %v5331_v30  ;;  %4294 = vmatprep.mubr.msk.bf16.mxu1 %vm541_vm0, %v4556_v58  ;;  %v6083_v49 = vpop.f32.mrf.mxu0  ;;  %v4558_v30 = vld [vmem:[%s6894_s1 + $0x1c8] sm:$0xff]  }
 0x136   : > { %4265 = vmatmul.mubr.msk.bf16.gmra.mxu0 %vm541_vm0, %v4555_v14  ;;  %4423 = vmatprep.subr.msk.bf16.mxu1 %vm541_vm0, %v4034_v27  ;;  %v734_v27 = vadd.f32 %v6067_v28, %v289_v29  ;;  %v735_v14 = vadd.f32 %v6072_v41, %v294_v24  ;;  %v736_v28 = vadd.f32 %v6077_v0, %v294_v24  ;;  %v4565_v29 = vld [vmem:[%s6894_s1 + $0x1b0] sm:$0xff]  }
 0x137   : > { %4313 = vmatpush3.bf16.xpose.msra.mxu0 %v5796_v9  ;;  %4266 = vmatprep.mubr.msk.bf16.mxu0 %vm541_vm0, %v4557_v16  ;;  %v6090_v12 = vpop.f32.mrf.mxu0  ;;  %v737_v48 = vadd.f32 %v6083_v49, %v299_v42 }
 0x138   : > { %4426 = vmatprep.subr.msk.bf16.mxu0 %vm541_vm0, %v5350_v44 }
 0x139   : > { %v6095_v35 = vpop.f32.mrf.mxu0 }
 0x13b   : > { %v6101_v53 = vpop.f32.mrf.mxu0 }
 0x13c   : > { %v1357_v37 = vpop.f32.mrf.mxu1  ;;  %4295 = vmatmul.mubr.msk.bf16.vlgmr.msra.gmra.mxu1 %vm541_vm0, %v4556_v58  ;;  %v6164_v58 = vpop.permute.xlu0 %333  ;;  %v740_v24 = vadd.f32 %v6101_v53, %v304_v18 }
 0x13d   : > { %v6098_v20 = vadd.f32 %v1357_v37, %v727_v60  ;;  %4350 = vmatpush3.bf16.xpose.msra.mxu1 %v1756_v40  ;;  %4296 = vmatprep.mubr.msk.bf16.mxu1 %vm541_vm0, %v4558_v30  ;;  %v6110_v2 = vpop.f32.mrf.mxu0  ;;  %v4563_v40 = vld [vmem:[%s6894_s1 + $0x1a8] sm:$0xff]  }
 0x13e   : > { %v1359_v11 = vpop.f32.mrf.mxu1  ;;  %4267 = vmatmul.mubr.msk.bf16.gmra.mxu0 %vm541_vm0, %v4557_v16  ;;  %4425 = vmatprep.subr.msk.bf16.mxu1 %vm541_vm0, %v5776_v54  ;;  %v4560_v54 = vld [vmem:[%s6894_s1 + $0x1d0] sm:$0xff]  }
 0x13f   : > { %v6106_v17 = vadd.f32 %v1359_v11, %v728_v23  ;;  %4315 = vmatpush3.bf16.xpose.msra.mxu0 %v5404_v15  ;;  %4268 = vmatprep.mubr.msk.bf16.mxu0 %vm541_vm0, %v4559_v50  ;;  %v6119_v3 = vpop.f32.mrf.mxu0  ;;  %v739_v11 = vadd.f32 %v6095_v35, %v304_v18 }
 0x140   : > { %v1361_v47 = vpop.f32.mrf.mxu1  ;;  %4428 = vmatprep.subr.msk.bf16.mxu0 %vm541_vm0, %v5422_v6  ;;  %v6195_v23 = vpop.permute.xlu0 %343 }
 0x141   : > { %v6114_v32 = vadd.f32 %v1361_v47, %v729_v22  ;;  %v6126_v61 = vpop.f32.mrf.mxu0 }
 0x142   : > { %v1363_v4 = vpop.f32.mrf.mxu1 }
 0x143   : > { %v6121_v26 = vadd.f32 %v1363_v4, %v730_v39  ;;  %v6133_v1 = vpop.f32.mrf.mxu0 }
 0x144   : > { %v1367_v62 = vpop.f32.mrf.mxu1  ;;  %4297 = vmatmul.mubr.msk.bf16.gmra.mxu1 %vm541_vm0, %v4558_v30  ;;  %v314_v53 = vpop.permute.xlu0 %313 }
 0x145   : > { %v6129_v59 = vadd.f32 %v1367_v62, %v731_v43  ;;  %4351 = vmatpush3.bf16.xpose.msra.mxu1 %v5796_v9  ;;  %4298 = vmatprep.mubr.msk.bf16.mxu1 %vm541_vm0, %v4560_v54  ;;  %v6143_v9 = vpop.f32.mrf.mxu0  ;;  %v741_v43 = vadd.f32 %v6110_v2, %v309_v19 }
 0x146   : > { %v1369_v45 = vpop.f32.mrf.mxu1  ;;  %4269 = vmatmul.mubr.msk.bf16.gmra.mxu0 %vm541_vm0, %v4559_v50  ;;  %4427 = vmatprep.subr.msk.bf16.mxu1 %vm541_vm0, %v5350_v44  ;;  %v4562_v44 = vld [vmem:[%s6894_s1 + $0x1d8] sm:$0xff]   ;;  %v738_v50 = vadd.f32 %v6090_v12, %v299_v42  ;;  %v7076_v42 = vld [vmem:[#allocation21_spill] sm:$0xff] }
 0x147   : > { %v6139_v7 = vadd.f32 %v1369_v45, %v732_v25  ;;  %4317 = vmatpush3.bf16.xpose.msra.mxu0 %v5457_v56  ;;  %4270 = vmatprep.mubr.msk.bf16.mxu0 %vm541_vm0, %v4561_v38  ;;  %v6153_v10 = vpop.f32.mrf.mxu0  ;;  %v742_v25 = vadd.f32 %v6119_v3, %v309_v19  ;;  %v744_v3 = vadd.f32 %v6133_v1, %v314_v53 }
 0x148   : > { %v1371_v31 = vpop.f32.mrf.mxu1  ;;  %4430 = vmatprep.subr.msk.bf16.mxu0 %vm541_vm0, %v5466_v55  ;;  %v324_v1 = vpop.permute.xlu0 %323 }
 0x149   : > { %v6148_v5 = vadd.f32 %v1371_v31, %v733_v46  ;;  %v6161_v34 = vpop.f32.mrf.mxu0  ;;  %v743_v46 = vadd.f32 %v6126_v61, %v314_v53 }
 0x14a   : > { %v1373_v21 = vpop.f32.mrf.mxu1 }
 0x14b   : > { %v6156_v33 = vadd.f32 %v1373_v21, %v734_v27  ;;  %v6171_v41 = vpop.f32.mrf.mxu0  ;;  %v4567_v27 = vld [vmem:[%s6894_s1 + $0x1b8] sm:$0xff]  }
 0x14c   : > { %v1377_v13 = vpop.f32.mrf.mxu1  ;;  %4299 = vmatmul.mubr.msk.bf16.gmra.mxu1 %vm541_vm0, %v4560_v54 }
 0x14d   : > { %v6167_v16 = vadd.f32 %v1377_v13, %v735_v14  ;;  %4352 = vmatpush3.bf16.xpose.msra.mxu1 %v5404_v15  ;;  %4300 = vmatprep.mubr.msk.bf16.mxu1 %vm541_vm0, %v4562_v44  ;;  %v6181_v0 = vpop.f32.mrf.mxu0  ;;  %v6183_v15 = vpop.permute.xlu1 %338 }
 0x14e   : > { %v1379_v57 = vpop.f32.mrf.mxu1  ;;  %4271 = vmatmul.mubr.msk.bf16.gmra.mxu0 %vm541_vm0, %v4561_v38  ;;  %4429 = vmatprep.subr.msk.bf16.mxu1 %vm541_vm0, %v5422_v6  ;;  %v4564_v6 = vld [vmem:[%s6894_s1 + $0x1e0] sm:$0xff]  }
 0x14f   : > { %v6177_v30 = vadd.f32 %v1379_v57, %v736_v28  ;;  %4319 = vmatpush3.bf16.xpose.msra.mxu0 %v5496_v36  ;;  %4272 = vmatprep.mubr.msk.bf16.mxu0 %vm541_vm0, %v4563_v40  ;;  %v6193_v49 = vpop.f32.mrf.mxu0  ;;  %v7077_v28 = vld [vmem:[#allocation24_spill] sm:$0xff] }
 0x150   : > { %v1381_v60 = vpop.f32.mrf.mxu1  ;;  %4432 = vmatprep.subr.msk.bf16.mxu0 %vm541_vm0, %v5490_v63 }
 0x151   : > { %v6188_v51 = vadd.f32 %v1381_v60, %v737_v48  ;;  %v6203_v12 = vpop.f32.mrf.mxu0  ;;  %v6213_v54 = vpop.permute.xlu1 %348 }
 0x152   : > { %v1383_v37 = vpop.f32.mrf.mxu1 }
 0x153   : > { %v6198_v22 = vadd.f32 %v1383_v37, %v738_v50  ;;  %v6211_v35 = vpop.f32.mrf.mxu0 }
 0x154   : > { %v1387_v47 = vpop.f32.mrf.mxu1  ;;  %4301 = vmatmul.mubr.msk.bf16.gmra.mxu1 %vm541_vm0, %v4562_v44 }
 0x155   : > { %v6207_v39 = vadd.f32 %v1387_v47, %v739_v11  ;;  %4353 = vmatpush3.bf16.xpose.msra.mxu1 %v5457_v56  ;;  %4302 = vmatprep.mubr.msk.bf16.mxu1 %vm541_vm0, %v4564_v6  ;;  %v6223_v56 = vpop.f32.mrf.mxu0  ;;  %v319_v44 = vpop.permute.xlu1 %318  ;;  %v4569_v11 = vld [vmem:[%s6894_s1 + $0x200] sm:$0xff]  }
 0x156   : > { %v1389_v4 = vpop.f32.mrf.mxu1  ;;  %4273 = vmatmul.mubr.msk.bf16.gmra.mxu0 %vm541_vm0, %v4563_v40  ;;  %4431 = vmatprep.subr.msk.bf16.mxu1 %vm541_vm0, %v5466_v55  ;;  %v4566_v55 = vld [vmem:[%s6894_s1 + $0x1e8] sm:$0xff]   ;;  %v745_v40 = vadd.f32 %v6143_v9, %v319_v44  ;;  %v746_v48 = vadd.f32 %v6153_v10, %v319_v44  ;;  %v748_v10 = vadd.f32 %v6171_v41, %v324_v1 }
 0x157   : > { %v6219_v38 = vadd.f32 %v1389_v4, %v740_v24  ;;  %4321 = vmatpush3.bf16.xpose.msra.mxu0 %v5558_v52  ;;  %4274 = vmatprep.mubr.msk.bf16.mxu0 %vm541_vm0, %v4565_v29  ;;  %v6233_v18 = vpop.f32.mrf.mxu0 }
 0x158   : > { %v1391_v62 = vpop.f32.mrf.mxu1  ;;  %4434 = vmatprep.subr.msk.bf16.mxu0 %vm541_vm0, %v7076_v42 }
 0x159   : > { %v6228_v45 = vadd.f32 %v1391_v62, %v741_v43  ;;  %v718_v61 = vpop.f32.mrf.mxu0 }
 0x15a   : > { %v1393_v2 = vpop.f32.mrf.mxu1 }
 0x15b   : > { %v6236_v31 = vadd.f32 %v1393_v2, %v742_v25  ;;  %v720_v50 = vpop.f32.mrf.mxu0  ;;  %v4570_v25 = vld [vmem:[%s6894_s1 + $0x1f8] sm:$0xff]  }
 0x15c   : > { %v1397_v21 = vpop.f32.mrf.mxu1  ;;  %4303 = vmatmul.mubr.msk.bf16.gmra.mxu1 %vm541_vm0, %v4564_v6  ;;  %v747_v6 = vadd.f32 %v6161_v34, %v324_v1 }
 0x15d   : > { %v6243_v19 = vadd.f32 %v1397_v21, %v743_v46  ;;  %4354 = vmatpush3.bf16.xpose.msra.mxu1 %v5496_v36  ;;  %4304 = vmatprep.mubr.msk.bf16.mxu1 %vm541_vm0, %v4566_v55  ;;  %v7078_v36 = vld [vmem:[#allocation30_spill] sm:$0xff]  ;;  %v722_v34 = vpop.f32.mrf.mxu0  ;;  %v4571_v46 = vld [vmem:[%s6894_s1 + $0x208] sm:$0xff]  }
 0x15e   : > { %v1399_v14 = vpop.f32.mrf.mxu1  ;;  %4275 = vmatmul.mubr.msk.bf16.gmra.mxu0 %vm541_vm0, %v4565_v29  ;;  %4433 = vmatprep.subr.msk.bf16.mxu1 %vm541_vm0, %v5490_v63  ;;  %v4568_v63 = vld [vmem:[%s6894_s1 + $0x1f0] sm:$0xff]   ;;  %v329_v29 = vpop.permute.xlu1 %328 }
 0x15f   : > { %v6251_v13 = vadd.f32 %v1399_v14, %v744_v3  ;;  %4323 = vmatpush3.bf16.xpose.msra.mxu0 %v7077_v28  ;;  %4276 = vmatprep.mubr.msk.bf16.mxu0 %vm541_vm0, %v4567_v27  ;;  %v749_v43 = vadd.f32 %v6181_v0, %v329_v29  ;;  %v751_v0 = vadd.f32 %v6203_v12, %v6164_v58 }
 0x160   : > { %v1401_v57 = vpop.f32.mrf.mxu1  ;;  %4436 = vmatprep.subr.msk.bf16.mxu0 %vm541_vm0, %v7078_v36  ;;  %v753_v3 = vadd.f32 %v6223_v56, %v6183_v15 }
 0x161   : > { %v6258_v60 = vadd.f32 %v1401_v57, %v745_v40 }
 0x162   : > { %v1403_v9 = vpop.f32.mrf.mxu1 }
 0x163   : > { %v6264_v37 = vadd.f32 %v1403_v9, %v746_v48 }
 0x164   : > { %v1407_v47 = vpop.f32.mrf.mxu1  ;;  %4305 = vmatmul.mubr.msk.bf16.gmra.mxu1 %vm541_vm0, %v4566_v55 }
 0x165   : > { %v6271_v24 = vadd.f32 %v1407_v47, %v747_v6  ;;  %4355 = vmatpush3.bf16.xpose.msra.mxu1 %v5558_v52  ;;  %4306 = vmatprep.mubr.msk.bf16.mxu1 %vm541_vm0, %v4568_v63  ;;  %v750_v52 = vadd.f32 %v6193_v49, %v329_v29  ;;  %v752_v49 = vadd.f32 %v6211_v35, %v6164_v58 }
 0x166   : > { %v1409_v4 = vpop.f32.mrf.mxu1  ;;  %4277 = vmatmul.mubr.msk.bf16.gmra.mxu0 %vm541_vm0, %v4567_v27  ;;  %4435 = vmatprep.subr.msk.bf16.mxu1 %vm541_vm0, %v7076_v42  ;;  %v724_v42 = vpop.f32.mrf.mxu0  ;;  %v756_v6 = vadd.f32 %v720_v50, %v6195_v23  ;;  %v757_v47 = vadd.f32 %v722_v34, %v6213_v54 }
 0x167   : > { %v6279_v53 = vadd.f32 %v1409_v4, %v748_v10  ;;  %4325 = vmatpush3.bf16.xpose.msra.mxu0 %v5653_v8  ;;  %4326 = vmatprep.mubr.msk.bf16.mxu0 %vm541_vm0, %v4569_v11 }
 0x168   : > { %v1411_v41 = vpop.f32.mrf.mxu1 }
 0x169   : > { %v6284_v62 = vadd.f32 %v1411_v41, %v749_v43  ;;  %v4574_v41 = vld [vmem:[%s6894_s1 + $0x228] sm:$0xff]  }
 0x16a   : > { %v1413_v55 = vpop.f32.mrf.mxu1 }
 0x16b   : > { %v6291_v2 = vadd.f32 %v1413_v55, %v750_v52  ;;  %v4575_v55 = vld [vmem:[%s6894_s1 + $0x218] sm:$0xff]  }
 0x16c   : > { %v1417_v27 = vpop.f32.mrf.mxu1  ;;  %4307 = vmatmul.mubr.msk.bf16.gmra.mxu1 %vm541_vm0, %v4568_v63  ;;  %v755_v63 = vadd.f32 %v718_v61, %v6195_v23 }
 0x16d   : > { %v6299_v44 = vadd.f32 %v1417_v27, %v751_v0  ;;  %4356 = vmatpush3.bf16.xpose.msra.mxu1 %v7077_v28  ;;  %4308 = vmatprep.mubr.msk.bf16.mxu1 %vm541_vm0, %v4570_v25  ;;  %v754_v28 = vadd.f32 %v6233_v18, %v6183_v15  ;;  %v4573_v15 = vld [vmem:[%s6894_s1 + $0x210] sm:$0xff]  }
 0x16e   : > { %v1419_v21 = vpop.f32.mrf.mxu1  ;;  %v1810_v12 = vpop.f32.mrf.mxu0  ;;  %4327 = vmatmul.mubr.msk.bf16.vlgmr.msra.gmra.mxu0 %vm541_vm0, %v4569_v11  ;;  %4437 = vmatprep.subr.msk.bf16.mxu1 %vm541_vm0, %v7078_v36  ;;  %v4572_v36 = vld [vmem:[%s6894_s1 + $0x220] sm:$0xff]  }
 0x16f   : > { %v6308_v14 = vadd.f32 %v1419_v21, %v752_v49  ;;  %v1889_v58 = vadd.f32 %v1810_v12, %v6098_v20  ;;  %4328 = vmatprep.mubr.msk.bf16.mxu0 %vm541_vm0, %v4571_v46 }
 0x170   : > { %v1421_v35 = vpop.f32.mrf.mxu1  ;;  %v1812_v40 = vpop.f32.mrf.mxu0 }
 0x171   : > { %v6314_v1 = vadd.f32 %v1421_v35, %v753_v3  ;;  %v1890_v57 = vadd.f32 %v1812_v40, %v6106_v17 }
 0x172   : > { %v1423_v56 = vpop.f32.mrf.mxu1  ;;  %v1814_v48 = vpop.f32.mrf.mxu0 }
 0x173   : > { %v6321_v20 = vadd.f32 %v1423_v56, %v754_v28  ;;  %v1891_v9 = vadd.f32 %v1814_v48, %v6114_v32 }
 0x174   : > { %v1427_v18 = vpop.f32.mrf.mxu1  ;;  %4309 = vmatmul.mubr.msk.bf16.gmra.mxu1 %vm541_vm0, %v4570_v25  ;;  %v1816_v17 = vpop.f32.mrf.mxu0 }
 0x175   : > { %v6329_v11 = vadd.f32 %v1427_v18, %v755_v63  ;;  %4357 = vmatpush3.bf16.xpose.msra.mxu1 %v5653_v8  ;;  %v1892_v61 = vadd.f32 %v1816_v17, %v6121_v26  ;;  %4334 = vmatprep.mubr.msk.bf16.mxu1 %vm541_vm0, %v4572_v36  ;;  %v758_v8 = vadd.f32 %v724_v42, %v6213_v54 }
 0x176   : > { %v1429_v29 = vpop.f32.mrf.mxu1  ;;  %v1820_v32 = vpop.f32.mrf.mxu0  ;;  %4329 = vmatmul.mubr.msk.bf16.gmra.mxu0 %vm541_vm0, %v4571_v46 }
 0x177   : > { %v6336_v10 = vadd.f32 %v1429_v29, %v756_v6  ;;  %v1893_v4 = vadd.f32 %v1820_v32, %v6129_v59  ;;  %4330 = vmatprep.mubr.msk.bf16.mxu0 %vm541_vm0, %v4573_v15 }
 0x178   : > { %v1431_v23 = vpop.f32.mrf.mxu1  ;;  %v1822_v50 = vpop.f32.mrf.mxu0 }
 0x179   : > { %v6341_v43 = vadd.f32 %v1431_v23, %v757_v47  ;;  %v1894_v26 = vadd.f32 %v1822_v50, %v6139_v7 }
 0x17a   : > { %v1433_v52 = vpop.f32.mrf.mxu1  ;;  %v1824_v34 = vpop.f32.mrf.mxu0 }
 0x17b   : > { %v6347_v25 = vadd.f32 %v1433_v52, %v758_v8  ;;  %v1895_v59 = vadd.f32 %v1824_v34, %v6148_v5 }
 0x17c   : > { %v2044_v0 = vpop.f32.mrf.mxu1  ;;  %4335 = vmatmul.mubr.msk.bf16.vlgmr.msra.gmra.mxu1 %vm541_vm0, %v4572_v36  ;;  %v1826_v54 = vpop.f32.mrf.mxu0 }
 0x17d   : > { %v6354_v42 = vadd.f32 %v2044_v0, %v1889_v58  ;;  %v1896_v7 = vadd.f32 %v1826_v54, %v6156_v33  ;;  %4336 = vmatprep.mubr.msk.bf16.mxu1 %vm541_vm0, %v4574_v41  ;;  %v4576_v33 = vld [vmem:[%s6894_s1 + $0x230] sm:$0xff]  }
 0x17e   : > { %v2046_v46 = vpop.f32.mrf.mxu1  ;;  %v1830_v27 = vpop.f32.mrf.mxu0  ;;  %4331 = vmatmul.mubr.msk.bf16.gmra.mxu0 %vm541_vm0, %v4573_v15 }
 0x17f   : > { %v6359_v49 = vadd.f32 %v2046_v46, %v1890_v57  ;;  %v1897_v5 = vadd.f32 %v1830_v27, %v6167_v16  ;;  %4332 = vmatprep.mubr.msk.bf16.mxu0 %vm541_vm0, %v4575_v55 }
 0x180   : > { %v2048_v21 = vpop.f32.mrf.mxu1  ;;  %v1832_v12 = vpop.f32.mrf.mxu0 }
 0x181   : > { %v6363_v3 = vadd.f32 %v2048_v21, %v1891_v9  ;;  %v1898_v58 = vadd.f32 %v1832_v12, %v6177_v30 }
 0x182   : > { %v2050_v35 = vpop.f32.mrf.mxu1  ;;  %v1834_v40 = vpop.f32.mrf.mxu0 }
 0x183   : > { %v6369_v28 = vadd.f32 %v2050_v35, %v1892_v61  ;;  %v1899_v57 = vadd.f32 %v1834_v40, %v6188_v51 }
 0x184   : > { %v2054_v36 = vpop.f32.mrf.mxu1  ;;  %4337 = vmatmul.mubr.msk.bf16.gmra.mxu1 %vm541_vm0, %v4574_v41  ;;  %v1836_v16 = vpop.f32.mrf.mxu0 }
 0x185   : > { %v6373_v56 = vadd.f32 %v2054_v36, %v1893_v4  ;;  %v1900_v48 = vadd.f32 %v1836_v16, %v6198_v22  ;;  %4338 = vmatprep.mubr.msk.bf16.mxu1 %vm541_vm0, %v4576_v33  ;;  %v4577_v22 = vld [vmem:[%s6894_s1 + $0x238] sm:$0xff]  }
 0x186   : > { %v2056_v30 = vpop.f32.mrf.mxu1  ;;  %v1840_v63 = vpop.f32.mrf.mxu0  ;;  %4333 = vmatmul.mubr.msk.bf16.gmra.mxu0 %vm541_vm0, %v4575_v55 }
 0x187   : > { %v6378_v9 = vadd.f32 %v2056_v30, %v1894_v26  ;;  %v1901_v15 = vadd.f32 %v1840_v63, %v6207_v39 }
 0x188   : > { %v2058_v18 = vpop.f32.mrf.mxu1  ;;  %v1842_v51 = vpop.f32.mrf.mxu0 }
 0x189   : > { %v6381_v17 = vadd.f32 %v2058_v18, %v1895_v59  ;;  %v1902_v6 = vadd.f32 %v1842_v51, %v6219_v38 }
 0x18a   : > { %v2060_v61 = vpop.f32.mrf.mxu1  ;;  %v1844_v29 = vpop.f32.mrf.mxu0 }
 0x18b   : > { %v6387_v32 = vadd.f32 %v2060_v61, %v1896_v7  ;;  %v1903_v47 = vadd.f32 %v1844_v29, %v6228_v45 }
 0x18c   : > { %v2064_v4 = vpop.f32.mrf.mxu1  ;;  %4339 = vmatmul.mubr.msk.bf16.gmra.mxu1 %vm541_vm0, %v4576_v33  ;;  %v1846_v39 = vpop.f32.mrf.mxu0 }
 0x18d   : > { %v6391_v23 = vadd.f32 %v2064_v4, %v1897_v5  ;;  %v1904_v50 = vadd.f32 %v1846_v39, %v6236_v31  ;;  %4340 = vmatprep.mubr.msk.bf16.mxu1 %vm541_vm0, %v4577_v22 }
 0x18e   : > { %v2066_v38 = vpop.f32.mrf.mxu1  ;;  %v1850_v8 = vpop.f32.mrf.mxu0 }
 0x18f   : > { %v6395_v26 = vadd.f32 %v2066_v38, %v1898_v58  ;;  %v1905_v41 = vadd.f32 %v1850_v8, %v6243_v19 }
 0x190   : > { %v2068_v52 = vpop.f32.mrf.mxu1  ;;  %v1852_v34 = vpop.f32.mrf.mxu0 }
 0x191   : > { %v6398_v59 = vadd.f32 %v2068_v52, %v1899_v57  ;;  %v1906_v45 = vadd.f32 %v1852_v34, %v6251_v13 }
 0x192   : > { %v2070_v55 = vpop.f32.mrf.mxu1  ;;  %v1854_v0 = vpop.f32.mrf.mxu0 }
 0x193   : > { %v6401_v54 = vadd.f32 %v2070_v55, %v1900_v48  ;;  %v1907_v31 = vadd.f32 %v1854_v0, %v6258_v60 }
 0x194   : > { %v2074_v7 = vpop.f32.mrf.mxu1  ;;  %4341 = vmatmul.mubr.msk.bf16.gmra.mxu1 %vm541_vm0, %v4577_v22  ;;  %v1856_v46 = vpop.f32.mrf.mxu0 }
 0x195   : > { %v6405_v27 = vadd.f32 %v2074_v7, %v1901_v15  ;;  %v1908_v19 = vadd.f32 %v1856_v46, %v6264_v37 }
 0x196   : > { %v2076_v5 = vpop.f32.mrf.mxu1  ;;  %v1860_v21 = vpop.f32.mrf.mxu0 }
 0x197   : > { %v6408_v12 = vadd.f32 %v2076_v5, %v1902_v6  ;;  %v1909_v13 = vadd.f32 %v1860_v21, %v6271_v24 }
 0x198   : > { %v2078_v58 = vpop.f32.mrf.mxu1  ;;  %v1862_v33 = vpop.f32.mrf.mxu0 }
 0x199   : > { %v6411_v35 = vadd.f32 %v2078_v58, %v1903_v47  ;;  %v1910_v60 = vadd.f32 %v1862_v33, %v6279_v53 }
 0x19a   : > { %v2080_v40 = vpop.f32.mrf.mxu1  ;;  %v1864_v57 = vpop.f32.mrf.mxu0 }
 0x19b   : > { %v6414_v36 = vadd.f32 %v2080_v40, %v1904_v50  ;;  %v1911_v16 = vadd.f32 %v1864_v57, %v6284_v62 }
 0x19c   : > { %v2084_v48 = vpop.f32.mrf.mxu1  ;;  %v1866_v37 = vpop.f32.mrf.mxu0 }
 0x19d   : > { %v6417_v30 = vadd.f32 %v2084_v48, %v1905_v41  ;;  %v1912_v63 = vadd.f32 %v1866_v37, %v6291_v2 }
 0x19e   : > { %v2086_v15 = vpop.f32.mrf.mxu1  ;;  %v1870_v24 = vpop.f32.mrf.mxu0 }
 0x19f   : > { %v6420_v18 = vadd.f32 %v2086_v15, %v1906_v45  ;;  %v1913_v51 = vadd.f32 %v1870_v24, %v6299_v44 }
 0x1a0   : > { %v2088_v6 = vpop.f32.mrf.mxu1  ;;  %v1872_v53 = vpop.f32.mrf.mxu0 }
 0x1a1   : > { %v6423_v22 = vadd.f32 %v2088_v6, %v1907_v31  ;;  %v1914_v61 = vadd.f32 %v1872_v53, %v6308_v14 }
 0x1a2   : > { %v2090_v29 = vpop.f32.mrf.mxu1  ;;  %v1874_v62 = vpop.f32.mrf.mxu0 }
 0x1a3   : > { %v6426_v47 = vadd.f32 %v2090_v29, %v1908_v19  ;;  %v1915_v4 = vadd.f32 %v1874_v62, %v6314_v1 }
 0x1a4   : > { %v2094_v39 = vpop.f32.mrf.mxu1  ;;  %v1876_v2 = vpop.f32.mrf.mxu0 }
 0x1a5   : > { %v6429_v50 = vadd.f32 %v2094_v39, %v1909_v13  ;;  %v1916_v38 = vadd.f32 %v1876_v2, %v6321_v20 }
 0x1a6   : > { %v2096_v8 = vpop.f32.mrf.mxu1  ;;  %v1880_v44 = vpop.f32.mrf.mxu0 }
 0x1a7   : > { %v6432_v41 = vadd.f32 %v2096_v8, %v1910_v60  ;;  %v1917_v52 = vadd.f32 %v1880_v44, %v6329_v11 }
 0x1a8   : > { %v2098_v34 = vpop.f32.mrf.mxu1  ;;  %v1882_v14 = vpop.f32.mrf.mxu0 }
 0x1a9   : > { %v6435_v45 = vadd.f32 %v2098_v34, %v1911_v16  ;;  %v1918_v55 = vadd.f32 %v1882_v14, %v6336_v10 }
 0x1aa   : > { %v2100_v0 = vpop.f32.mrf.mxu1  ;;  %v1884_v1 = vpop.f32.mrf.mxu0 }
 0x1ab   : > { %v6438_v31 = vadd.f32 %v2100_v0, %v1912_v63  ;;  %v1919_v7 = vadd.f32 %v1884_v1, %v6341_v43 }
 0x1ac   : > { %v2104_v46 = vpop.f32.mrf.mxu1  ;;  %v1886_v20 = vpop.f32.mrf.mxu0 }
 0x1ad   : > { %v6441_v19 = vadd.f32 %v2104_v46, %v1913_v51  ;;  %v1920_v5 = vadd.f32 %v1886_v20, %v6347_v25 }
 0x1ae   : > { %v2106_v21 = vpop.f32.mrf.mxu1  ;;  %v2300_v11 = vpop.f32.mrf.mxu0 }
 0x1af   : > { %v6444_v13 = vadd.f32 %v2106_v21, %v1914_v61  ;;  %v2379_v58 = vadd.f32 %v2300_v11, %v6354_v42 }
 0x1b0   : > { %v2108_v33 = vpop.f32.mrf.mxu1  ;;  %v2302_v10 = vpop.f32.mrf.mxu0 }
 0x1b1   : > { %v6447_v60 = vadd.f32 %v2108_v33, %v1915_v4  ;;  %v2380_v40 = vadd.f32 %v2302_v10, %v6359_v49 }
 0x1b2   : > { %v2110_v57 = vpop.f32.mrf.mxu1  ;;  %v2304_v43 = vpop.f32.mrf.mxu0 }
 0x1b3   : > { %v6450_v16 = vadd.f32 %v2110_v57, %v1916_v38  ;;  %v2381_v48 = vadd.f32 %v2304_v43, %v6363_v3 }
 0x1b4   : > { %v2114_v37 = vpop.f32.mrf.mxu1  ;;  %v2306_v25 = vpop.f32.mrf.mxu0 }
 0x1b5   : > { %v6453_v63 = vadd.f32 %v2114_v37, %v1917_v52  ;;  %v2382_v15 = vadd.f32 %v2306_v25, %v6369_v28 }
 0x1b6   : > { %v2116_v24 = vpop.f32.mrf.mxu1  ;;  %v2310_v42 = vpop.f32.mrf.mxu0 }
 0x1b7   : > { %v6456_v51 = vadd.f32 %v2116_v24, %v1918_v55  ;;  %v2383_v6 = vadd.f32 %v2310_v42, %v6373_v56 }
 0x1b8   : > { %v2118_v53 = vpop.f32.mrf.mxu1  ;;  %v2312_v49 = vpop.f32.mrf.mxu0 }
 0x1b9   : > { %v6459_v61 = vadd.f32 %v2118_v53, %v1919_v7  ;;  %v2384_v29 = vadd.f32 %v2312_v49, %v6378_v9 }
 0x1ba   : > { %v2120_v62 = vpop.f32.mrf.mxu1  ;;  %v2314_v3 = vpop.f32.mrf.mxu0 }
 0x1bb   : > { %v6462_v4 = vadd.f32 %v2120_v62, %v1920_v5  ;;  %v2385_v39 = vadd.f32 %v2314_v3, %v6381_v17 }
 0x1bc   : > { %v2540_v2 = vpop.f32.mrf.mxu1  ;;  %v2316_v28 = vpop.f32.mrf.mxu0 }
 0x1bd   : > { %v6465_v38 = vadd.f32 %v2540_v2, %v2379_v58  ;;  %v2386_v8 = vadd.f32 %v2316_v28, %v6387_v32 }
 0x1be   : > { %v2542_v44 = vpop.f32.mrf.mxu1  ;;  %v2320_v56 = vpop.f32.mrf.mxu0 }
 0x1bf   : > { %v6468_v52 = vadd.f32 %v2542_v44, %v2380_v40  ;;  %v2387_v34 = vadd.f32 %v2320_v56, %v6391_v23 }
 0x1c0   : > { %v2544_v14 = vpop.f32.mrf.mxu1  ;;  %v2322_v9 = vpop.f32.mrf.mxu0 }
 0x1c1   : > { %v6471_v55 = vadd.f32 %v2544_v14, %v2381_v48  ;;  %v2388_v0 = vadd.f32 %v2322_v9, %v6395_v26 }
 0x1c2   : > { %v2546_v1 = vpop.f32.mrf.mxu1  ;;  %v2324_v17 = vpop.f32.mrf.mxu0 }
 0x1c3   : > { %v6474_v7 = vadd.f32 %v2546_v1, %v2382_v15  ;;  %v2389_v46 = vadd.f32 %v2324_v17, %v6398_v59 }
 0x1c4   : > { %v2550_v20 = vpop.f32.mrf.mxu1  ;;  %v2326_v32 = vpop.f32.mrf.mxu0 }
 0x1c5   : > { %v6477_v5 = vadd.f32 %v2550_v20, %v2383_v6  ;;  %v2390_v21 = vadd.f32 %v2326_v32, %v6401_v54 }
 0x1c6   : > { %v2552_v11 = vpop.f32.mrf.mxu1  ;;  %v2330_v23 = vpop.f32.mrf.mxu0 }
 0x1c7   : > { %v6480_v58 = vadd.f32 %v2552_v11, %v2384_v29  ;;  %v2391_v33 = vadd.f32 %v2330_v23, %v6405_v27 }
 0x1c8   : > { %v2554_v10 = vpop.f32.mrf.mxu1  ;;  %v2332_v26 = vpop.f32.mrf.mxu0 }
 0x1c9   : > { %v6483_v40 = vadd.f32 %v2554_v10, %v2385_v39  ;;  %v2392_v57 = vadd.f32 %v2332_v26, %v6408_v12 }
 0x1ca   : > { %v2556_v43 = vpop.f32.mrf.mxu1  ;;  %v2334_v59 = vpop.f32.mrf.mxu0 }
 0x1cb   : > { %v6486_v48 = vadd.f32 %v2556_v43, %v2386_v8  ;;  %v2393_v37 = vadd.f32 %v2334_v59, %v6411_v35 }
 0x1cc   : > { %v2560_v25 = vpop.f32.mrf.mxu1  ;;  %v2336_v54 = vpop.f32.mrf.mxu0 }
 0x1cd   : > { %v6489_v15 = vadd.f32 %v2560_v25, %v2387_v34  ;;  %v2394_v24 = vadd.f32 %v2336_v54, %v6414_v36 }
 0x1ce   : > { %v2562_v42 = vpop.f32.mrf.mxu1  ;;  %v2340_v27 = vpop.f32.mrf.mxu0 }
 0x1cf   : > { %v6492_v6 = vadd.f32 %v2562_v42, %v2388_v0  ;;  %v2395_v53 = vadd.f32 %v2340_v27, %v6417_v30 }
 0x1d0   : > { %v2564_v49 = vpop.f32.mrf.mxu1  ;;  %v2342_v12 = vpop.f32.mrf.mxu0 }
 0x1d1   : > { %v6495_v29 = vadd.f32 %v2564_v49, %v2389_v46  ;;  %v2396_v62 = vadd.f32 %v2342_v12, %v6420_v18 }
 0x1d2   : > { %v2566_v3 = vpop.f32.mrf.mxu1  ;;  %v2344_v35 = vpop.f32.mrf.mxu0 }
 0x1d3   : > { %v6498_v39 = vadd.f32 %v2566_v3, %v2390_v21  ;;  %v2397_v2 = vadd.f32 %v2344_v35, %v6423_v22 }
 0x1d4   : > { %v2570_v28 = vpop.f32.mrf.mxu1  ;;  %v2346_v36 = vpop.f32.mrf.mxu0 }
 0x1d5   : > { %v6501_v8 = vadd.f32 %v2570_v28, %v2391_v33  ;;  %v2398_v44 = vadd.f32 %v2346_v36, %v6426_v47 }
 0x1d6   : > { %v2572_v56 = vpop.f32.mrf.mxu1  ;;  %v2350_v30 = vpop.f32.mrf.mxu0 }
 0x1d7   : > { %v6504_v34 = vadd.f32 %v2572_v56, %v2392_v57  ;;  %v2399_v14 = vadd.f32 %v2350_v30, %v6429_v50 }
 0x1d8   : > { %v2574_v9 = vpop.f32.mrf.mxu1  ;;  %v2352_v18 = vpop.f32.mrf.mxu0 }
 0x1d9   : > { %v6507_v0 = vadd.f32 %v2574_v9, %v2393_v37  ;;  %v2400_v1 = vadd.f32 %v2352_v18, %v6432_v41 }
 0x1da   : > { %v2576_v17 = vpop.f32.mrf.mxu1  ;;  %v2354_v22 = vpop.f32.mrf.mxu0 }
 0x1db   : > { %v6510_v46 = vadd.f32 %v2576_v17, %v2394_v24  ;;  %v2401_v20 = vadd.f32 %v2354_v22, %v6435_v45 }
 0x1dc   : > { %v2580_v32 = vpop.f32.mrf.mxu1  ;;  %v2356_v47 = vpop.f32.mrf.mxu0 }
 0x1dd   : > { %v6513_v21 = vadd.f32 %v2580_v32, %v2395_v53  ;;  %v2402_v11 = vadd.f32 %v2356_v47, %v6438_v31 }
 0x1de   : > { %v2582_v23 = vpop.f32.mrf.mxu1  ;;  %v2360_v50 = vpop.f32.mrf.mxu0 }
 0x1df   : > { %v6516_v33 = vadd.f32 %v2582_v23, %v2396_v62  ;;  %v2403_v10 = vadd.f32 %v2360_v50, %v6441_v19 }
 0x1e0   : > { %v2584_v26 = vpop.f32.mrf.mxu1  ;;  %v2362_v41 = vpop.f32.mrf.mxu0 }
 0x1e1   : > { %v6519_v57 = vadd.f32 %v2584_v26, %v2397_v2  ;;  %v2404_v43 = vadd.f32 %v2362_v41, %v6444_v13 }
 0x1e2   : > { %v2586_v59 = vpop.f32.mrf.mxu1  ;;  %v2364_v45 = vpop.f32.mrf.mxu0 }
 0x1e3   : > { %v6522_v37 = vadd.f32 %v2586_v59, %v2398_v44  ;;  %v2405_v25 = vadd.f32 %v2364_v45, %v6447_v60 }
 0x1e4   : > { %v2590_v54 = vpop.f32.mrf.mxu1  ;;  %v2366_v31 = vpop.f32.mrf.mxu0 }
 0x1e5   : > { %v6525_v24 = vadd.f32 %v2590_v54, %v2399_v14  ;;  %v2406_v42 = vadd.f32 %v2366_v31, %v6450_v16 }
 0x1e6   : > { %v2592_v27 = vpop.f32.mrf.mxu1  ;;  %v2370_v19 = vpop.f32.mrf.mxu0 }
 0x1e7   : > { %v6528_v53 = vadd.f32 %v2592_v27, %v2400_v1  ;;  %v2407_v49 = vadd.f32 %v2370_v19, %v6453_v63 }
 0x1e8   : > { %v2594_v12 = vpop.f32.mrf.mxu1  ;;  %v2372_v13 = vpop.f32.mrf.mxu0 }
 0x1e9   : > { %v6531_v62 = vadd.f32 %v2594_v12, %v2401_v20  ;;  %v2408_v3 = vadd.f32 %v2372_v13, %v6456_v51 }
 0x1ea   : > { %v2596_v35 = vpop.f32.mrf.mxu1  ;;  %v2374_v60 = vpop.f32.mrf.mxu0 }
 0x1eb   : > { %v6534_v2 = vadd.f32 %v2596_v35, %v2402_v11  ;;  %v2409_v28 = vadd.f32 %v2374_v60, %v6459_v61 }
 0x1ec   : > { %v2600_v36 = vpop.f32.mrf.mxu1  ;;  %v2376_v16 = vpop.f32.mrf.mxu0 }
 0x1ed   : > { %7079 = vst [vmem:[#allocation25_spill] sm:$0xff] %v6534_v2  ;;  %v6537_v44 = vadd.f32 %v2600_v36, %v2403_v10  ;;  %v2410_v56 = vadd.f32 %v2376_v16, %v6462_v4 }
 0x1ee   : > { %v2602_v30 = vpop.f32.mrf.mxu1  ;;  %v2774_v63 = vpop.f32.mrf.mxu0 }
 0x1ef   : > { %7080 = vst [vmem:[#allocation38_spill] sm:$0xff] %v6537_v44  ;;  %v6540_v14 = vadd.f32 %v2602_v30, %v2404_v43  ;;  %v2853_v9 = vadd.f32 %v2774_v63, %v6465_v38 }
 0x1f0   : > { %v2604_v18 = vpop.f32.mrf.mxu1  ;;  %v2776_v51 = vpop.f32.mrf.mxu0 }
 0x1f1   : > { %7081 = vst [vmem:[#allocation26_spill] sm:$0xff] %v6540_v14  ;;  %v6543_v1 = vadd.f32 %v2604_v18, %v2405_v25  ;;  %v2854_v17 = vadd.f32 %v2776_v51, %v6468_v52 }
 0x1f2   : > { %v2606_v22 = vpop.f32.mrf.mxu1  ;;  %v2778_v61 = vpop.f32.mrf.mxu0 }
 0x1f3   : > { %7082 = vst [vmem:[#allocation8_spill] sm:$0xff] %v6543_v1  ;;  %v6546_v20 = vadd.f32 %v2606_v22, %v2406_v42  ;;  %v2855_v32 = vadd.f32 %v2778_v61, %v6471_v55 }
 0x1f4   : > { %v2610_v47 = vpop.f32.mrf.mxu1  ;;  %v2780_v4 = vpop.f32.mrf.mxu0 }
 0x1f5   : > { %7083 = vst [vmem:[#allocation27_spill] sm:$0xff] %v6546_v20  ;;  %v6549_v11 = vadd.f32 %v2610_v47, %v2407_v49  ;;  %v2856_v23 = vadd.f32 %v2780_v4, %v6474_v7 }
 0x1f6   : > { %v2612_v50 = vpop.f32.mrf.mxu1  ;;  %v2784_v38 = vpop.f32.mrf.mxu0 }
 0x1f7   : > { %7084 = vst [vmem:[#allocation39_spill] sm:$0xff] %v6549_v11  ;;  %v6552_v10 = vadd.f32 %v2612_v50, %v2408_v3  ;;  %v2857_v26 = vadd.f32 %v2784_v38, %v6477_v5 }
 0x1f8   : > { %v2614_v41 = vpop.f32.mrf.mxu1  ;;  %v2786_v52 = vpop.f32.mrf.mxu0 }
 0x1f9   : > { %7085 = vst [vmem:[#allocation32_spill] sm:$0xff] %v6552_v10  ;;  %v6555_v43 = vadd.f32 %v2614_v41, %v2409_v28  ;;  %v2858_v59 = vadd.f32 %v2786_v52, %v6480_v58 }
 0x1fa   : > { %v2616_v45 = vpop.f32.mrf.mxu1  ;;  %v2788_v55 = vpop.f32.mrf.mxu0 }
 0x1fb   : > { %7086 = vst [vmem:[#allocation33_spill] sm:$0xff] %v6555_v43  ;;  %v6558_v25 = vadd.f32 %v2616_v45, %v2410_v56  ;;  %v2859_v54 = vadd.f32 %v2788_v55, %v6483_v40 }
 0x1fc   : > { %v3030_v31 = vpop.f32.mrf.mxu1  ;;  %v2790_v7 = vpop.f32.mrf.mxu0 }
 0x1fd   : > { %7087 = vst [vmem:[#allocation44_spill] sm:$0xff] %v6558_v25  ;;  %v6561_v42 = vadd.f32 %v3030_v31, %v2853_v9  ;;  %v2860_v27 = vadd.f32 %v2790_v7, %v6486_v48 }
 0x1fe   : > { %v3032_v19 = vpop.f32.mrf.mxu1  ;;  %v6564_v5 = vpop.f32.mrf.mxu0 }
 0x1ff   : > { %v6566_v49 = vadd.f32 %v3032_v19, %v2854_v17 }
 0x200   : > { %v3034_v12 = vpop.f32.mrf.mxu1  ;;  %v6568_v13 = vpop.f32.mrf.mxu0 }
 0x201   : > { %v6570_v58 = vadd.f32 %v3034_v12, %v2855_v32 }
 0x202   : > { %v3036_v3 = vpop.f32.mrf.mxu1  ;;  %v6572_v35 = vpop.f32.mrf.mxu0 }
 0x203   : > { %v6574_v40 = vadd.f32 %v3036_v3, %v2856_v23 }
 0x204   : > { %v3040_v60 = vpop.f32.mrf.mxu1  ;;  %v2800_v28 = vpop.f32.mrf.mxu0 }
 0x205   : > { %v6576_v36 = vadd.f32 %v3040_v60, %v2857_v26 }
 0x206   : > { %v3042_v48 = vpop.f32.mrf.mxu1  ;;  %v2804_v16 = vpop.f32.mrf.mxu0 }
 0x207   : > { %v6578_v56 = vadd.f32 %v3042_v48, %v2858_v59 }
 0x208   : > { %v3044_v30 = vpop.f32.mrf.mxu1  ;;  %v2806_v63 = vpop.f32.mrf.mxu0 }
 0x209   : > { %v6580_v9 = vadd.f32 %v3044_v30, %v2859_v54 }
 0x20a   : > { %v3046_v18 = vpop.f32.mrf.mxu1  ;;  %v2808_v51 = vpop.f32.mrf.mxu0 }
 0x20b   : > { %v6582_v17 = vadd.f32 %v3046_v18, %v2860_v27 }
 0x20c   : > { %v3050_v22 = vpop.f32.mrf.mxu1  ;;  %v2810_v61 = vpop.f32.mrf.mxu0 }
 0x20e   : > { %v3052_v32 = vpop.f32.mrf.mxu1  ;;  %v6584_v47 = vpop.f32.mrf.mxu0 }
 0x210   : > { %v3054_v4 = vpop.f32.mrf.mxu1  ;;  %v6586_v23 = vpop.f32.mrf.mxu0 }
 0x212   : > { %v6588_v50 = vpop.f32.mrf.mxu1  ;;  %v6590_v38 = vpop.f32.mrf.mxu0 }
 0x214   : > { %v6592_v26 = vpop.f32.mrf.mxu1  ;;  %v6594_v41 = vpop.f32.mrf.mxu0 }
 0x216   : > { %v6596_v52 = vpop.f32.mrf.mxu1  ;;  %v6598_v59 = vpop.f32.mrf.mxu0 }
 0x218   : > { %v6600_v45 = vpop.f32.mrf.mxu1  ;;  %v6602_v55 = vpop.f32.mrf.mxu0 }
 0x21a   : > { %v6604_v54 = vpop.f32.mrf.mxu1  ;;  %v6606_v31 = vpop.f32.mrf.mxu0 }
 0x21c   : > { %v3070_v7 = vpop.f32.mrf.mxu1  ;;  %v6608_v27 = vpop.f32.mrf.mxu0 }
 0x21d   : > { %7088 = vst [vmem:[#allocation35_spill] sm:$0xff] %v6608_v27  ;;  %v2864_v27 = vadd.f32 %v2800_v28, %v6498_v39 }
 0x21e   : > { %v6610_v19 = vpop.f32.mrf.mxu1  ;;  %v6612_v12 = vpop.f32.mrf.mxu0 }
 0x21f   : > { %7089 = vst [vmem:[#allocation42_spill] sm:$0xff] %v6612_v12 }
 0x220   : > { %v6614_v3 = vpop.f32.mrf.mxu1  ;;  %v6616_v60 = vpop.f32.mrf.mxu0 }
 0x221   : > { %7090 = vst [vmem:[#allocation9_spill] sm:$0xff] %v6616_v60 }
 0x222   : > { %v6618_v48 = vpop.f32.mrf.mxu1  ;;  %v6620_v30 = vpop.f32.mrf.mxu0 }
 0x223   : > { %7091 = vst [vmem:[#allocation10_spill] sm:$0xff] %v6618_v48  ;;  %7092 = vst [vmem:[#allocation11_spill] sm:$0xff] %v6620_v30 }
 0x224   : > { %v6622_v18 = vpop.f32.mrf.mxu1  ;;  %v6624_v25 = vpop.f32.mrf.mxu0 }
 0x225   : > { %7093 = vst [vmem:[#allocation12_spill] sm:$0xff] %v6622_v18  ;;  %7094 = vst [vmem:[#allocation14_spill] sm:$0xff] %v6624_v25 }
 0x226   : > { %v6626_v43 = vpop.f32.mrf.mxu1  ;;  %v6628_v10 = vpop.f32.mrf.mxu0 }
 0x227   : > { %7095 = vst [vmem:[#allocation16_spill] sm:$0xff] %v6626_v43  ;;  %7096 = vst [vmem:[#allocation18_spill] sm:$0xff] %v6628_v10 }
 0x228   : > { %v6630_v11 = vpop.f32.mrf.mxu1  ;;  %v6632_v20 = vpop.f32.mrf.mxu0 }
 0x229   : > { %7097 = vst [vmem:[#allocation20_spill] sm:$0xff] %v6630_v11  ;;  %7098 = vst [vmem:[#allocation23_spill] sm:$0xff] %v6632_v20 }
 0x22a   : > { %v6634_v1 = vpop.f32.mrf.mxu1  ;;  %v6636_v14 = vpop.f32.mrf.mxu0 }
 0x22b   : > { %7099 = vst [vmem:[#allocation29_spill] sm:$0xff] %v6634_v1  ;;  %7100 = vst [vmem:[#allocation31_spill] sm:$0xff] %v6636_v14 }
 0x22c   : > { %v6638_v60 = vpop.f32.mrf.mxu1  ;;  %v6640_v48 = vpop.f32.mrf.mxu0 }
 0x22d   : > { %7101 = vst [vmem:[#allocation37_spill] sm:$0xff] %v6638_v60  ;;  %7102 = vst [vmem:[#allocation13_spill] sm:$0xff] %v6640_v48 }
 0x22e   : > { %v6642_v30 = vpop.f32.mrf.mxu1  ;;  %v3270_v18 = vpop.f32.mrf.mxu0 }
 0x22f   : > { %7103 = vst [vmem:[#allocation41_spill] sm:$0xff] %v6642_v30  ;;  %v3349_v14 = vadd.f32 %v3270_v18, %v6561_v42  ;;  %v2861_v30 = vadd.f32 %v6564_v5, %v6489_v15  ;;  %v2866_v15 = vadd.f32 %v2806_v63, %v6504_v34  ;;  %v2867_v5 = vadd.f32 %v2808_v51, %v6507_v0 }
 0x230   : > { %v6644_v25 = vpop.f32.mrf.mxu1  ;;  %v3272_v43 = vpop.f32.mrf.mxu0  ;;  %v3120_v34 = vadd.f32 %v6588_v50, %v2864_v27  ;;  %v2870_v0 = vadd.f32 %v6586_v23, %v6516_v33 }
 0x231   : > { %7104 = vst [vmem:[#allocation15_spill] sm:$0xff] %v6644_v25  ;;  %v2862_v25 = vadd.f32 %v6568_v13, %v6492_v6  ;;  %v3117_v2 = vadd.f32 %v3050_v22, %v2861_v30  ;;  %v3122_v51 = vadd.f32 %v6596_v52, %v2866_v15  ;;  %v2875_v30 = vadd.f32 %v6606_v31, %v6531_v62  ;;  %v7109_v15 = vld [vmem:[#allocation25_spill] sm:$0xff] }
 0x232   : > { %v6646_v12 = vpop.f32.mrf.mxu1  ;;  %v3274_v10 = vpop.f32.mrf.mxu0  ;;  %v3126_v23 = vadd.f32 %v6610_v19, %v2870_v0  ;;  %v7117_v0 = vld [vmem:[#allocation11_spill] sm:$0xff] }
 0x233   : > { %7105 = vst [vmem:[#allocation17_spill] sm:$0xff] %v6646_v12  ;;  %v3350_v12 = vadd.f32 %v3272_v43, %v6566_v49  ;;  %v3351_v42 = vadd.f32 %v3274_v10, %v6570_v58  ;;  %v3118_v43 = vadd.f32 %v3052_v32, %v2862_v25  ;;  %v2868_v49 = vadd.f32 %v2810_v61, %v6510_v46 }
 0x234   : > { %v6648_v11 = vpop.f32.mrf.mxu1  ;;  %v3276_v20 = vpop.f32.mrf.mxu0  ;;  %v2869_v10 = vadd.f32 %v6584_v47, %v6513_v21  ;;  %v2871_v46 = vadd.f32 %v6590_v38, %v6519_v57 }
 0x235   : > { %7106 = vst [vmem:[#allocation19_spill] sm:$0xff] %v6648_v11  ;;  %v2863_v11 = vadd.f32 %v6572_v35, %v6495_v29  ;;  %v3352_v6 = vadd.f32 %v3276_v20, %v6574_v40  ;;  %v3389_v29 = vmul.f32 0.5, %v3349_v14  ;;  %v3390_v58 = vmul.f32 0.5, %v3350_v12 }
 0x236   : > { %v6650_v44 = vpop.f32.mrf.mxu1  ;;  %v3280_v1 = vpop.f32.mrf.mxu0  ;;  %v3391_v14 = vmul.f32 0.5, %v3351_v42  ;;  %v3127_v52 = vadd.f32 %v6614_v3, %v2871_v46  ;;  %v3124_v12 = vadd.f32 %v6604_v54, %v2868_v49  ;;  %v7114_v54 = vld [vmem:[#allocation9_spill] sm:$0xff] }
 0x237   : > { %7107 = vst [vmem:[#allocation22_spill] sm:$0xff] %v6650_v44  ;;  %v2865_v44 = vadd.f32 %v2804_v16, %v6501_v8  ;;  %v3353_v39 = vadd.f32 %v3280_v1, %v6576_v36  ;;  %v3119_v35 = vadd.f32 %v3054_v4, %v2863_v11  ;;  %v3125_v11 = vadd.f32 %v3070_v7, %v2869_v10 }
 0x238   : > { %v6653_v60 = vpop.f32.mrf.mxu1  ;;  %v3282_v48 = vpop.f32.mrf.mxu0  ;;  %v3392_v40 = vmul.f32 0.5, %v3352_v6  ;;  %v2872_v36 = vadd.f32 %v6594_v41, %v6522_v37  ;;  %4578 = vtanh.f32 %v3389_v29  ;;  %v3123_v37 = vadd.f32 %v6600_v45, %v2867_v5  ;;  %v7110_v5 = vld [vmem:[#allocation35_spill] sm:$0xff]  ;;  %v7112_v29 = vld [vmem:[#allocation42_spill] sm:$0xff] }
 0x239   : > { %7108 = vst [vmem:[#allocation28_spill] sm:$0xff] %v6653_v60  ;;  %v3354_v28 = vadd.f32 %v3282_v48, %v6578_v56  ;;  %v3121_v25 = vadd.f32 %v6592_v26, %v2865_v44  ;;  %v3393_v16 = vmul.f32 0.5, %v3353_v39  ;;  %4580 = vtanh.f32 %v3390_v58  ;;  %v7115_v58 = vld [vmem:[#allocation10_spill] sm:$0xff] }
 0x23a   : > { %v6665_v18 = vpop.f32.mrf.mxu1  ;;  %v3284_v60 = vpop.f32.mrf.mxu0  ;;  %v2873_v44 = vadd.f32 %v6598_v59, %v6525_v24  ;;  %4582 = vtanh.f32 %v3391_v14  ;;  %v2874_v41 = vadd.f32 %v6602_v55, %v6528_v53  ;;  %v2876_v6 = vadd.f32 %v7110_v5, %v7109_v15  ;;  %v7129_v5 = vld [vmem:[#allocation29_spill] sm:$0xff] }
 0x23b   : > { %v3355_v21 = vadd.f32 %v3284_v60, %v6580_v9  ;;  %v3394_v22 = vmul.f32 0.5, %v3354_v28  ;;  %4584 = vtanh.f32 %v3392_v40  ;;  %v3128_v28 = vadd.f32 %v7115_v58, %v2872_v36 }
 0x23c   : > { %v3310_v13 = vpop.f32.mrf.mxu1  ;;  %v3286_v8 = vpop.f32.mrf.mxu0  ;;  %4586 = vtanh.f32 %v3393_v16 }
 0x23d   : > { %v3365_v57 = vadd.f32 %v3310_v13, %v3125_v11  ;;  %v3395_v4 = vmul.f32 0.5, %v3355_v21  ;;  %4588 = vtanh.f32 %v3394_v22  ;;  %v7113_v13 = vld [vmem:[#allocation26_spill] sm:$0xff] }
 0x23e   : > { %v3312_v20 = vpop.f32.mrf.mxu1  ;;  %v3290_v1 = vpop.f32.mrf.mxu0  ;;  %v2878_v49 = vadd.f32 %v7114_v54, %v7113_v13  ;;  %v7132_v13 = vld [vmem:[#allocation33_spill] sm:$0xff]  ;;  %v7133_v54 = vld [vmem:[#allocation31_spill] sm:$0xff] }
 0x23f   : > { %v3357_v63 = vadd.f32 %v3290_v1, %v3117_v2  ;;  %v3356_v2 = vadd.f32 %v3286_v8, %v6582_v17  ;;  %v3485_v59 = vmul.f32 0.5, %v3365_v57  ;;  %v3366_v45 = vadd.f32 %v3312_v20, %v3126_v23  ;;  %v7118_v20 = vld [vmem:[#allocation12_spill] sm:$0xff]  ;;  %v7122_v57 = vld [vmem:[#allocation41_spill] sm:$0xff] }
 0x240   : > { %v3314_v56 = vpop.f32.mrf.mxu1  ;;  %v3292_v33 = vpop.f32.mrf.mxu0  ;;  %v3129_v1 = vadd.f32 %v7118_v20, %v2873_v44  ;;  %v3134_v22 = vadd.f32 %v7122_v57, %v2878_v49  ;;  %v2883_v49 = vadd.f32 %v7133_v54, %v7132_v13 }
 0x241   : > { %v3421_v9 = vmul.f32 0.5, %v3357_v63  ;;  %v3358_v32 = vadd.f32 %v3292_v33, %v3118_v43  ;;  %v3367_v60 = vadd.f32 %v3314_v56, %v3127_v52  ;;  %v3396_v48 = vmul.f32 0.5, %v3356_v2  ;;  %v7111_v43 = vld [vmem:[#allocation38_spill] sm:$0xff]  ;;  %v7120_v63 = vld [vmem:[#allocation27_spill] sm:$0xff] }
 0x242   : > { %v6687_v61 = vpop.f32.mrf.mxu1  ;;  %v3294_v47 = vpop.f32.mrf.mxu0  ;;  %v2877_v39 = vadd.f32 %v7112_v29, %v7111_v43  ;;  %v3486_v8 = vmul.f32 0.5, %v3366_v45  ;;  %v7121_v33 = vld [vmem:[#allocation14_spill] sm:$0xff]  ;;  %v6730_v43 = vadd.f32 %v7129_v5, %v2876_v6  ;;  %v7130_v29 = vld [vmem:[#allocation32_spill] sm:$0xff]  ;;  %v7136_v6 = vld [vmem:[#allocation13_spill] sm:$0xff] }
 0x243   : > { %v3422_v38 = vmul.f32 0.5, %v3358_v32  ;;  %v3359_v26 = vadd.f32 %v3294_v47, %v3119_v35  ;;  %4590 = vtanh.f32 %v3421_v9  ;;  %v3487_v14 = vmul.f32 0.5, %v3367_v60  ;;  %v7123_v32 = vld [vmem:[#allocation16_spill] sm:$0xff] }
 0x244   : > { %v6692_v50 = vpop.f32.mrf.mxu1  ;;  %v3296_v24 = vpop.f32.mrf.mxu0  ;;  %4592 = vtanh.f32 %v3395_v4  ;;  %v3130_v47 = vadd.f32 %v7123_v32, %v2874_v41  ;;  %v3368_v60 = vadd.f32 %v6687_v61, %v3128_v28 }
 0x245   : > { %v3423_v17 = vmul.f32 0.5, %v3359_v26  ;;  %v3360_v27 = vadd.f32 %v3296_v24, %v3120_v34  ;;  %4594 = vtanh.f32 %v3422_v38  ;;  %v7116_v34 = vld [vmem:[#allocation8_spill] sm:$0xff]  ;;  %v4579_v56 = vpop.eup %4578  ;;  %v7124_v38 = vld [vmem:[#allocation15_spill] sm:$0xff] }
 0x246   : > { %v6697_v7 = vpop.f32.mrf.mxu1  ;;  %v3300_v19 = vpop.f32.mrf.mxu0  ;;  %4596 = vtanh.f32 %v3485_v59  ;;  %v2879_v46 = vadd.f32 %v7117_v0, %v7116_v34  ;;  %v7125_v59 = vld [vmem:[#allocation20_spill] sm:$0xff] }
 0x247   : > { %v3424_v55 = vmul.f32 0.5, %v3360_v27  ;;  %v3361_v3 = vadd.f32 %v3300_v19, %v3121_v25  ;;  %4598 = vtanh.f32 %v3423_v17  ;;  %v7119_v25 = vld [vmem:[#allocation37_spill] sm:$0xff]  ;;  %v4581_v9 = vpop.eup %4580  ;;  %v6723_v45 = vadd.f32 %v7125_v59, %v2875_v30  ;;  %v7126_v17 = vld [vmem:[#allocation39_spill] sm:$0xff]  ;;  %v7127_v27 = vld [vmem:[#allocation18_spill] sm:$0xff] }
 0x248   : > { %v6702_v53 = vpop.f32.mrf.mxu1  ;;  %v3302_v42 = vpop.f32.mrf.mxu0  ;;  %4600 = vtanh.f32 %v3396_v48  ;;  %v3133_v11 = vadd.f32 %v7119_v25, %v2877_v39  ;;  %v3135_v26 = vadd.f32 %v7124_v38, %v2879_v46  ;;  %v2881_v19 = vadd.f32 %v7127_v27, %v7126_v17  ;;  %v7131_v30 = vld [vmem:[#allocation23_spill] sm:$0xff]  ;;  %v7135_v34 = vld [vmem:[#allocation44_spill] sm:$0xff] }
 0x249   : > { %v3425_v62 = vmul.f32 0.5, %v3361_v3  ;;  %v3362_v31 = vadd.f32 %v3302_v42, %v3122_v51  ;;  %4602 = vtanh.f32 %v3424_v55  ;;  %v2880_v51 = vadd.f32 %v7121_v33, %v7120_v63  ;;  %v4583_v23 = vpop.eup %4582  ;;  %v7128_v55 = vld [vmem:[#allocation17_spill] sm:$0xff]  ;;  %v7138_v63 = vld [vmem:[#allocation28_spill] sm:$0xff] }
 0x24a   : > { %v6710_v35 = vpop.f32.mrf.mxu1  ;;  %v3304_v10 = vpop.f32.mrf.mxu0  ;;  %v2882_v39 = vadd.f32 %v7131_v30, %v7130_v29  ;;  %v2884_v0 = vadd.f32 %v7136_v6, %v7135_v34  ;;  %v3488_v46 = vmul.f32 0.5, %v3368_v60  ;;  %v3139_v33 = vadd.f32 %v7138_v63, %v2883_v49  ;;  %v3382_v30 = vld [vmem:[%s6754_s16 + $0x8] sm:$0xff] }
 0x24b   : > { %v3363_v21 = vadd.f32 %v3304_v10, %v3123_v37  ;;  %4604 = vtanh.f32 %v3425_v62  ;;  %v3426_v36 = vmul.f32 0.5, %v3362_v31  ;;  %v4585_v52 = vpop.eup %4584  ;;  %v3405_v62 = vmul.f32 0.5, %v4579_v56  ;;  %v7134_v31 = vld [vmem:[#allocation19_spill] sm:$0xff] }
 0x24c   : > { %v3330_v40 = vpop.f32.mrf.mxu1  ;;  %v3306_v16 = vpop.f32.mrf.mxu0  ;;  %4606 = vtanh.f32 %v3486_v8  ;;  %v3137_v10 = vadd.f32 %v7134_v31, %v2881_v19  ;;  %v3370_v57 = vadd.f32 %v6697_v7, %v3130_v47 }
 0x24d   : > { %v3373_v4 = vadd.f32 %v3330_v40, %v3133_v11  ;;  %v3364_v2 = vadd.f32 %v3306_v16, %v3124_v12  ;;  %4608 = vtanh.f32 %v3487_v14  ;;  %v3427_v24 = vmul.f32 0.5, %v3363_v21  ;;  %v4587_v48 = vpop.eup %4586  ;;  %v7137_v40 = vld [vmem:[#allocation22_spill] sm:$0xff] }
 0x24e   : > { %v3332_v44 = vpop.f32.mrf.mxu1  ;;  %v3136_v12 = vadd.f32 %v7128_v55, %v2880_v51  ;;  %v4589_v15 = vpop.eup %4588  ;;  %v3369_v14 = vadd.f32 %v6692_v50, %v3129_v1  ;;  %v3406_v11 = vmul.f32 0.5, %v4581_v9  ;;  %v3138_v21 = vadd.f32 %v7137_v40, %v2882_v39 }
 0x24f   : > { %v3374_v37 = vadd.f32 %v3332_v44, %v3134_v22  ;;  %4610 = vtanh.f32 %v3373_v4  ;;  %v3428_v42 = vmul.f32 0.5, %v3364_v2  ;;  %v3413_v1 = vadd.f32 0.5, %v3405_v62  ;;  %v3383_v62 = vld [vmem:[%s6754_s16 + $0x10] sm:$0xff] }
 0x250   : > { %v3334_v41 = vpop.f32.mrf.mxu1  ;;  %4612 = vtanh.f32 %v3426_v36  ;;  %v4591_v8 = vpop.eup %4590  ;;  %v3140_v36 = vadd.f32 %v6665_v18, %v2884_v0  ;;  %v3407_v4 = vmul.f32 0.5, %v4583_v23  ;;  %v3489_v44 = vmul.f32 0.5, %v3369_v14  ;;  %v3384_v14 = vld [vmem:[%s6754_s16 + $0x18] sm:$0xff] }
 0x251   : > { %v3375_v3 = vadd.f32 %v3334_v41, %v3135_v26  ;;  %4614 = vtanh.f32 %v3374_v37  ;;  %v6737_v28 = vpop.eup %4592  ;;  %v3437_v51 = vmul.f32 0.5, %v4591_v8  ;;  %v3414_v38 = vadd.f32 0.5, %v3406_v11  ;;  %v3381_v41 = vld [vmem:[%s6754_s16] sm:$0xff] }
 0x252   : > { %v3336_v61 = vpop.f32.mrf.mxu1  ;;  %4616 = vtanh.f32 %v3427_v24  ;;  %v4595_v25 = vpop.eup %4594  ;;  %v3408_v26 = vmul.f32 0.5, %v4585_v52  ;;  %v3409_v24 = vmul.f32 0.5, %v4587_v48  ;;  %v3490_v59 = vmul.f32 0.5, %v3370_v57 }
 0x253   : > { %v3376_v58 = vadd.f32 %v3336_v61, %v3136_v12  ;;  %4618 = vtanh.f32 %v3375_v3  ;;  %v6744_v56 = vpop.eup %4596  ;;  %v3438_v7 = vmul.f32 0.5, %v4595_v25  ;;  %v3445_v23 = vadd.f32 0.5, %v3437_v51 }
 0x254   : > { %v3340_v20 = vpop.f32.mrf.mxu1  ;;  %4620 = vtanh.f32 %v3428_v42  ;;  %v4599_v50 = vpop.eup %4598  ;;  %v3410_v60 = vmul.f32 0.5, %v4589_v15  ;;  %v3371_v55 = vadd.f32 %v6702_v53, %v6723_v45  ;;  %v3415_v3 = vadd.f32 0.5, %v3407_v4 }
 0x255   : > { %v3377_v16 = vadd.f32 %v3340_v20, %v3137_v10  ;;  %4622 = vtanh.f32 %v3376_v58  ;;  %v6749_v32 = vpop.eup %4600  ;;  %v3439_v17 = vmul.f32 0.5, %v4599_v50  ;;  %v3446_v48 = vadd.f32 0.5, %v3438_v7 }
 0x256   : > { %v3342_v22 = vpop.f32.mrf.mxu1  ;;  %v4603_v2 = vpop.eup %4602  ;;  %v3416_v29 = vadd.f32 0.5, %v3408_v26  ;;  %v3372_v15 = vadd.f32 %v6710_v35, %v6730_v43  ;;  %v3417_v53 = vadd.f32 0.5, %v3409_v24  ;;  %v3461_v45 = vmul.f32 %v3445_v23, %v3381_v41  ;;  %v3387_v26 = vld [vmem:[%s6754_s16 + $0x30] sm:$0xff] }
 0x257   : > { %4624 = vtanh.f32 %v3377_v16  ;;  %v3378_v9 = vadd.f32 %v3342_v22, %v3138_v21  ;;  %v3440_v42 = vmul.f32 0.5, %v4603_v2  ;;  %v3447_v54 = vadd.f32 0.5, %v3439_v17  ;;  %v3385_v16 = vld [vmem:[%s6754_s16 + $0x20] sm:$0xff] }
 0x258   : > { %4626 = vtanh.f32 %v3488_v46  ;;  %v3344_v47 = vpop.f32.mrf.mxu1  ;;  %v4605_v37 = vpop.eup %4604  ;;  %v3418_v8 = vadd.f32 0.5, %v3410_v60  ;;  %v3491_v31 = vmul.f32 0.5, %v3371_v55  ;;  %v3462_v34 = vmul.f32 %v3446_v48, %v3382_v30  ;;  %v3388_v60 = vld [vmem:[%s6754_s16 + $0x38] sm:$0xff] }
 0x259   : > { %4628 = vtanh.f32 %v3378_v9  ;;  %v3379_v18 = vadd.f32 %v3344_v47, %v3139_v33  ;;  %v6759_v19 = vpop.eup %4606  ;;  %v3441_v39 = vmul.f32 0.5, %v4605_v37  ;;  %v3448_v6 = vadd.f32 0.5, %v3440_v42 }
 0x25a   : > { %v3346_v27 = vpop.f32.mrf.mxu1  ;;  %v6764_v12 = vpop.eup %4608  ;;  %v3411_v46 = vmul.f32 0.5, %v6737_v28  ;;  %v3492_v20 = vmul.f32 0.5, %v3372_v15  ;;  %v3463_v21 = vmul.f32 %v3447_v54, %v3383_v62  ;;  %v3412_v28 = vmul.f32 0.5, %v6749_v32 }
 0x25b   : > { %4630 = vtanh.f32 %v3379_v18  ;;  %v3380_v52 = vadd.f32 %v3346_v27, %v3140_v36  ;;  %v3449_v25 = vadd.f32 0.5, %v3441_v39  ;;  %v3386_v36 = vld [vmem:[%s6754_s16 + $0x28] sm:$0xff]  ;;  %v3501_v42 = vmul.f32 0.5, %v6744_v56 }
 0x25c   : > { %4632 = vtanh.f32 %v3489_v44  ;;  %v4611_v5 = vpop.eup %4610  ;;  %v3420_v27 = vadd.f32 0.5, %v3412_v28  ;;  %v3502_v39 = vmul.f32 0.5, %v6759_v19 }
 0x25d   : > { %4634 = vtanh.f32 %v3380_v52  ;;  %v4613_v13 = vpop.eup %4612  ;;  %v3469_v49 = vmul.f32 %v4611_v5, %v3413_v1  ;;  %v3464_v1 = vmul.f32 %v3448_v6, %v3384_v14  ;;  %v3465_v7 = vmul.f32 %v3449_v25, %v3385_v16 }
 0x25e   : > { %v4615_v61 = vpop.eup %4614  ;;  %4636 = vtanh.f32 %v3490_v59  ;;  %v3442_v10 = vmul.f32 0.5, %v4613_v13  ;;  %v3509_v56 = vadd.f32 0.5, %v3501_v42  ;;  %v3510_v54 = vadd.f32 0.5, %v3502_v39 }
 0x25f   : > { %v4617_v58 = vpop.eup %4616  ;;  %v3477_v35 = vadd.f32 %v3469_v49, %v3461_v45  ;;  %v3470_v43 = vmul.f32 %v4615_v61, %v3414_v38  ;;  %v3419_v38 = vadd.f32 0.5, %v3411_v46 }
 0x260   : > { %v4619_v0 = vpop.eup %4618  ;;  %v3443_v11 = vmul.f32 0.5, %v4617_v58  ;;  %v3450_v57 = vadd.f32 0.5, %v3442_v10 }
 0x261   : > { %v4621_v40 = vpop.eup %4620  ;;  %4638 = vtanh.f32 %v3477_v35  ;;  %3541 = vst [vmem:[%s6776_s25] sm:$0xff] %v3477_v35  ;;  %v3478_v63 = vadd.f32 %v3470_v43, %v3462_v34  ;;  %v3471_v33 = vmul.f32 %v4619_v0, %v3415_v3 }
 0x262   : > { %v4623_v51 = vpop.eup %4622  ;;  %4640 = vtanh.f32 %v3491_v31  ;;  %v3444_v22 = vmul.f32 0.5, %v4621_v40  ;;  %v3451_v47 = vadd.f32 0.5, %v3443_v11  ;;  %v3466_v37 = vmul.f32 %v3450_v57, %v3386_v36 }
 0x263   : > { %4642 = vtanh.f32 %v3478_v63  ;;  %3542 = vst [vmem:[%s6776_s25 + $0x8] sm:$0xff] %v3478_v63  ;;  %v3479_v9 = vadd.f32 %v3471_v33, %v3463_v21  ;;  %v3472_v4 = vmul.f32 %v4623_v51, %v3416_v29 }
 0x264   : > { %v4625_v50 = vpop.eup %4624  ;;  %4644 = vtanh.f32 %v3492_v20  ;;  %v3452_v24 = vadd.f32 0.5, %v3444_v22  ;;  %v3467_v55 = vmul.f32 %v3451_v47, %v3387_v26 }
 0x265   : > { %v4627_v44 = vpop.eup %4626  ;;  %v3473_v2 = vmul.f32 %v4625_v50, %v3417_v53  ;;  %4646 = vtanh.f32 %v3479_v9  ;;  %3543 = vst [vmem:[%s6776_s25 + $0x10] sm:$0xff] %v3479_v9  ;;  %v3480_v18 = vadd.f32 %v3472_v4, %v3464_v1  ;;  %v3503_v53 = vmul.f32 0.5, %v6764_v12 }
 0x266   : > { %v4629_v32 = vpop.eup %4628  ;;  %v3468_v5 = vmul.f32 %v3452_v24, %v3388_v60  ;;  %v3504_v49 = vmul.f32 0.5, %v4627_v44 }
 0x267   : > { %v3481_v23 = vadd.f32 %v3473_v2, %v3465_v7  ;;  %v3474_v59 = vmul.f32 %v4629_v32, %v3418_v8  ;;  %4648 = vtanh.f32 %v3480_v18  ;;  %3544 = vst [vmem:[%s6776_s25 + $0x18] sm:$0xff] %v3480_v18 }
 0x268   : > { %v4631_v17 = vpop.eup %4630 }
 0x269   : > { %v4633_v41 = vpop.eup %4632  ;;  %4650 = vtanh.f32 %v3481_v23  ;;  %3545 = vst [vmem:[%s6776_s25 + $0x20] sm:$0xff] %v3481_v23  ;;  %v3482_v52 = vadd.f32 %v3474_v59, %v3466_v37  ;;  %v3475_v3 = vmul.f32 %v4631_v17, %v3419_v38 }
 0x26a   : > { %v4635_v48 = vpop.eup %4634 }
 0x26b   : > { %4652 = vtanh.f32 %v3482_v52  ;;  %3546 = vst [vmem:[%s6776_s25 + $0x28] sm:$0xff] %v3482_v52  ;;  %v3483_v29 = vadd.f32 %v3475_v3, %v3467_v55  ;;  %v3476_v30 = vmul.f32 %v4635_v48, %v3420_v27  ;;  %v4637_v15 = vpop.eup %4636 }
 0x26d   : > { %4654 = vtanh.f32 %v3483_v29  ;;  %3547 = vst [vmem:[%s6776_s25 + $0x30] sm:$0xff] %v3483_v29  ;;  %v3484_v13 = vadd.f32 %v3476_v30, %v3468_v5 }
 0x26e   : > { %v4639_v45 = vpop.eup %4638 }
 0x26f   : > { %4656 = vtanh.f32 %v3484_v13  ;;  %3548 = vst [vmem:[%s6776_s25 + $0x38] sm:$0xff] %v3484_v13  ;;  %v4641_v19 = vpop.eup %4640  ;;  %v3525_v61 = vmul.f32 %v4639_v45, %v3509_v56 }
 0x270   : > { %4672 = shalt.err (!%p4669_p3)
}
 0x271   : > { %s4673_s30 = scalar_lea.hbm %s6798_s13, 1024  ;;  %s4677_s25 = scalar_lea.hbm %s6898_s5, 2048 }
 0x272   : > { %p4674_p4 = scmp.ne.s32.totalorder %s6798_s13, %s4673_s30  ;;  %p4678_p9 = scmp.lt.s32.totalorder %s6798_s13, %s6898_s5 }
 0x273   : > { %p4679_p10 = scmp.lt.s32.totalorder %s4677_s25, %s4673_s30 }
 0x274   : > { %p4675_p7 = pnand %p4674_p4, %p4824_p5 }
 0x275   : > { %p4680_p11 = por %p4679_p10, %p4678_p9 }
 0x276   : > { %p4676_p8 = pneg %p4675_p7 }
 0x278   : > { %p4681_p12 = pnand %p4680_p11, %p4676_p8 }
 0x27a   : > { %4684 = shalt.err (!%p4681_p12)
}
 0x27b   : > { %s4753_s10 = smov 256   ;;  %s4754_s11 = smov 16   ;;  %v4643_v12 = vpop.eup %4642  ;;  %v3505_v8 = vmul.f32 0.5, %v4633_v41  ;;  %v3511_v31 = vadd.f32 0.5, %v3503_v53  ;;  %v3506_v34 = vmul.f32 0.5, %v4637_v15  ;;  %v3512_v6 = vadd.f32 0.5, %v3504_v49 }
 0x27c   : > { %4440 = dma.vmem_to_hbm [thread:$0]  (%p4824_p5), %s6800_s6, 1024, %s6798_s13, %s3555_s9, %s4753_s10, %s4753_s10, %s4754_s11   ;;  %v4645_v62 = vpop.eup %4644  ;;  %v3526_v10 = vmul.f32 %v4643_v12, %v3510_v54  ;;  %v3507_v46 = vmul.f32 0.5, %v4641_v19 }
 0x27d   : > { %s6832_s12 = scalar_lea.vmem [#allocation2], %s3694_s23  ;;  %v4647_v58 = vpop.eup %4646  ;;  %v3513_v0 = vadd.f32 0.5, %v3505_v8  ;;  %v3514_v25 = vadd.f32 0.5, %v3506_v34  ;;  %v3508_v11 = vmul.f32 0.5, %v4645_v62  ;;  %s6847_s9 = scalar_lea.hbm %s6897_s4, %s4052_s26 }
 0x27e   : > { %3533 = vst [vmem:[%s6832_s12] sm:$0xff] %v3525_v61  ;;  %3534 = vst [vmem:[%s6832_s12 + $0x8] sm:$0xff] %v3526_v10  ;;  %v3527_v35 = vmul.f32 %v4647_v58, %v3511_v31  ;;  %v4649_v43 = vpop.eup %4648  ;;  %v3515_v16 = vadd.f32 0.5, %v3507_v46  ;;  %s3568_s23 = sshll.u32 %s6832_s12, 4  ;;  %s3550_s14 = scalar_lea.sflag [#allocation3], %s6757_s17  ;;  %s6849_s23 = int_to_ptr.vmem [resolvable:$true] %s3568_s23 }
 0x27f   : > { %v4651_v14 = vpop.eup %4650  ;;  %v3528_v20 = vmul.f32 %v4649_v43, %v3512_v6  ;;  %v3516_v51 = vadd.f32 0.5, %v3508_v11  ;;  %s4685_s30 = scalar_lea.vmem %s6849_s23, 1024  ;;  %s4755_s15 = smov [#allocation2]  }
 0x280   : > { %3535 = vst [vmem:[%s6832_s12 + $0x10] sm:$0xff] %v3527_v35  ;;  %v3529_v40 = vmul.f32 %v4651_v14, %v3513_v0  ;;  %v4653_v21 = vpop.eup %4652  ;;  %p4686_p13 = scmp.ne.s32.totalorder %s6849_s23, %s4685_s30  ;;  %s4689_s16 = sshll.u32 %s4755_s15, 4  ;;  %s4690_s16 = int_to_ptr.vmem [resolvable:$false] %s4689_s16 }
 0x281   : > { %3536 = vst [vmem:[%s6832_s12 + $0x18] sm:$0xff] %v3528_v20  ;;  %v3530_v63 = vmul.f32 %v4653_v21, %v3514_v25  ;;  %v4655_v33 = vpop.eup %4654  ;;  %s4691_s22 = scalar_lea.vmem %s4690_s16, 2048  ;;  %p4692_p2 = scmp.lt.s32.totalorder %s6849_s23, %s4690_s16 }
 0x282   : > { %3537 = vst [vmem:[%s6832_s12 + $0x20] sm:$0xff] %v3529_v40  ;;  %v3531_v28 = vmul.f32 %v4655_v33, %v3515_v16  ;;  %v4657_v57 = vpop.eup %4656  ;;  %p4687_p0 = pnand %p4686_p13, %p4824_p5  ;;  %p4693_p3 = scmp.lt.s32.totalorder %s4691_s22, %s4685_s30 }
 0x283   : > { %3538 = vst [vmem:[%s6832_s12 + $0x28] sm:$0xff] %v3530_v63  ;;  %v3532_v22 = vmul.f32 %v4657_v57, %v3516_v51 }
 0x284   : > { %3539 = vst [vmem:[%s6832_s12 + $0x30] sm:$0xff] %v3531_v28  ;;  %p4688_p1 = pneg %p4687_p0  ;;  %p4694_p4 = por %p4693_p3, %p4692_p2 }
 0x285   : > { %3540 = vst [vmem:[%s6832_s12 + $0x38] sm:$0xff] %v3532_v22 }
 0x286   : > { %p4695_p7 = pnand %p4694_p4, %p4688_p1 }
 0x288   : > { %4698 = shalt.err (!%p4695_p7)
}
 0x289   : > { %s4699_s26 = scalar_lea.hbm %s6847_s9, 1024  ;;  %s4703_s7 = scalar_lea.hbm %s6897_s4, 2048 }
 0x28a   : > { %p4700_p8 = scmp.ne.s32.totalorder %s6847_s9, %s4699_s26  ;;  %p4704_p11 = scmp.lt.s32.totalorder %s6847_s9, %s6897_s4 }
 0x28b   : > { %p4705_p12 = scmp.lt.s32.totalorder %s4703_s7, %s4699_s26 }
 0x28c   : > { %p4701_p9 = pnand %p4700_p8, %p4824_p5 }
 0x28d   : > { %p4706_p13 = por %p4705_p12, %p4704_p11 }
 0x28e   : > { %p4702_p10 = pneg %p4701_p9 }
 0x290   : > { %p4707_p0 = pnand %p4706_p13, %p4702_p10 }
 0x292   : > { %4710 = shalt.err (!%p4707_p0)
}
 0x293   : > { %4439 = dma.vmem_to_hbm [thread:$0]  (%p4824_p5), %s6849_s23, 1024, %s6847_s9, %s3550_s14, %s4753_s10, %s4753_s10, %s4754_s11  }
 0x294 PF: > { %p4450_p1 = scmp.ge.s32.totalorder %s4749_s21, 2  ;;  %s3599_s6 = sand.u32 1, %s4737_s18  }
 0x295   : > { %s3600_s13 = scalar_lea.sflag [#allocation3], %s3599_s6 }
 0x296   : > { %p4444_p2 = pnand %p4450_p1, %p4828_p6 }
 0x298   : > { %p4445_p3 = pneg %p4444_p2 }
 0x29a   : > { %4728 = dma.done.wait (%p4445_p3), %s3600_s13, 1024  }
 0x29b   : > { %4730 = vsyncadd (%p4445_p3), %s3600_s13, 4294966272  ;;  %s3609_s30 = scalar_lea.sflag [#allocation5], %s3599_s6 }
 0x29c   : > { %4732 = dma.done.wait (%p4445_p3), %s3609_s30, 1024  }
 0x29d   : > { %4734 = vsyncadd (%p4445_p3), %s3609_s30, 4294966272  ;;  %p19_p5 = scmp.ge.s32.totalorder %s4811_s24, 4   ;;  %s7139_s18 = smov %s4741_s19 }
 0x29e   : > { %s7140_s19 = smov %s4745_s20  ;;  %s7141_s20 = smov %s4822_s27 }
 0x29f   : > { %s7142_s21 = smov %s4811_s24  ;;  %21 = sbr.rel (!%p19_p5) target bundleno = 5 (0x5), region = 99 }
 0x2a4   :  { %3614 = vsyncpa [#allocation3], 1 }
 0x2a5   :  { %3616 = vsyncpa [#allocation3 + $0x1], 1 }
 0x2a6   :  { %3617 = vsyncpa [#allocation5], 1 }
 0x2a7   :  { %3619 = vsyncpa [#allocation5 + $0x1], 1 }

</bundles_post_ra>
